<compile_context>
chip_gen: v7x
topology: tpu7x:2x2x1
jax: 0.10.0
libtpu: 0.0.40
codegen_flags: <defaults>
</compile_context>

<pallas_src>
import numpy as np
import jax
import jax.numpy as jnp
from jax.experimental import pallas as pl
from jax.experimental.pallas import tpu as pltpu

C_PAD = 128  # lane-dense channel padding (one full vreg lane width)


def _round_up(x, m):
    return ((x + m - 1) // m) * m


def _pad_cols(a, width=C_PAD):
    a = jnp.asarray(a, jnp.float32)
    return jnp.zeros((a.shape[0], width), jnp.float32).at[:, :a.shape[1]].set(a)


def _pad_vec(v, width=C_PAD):
    v = jnp.asarray(v, jnp.float32)
    return jnp.zeros((1, width), jnp.float32).at[:, :v.shape[0]].set(v)


# ---- static (trace-time) one-hot selection matrices -------------------------

def _stacked_onehot(src_maps, n_src, block_rows):
    """One (block_rows, n_src) one-hot block per offset/tap, row-padded with
    all-zero rows so every block is (8,128)-tile aligned, stacked on rows."""
    blocks = []
    for src in src_maps:
        m = np.zeros((block_rows, n_src), np.float32)
        m[np.arange(src.size), src] = 1.0
        blocks.append(m)
    return np.concatenate(blocks, axis=0)


def _pool_src_maps(n, h_in, w_in):
    # MaxPool2d(2,2), floor mode: out[n,i,j] = max over rows (2i+a, 2j+b)
    h_out, w_out = h_in // 2, w_in // 2
    maps = []
    for ah in (0, 1):
        for aw in (0, 1):
            nn, ii, jj = np.meshgrid(np.arange(n), np.arange(h_out),
                                     np.arange(w_out), indexing="ij")
            maps.append((nn * h_in * w_in + (2 * ii + ah) * w_in
                         + (2 * jj + aw)).reshape(-1))
    return maps


def _conv2x2_src_maps(n, h_in, w_in):
    # 2x2 valid-conv im2col: tap (bh, bw) reads source row (p+bh, q+bw)
    h_out, w_out = h_in - 1, w_in - 1
    maps = []
    for bh in (0, 1):
        for bw in (0, 1):
            nn, pp, qq = np.meshgrid(np.arange(n), np.arange(h_out),
                                     np.arange(w_out), indexing="ij")
            maps.append((nn * h_in * w_in + (pp + bh) * w_in
                         + (qq + bw)).reshape(-1))
    return maps


# --------------------------------- model -------------------------------------

def init_params(n_channels, n_classes, key):
    ks = jax.random.split(key, 6)

    def w_init(k, shape, fan_in):
        return jax.random.normal(k, shape, jnp.float32) * (1.0 / jnp.sqrt(fan_in))

    return {
        # conv_1: Conv2d(n_channels, 12, k=2) + BN(12); K-order = (kh, kw, c_in)
        "w1": w_init(ks[0], (4 * n_channels, 12), 4 * n_channels),
        "b1": w_init(ks[1], (12,), 4 * n_channels),
        "g1": jnp.ones((12,), jnp.float32),
        "be1": jnp.zeros((12,), jnp.float32),
        # conv_2: Conv2d(12, 24, k=2) + BN(24); K-order = (kh, kw, c_in)
        "w2": w_init(ks[2], (4 * 12, 24), 4 * 12),
        "b2": w_init(ks[3], (24,), 4 * 12),
        "g2": jnp.ones((24,), jnp.float32),
        "be2": jnp.zeros((24,), jnp.float32),
        # flaten: Conv2d(24, n_classes, k=1)
        "w3": w_init(ks[4], (24, n_classes), 24),
        "b3": w_init(ks[5], (n_classes,), 24),
    }


def simple_cnn_forward(x_nchw, params):
    N, C_in, H, W = x_nchw.shape
    c1 = params["w1"].shape[1]            # 12
    c2 = params["w2"].shape[1]            # 24
    n_classes = params["w3"].shape[1]

    # ---------------- static layer geometry ----------------
    Ho1, Wo1 = H - 1, W - 1               # conv_1 output  (15, 15)
    Hp1, Wp1 = Ho1 // 2, Wo1 // 2         # pool_1 output  (7, 7)
    Ho2, Wo2 = Hp1 - 1, Wp1 - 1           # conv_2 output  (6, 6)
    Hp2, Wp2 = Ho2 // 2, Wo2 // 2         # pool_2 output  (3, 3)
    M1 = N * Ho1 * Wo1                    # 450 real conv_1 rows
    Mp1 = N * Hp1 * Wp1                   # 98
    M2 = N * Ho2 * Wo2                    # 72
    Mp2 = N * Hp2 * Wp2                   # 18
    K1 = 4 * C_in                         # conv_1 im2col K (16)

    # Tile-aligned row counts: row counts that feed a later matmul as its
    # K (lane) dim are padded to 128, pure M dims to 8.  Padded rows are
    # exactly zero and never selected by the one-hot matrices.
    M1P = _round_up(M1, 128)              # 512  (y1 rows = sel1 K)
    P1B = _round_up(Mp1, 128)             # 128  (p1 rows = sel2 K)
    M2B = _round_up(M2, 128)              # 128  (y2 rows = sel3 K)
    P2B = _round_up(Mp2, 8)               # 24   (p2 / output rows)

    # ---- input glue: NCHW->NHWC + conv_1 im2col (tiny XLA pre-fusion) -------
    xt = jnp.transpose(x_nchw, (0, 2, 3, 1)).astype(jnp.float32)
    patches = jnp.concatenate(
        [xt[:, dy:dy + Ho1, dx:dx + Wo1, :] for dy in (0, 1) for dx in (0, 1)],
        axis=-1)                                       # (N, Ho1, Wo1, 4*C_in)
    xm = jnp.zeros((M1P, K1), jnp.float32).at[:M1, :].set(
        patches.reshape(M1, K1))

    # ---- parameters padded to a lane-dense 128-wide layout ------------------
    # (training-mode BN subtracts the batch mean, which cancels the conv bias
    #  exactly, so b1/b2 are mathematically irrelevant and not passed)
    w1p = _pad_cols(params["w1"])                      # (K1, 128)
    g1p, be1p = _pad_vec(params["g1"]), _pad_vec(params["be1"])
    w2 = jnp.asarray(params["w2"], jnp.float32)
    w2cat = jnp.zeros((4 * C_PAD, C_PAD), jnp.float32)
    for t in range(4):                                 # stacked per-tap blocks
        w2cat = w2cat.at[t * C_PAD:t * C_PAD + c1, :c2].set(
            w2[t * c1:(t + 1) * c1, :])
    g2p, be2p = _pad_vec(params["g2"]), _pad_vec(params["be2"])
    w3p = jnp.zeros((C_PAD, C_PAD), jnp.float32).at[:c2, :n_classes].set(
        jnp.asarray(params["w3"], jnp.float32))
    b3p = _pad_vec(params["b3"])

    # ---- precomputed one-hot selection matrices (trace-time constants) ------
    sel1 = jnp.asarray(_stacked_onehot(_pool_src_maps(N, Ho1, Wo1), M1P, P1B))
    sel2 = jnp.asarray(_stacked_onehot(_conv2x2_src_maps(N, Hp1, Wp1), P1B, M2B))
    sel3 = jnp.asarray(_stacked_onehot(_pool_src_maps(N, Ho2, Wo2), M2B, P2B))

    # --------------------------- the fused kernel ----------------------------
    def kernel(xm_ref, w1_ref, g1_ref, be1_ref,
               w2_ref, g2_ref, be2_ref, w3_ref, b3_ref,
               sel1_ref, sel2_ref, sel3_ref, o_ref):
        f32 = jnp.float32

        def bn_relu(z, g, be, inv_n):
            # Training-mode BN folded into one per-channel affine.  Single
            # pass: sum and sum-of-squares (padded rows are exactly zero, the
            # divisor is the real row count).
            s = jnp.sum(z, axis=0, keepdims=True)
            sq = jnp.sum(z * z, axis=0, keepdims=True)
            mean = s * inv_n
            var = sq * inv_n - mean * mean
            scale = g * jax.lax.rsqrt(var + 1e-5)
            shift = be - mean * scale
            return jnp.maximum(z * scale + shift, 0.0)

        def max4(x, blk):
            # MaxPool over the 4 tile-aligned offset row-blocks.
            return jnp.maximum(
                jnp.maximum(x[0 * blk:1 * blk], x[1 * blk:2 * blk]),
                jnp.maximum(x[2 * blk:3 * blk], x[3 * blk:4 * blk]))

        # conv_1 (2x2) + BN + ReLU
        z1 = jnp.dot(xm_ref[...], w1_ref[...], preferred_element_type=f32)
        y1 = bn_relu(z1, g1_ref[...], be1_ref[...], 1.0 / M1)        # (M1P,128)

        # pool_1: one fused selection matmul + max over its 4 row blocks
        p1 = max4(jnp.dot(sel1_ref[...], y1, preferred_element_type=f32), P1B)

        # conv_2 (2x2): fused 4-tap gather, lane-aligned concat, one K=512 dot
        gat = jnp.dot(sel2_ref[...], p1, preferred_element_type=f32)  # (4*M2B,128)
        im2col = jnp.concatenate(
            [gat[t * M2B:(t + 1) * M2B] for t in range(4)], axis=-1)  # (M2B,512)
        z2 = jnp.dot(im2col, w2_ref[...], preferred_element_type=f32)
        y2 = bn_relu(z2, g2_ref[...], be2_ref[...], 1.0 / M2)         # (M2B,128)

        # pool_2
        p2 = max4(jnp.dot(sel3_ref[...], y2, preferred_element_type=f32), P2B)

        # flaten (1x1 conv) + sigmoid (tanh form: stable, runs on the EUP)
        y3 = jnp.dot(p2, w3_ref[...], preferred_element_type=f32) + b3_ref[...]
        o_ref[...] = 0.5 * jnp.tanh(0.5 * y3) + 0.5

    vmem = pl.BlockSpec(memory_space=pltpu.MemorySpace.VMEM)
    flops = 2 * (M1P * K1 * C_PAD + 4 * P1B * M1P * C_PAD
                 + 4 * M2B * P1B * C_PAD + M2B * 4 * C_PAD * C_PAD
                 + 4 * P2B * M2B * C_PAD + P2B * C_PAD * C_PAD)
    in_bytes = 4 * (M1P * K1 + K1 * C_PAD + 5 * C_PAD + 4 * C_PAD * C_PAD
                    + C_PAD * C_PAD + 4 * P1B * M1P + 4 * M2B * P1B
                    + 4 * P2B * M2B)

    out = pl.pallas_call(
        kernel,
        out_shape=jax.ShapeDtypeStruct((P2B, C_PAD), jnp.float32),
        in_specs=[vmem] * 12,
        out_specs=vmem,
        cost_estimate=pl.CostEstimate(
            flops=int(flops),
            transcendentals=int(2 * C_PAD + P2B * C_PAD),
            bytes_accessed=int(in_bytes + 4 * P2B * C_PAD)),
    )(xm, w1p, g1p, be1p, w2cat, g2p, be2p, w3p, b3p, sel1, sel2, sel3)

    # Output glue: drop row/lane padding, NHWC -> NCHW, torch.squeeze.
    out = out[:Mp2, :n_classes].reshape(N, Hp2, Wp2, n_classes)
    out = jnp.transpose(out, (0, 3, 1, 2))
    return jnp.squeeze(out)


if __name__ == "__main__":
    key = jax.random.PRNGKey(0)
    k_x, k_p = jax.random.split(key)

    n_channels, n_classes = 4, 3
    x = jax.random.normal(k_x, (2, n_channels, 16, 16), jnp.float32)  # NCHW
    params = init_params(n_channels, n_classes, k_p)

    fwd = jax.jit(simple_cnn_forward)
    out = fwd(x, params)
    jax.block_until_ready(out)

    # shape chain: (2,4,16,16) -> conv2 (2,12,15,15) -> pool (2,12,7,7)
    #              -> conv2 (2,24,6,6) -> pool (2,24,3,3) -> 1x1 (2,3,3,3)
    assert out.shape == (2, n_classes, 3, 3), out.shape
    assert bool(jnp.all(jnp.isfinite(out)))
    assert bool(jnp.all((out >= 0.0) & (out <= 1.0)))
    print("KERNEL_OK")
</pallas_src>

<mosaic_0001>
module attributes {stable_mosaic.version = 11 : i64} {
  func.func @kernel(%arg0: memref<512x16xf32, #tpu.memory_space<vmem>>, %arg1: memref<16x128xf32, #tpu.memory_space<vmem>>, %arg2: memref<1x128xf32, #tpu.memory_space<vmem>>, %arg3: memref<1x128xf32, #tpu.memory_space<vmem>>, %arg4: memref<512x128xf32, #tpu.memory_space<vmem>>, %arg5: memref<1x128xf32, #tpu.memory_space<vmem>>, %arg6: memref<1x128xf32, #tpu.memory_space<vmem>>, %arg7: memref<128x128xf32, #tpu.memory_space<vmem>>, %arg8: memref<1x128xf32, #tpu.memory_space<vmem>>, %arg9: memref<512x512xf32, #tpu.memory_space<vmem>>, %arg10: memref<512x128xf32, #tpu.memory_space<vmem>>, %arg11: memref<96x128xf32, #tpu.memory_space<vmem>>, %arg12: memref<24x128xf32, #tpu.memory_space<vmem>>) attributes {dimension_semantics = [], scalar_prefetch = 0 : i64, scratch_operands = 0 : i64, tpu.core_type = #tpu.core_type<tc>} {
    %c0 = arith.constant 0 : index
    %c0_0 = arith.constant 0 : index
    %0 = vector.load %arg0[%c0, %c0_0] : memref<512x16xf32, #tpu.memory_space<vmem>>, vector<512x16xf32>
    %c0_1 = arith.constant 0 : index
    %c0_2 = arith.constant 0 : index
    %1 = vector.load %arg1[%c0_1, %c0_2] : memref<16x128xf32, #tpu.memory_space<vmem>>, vector<16x128xf32>
    %cst = arith.constant dense<0.000000e+00> : vector<512x128xf32>
    %2 = tpu.matmul %0, %1, %cst {dimension_numbers = #tpu.dot_dimension_numbers<[1], [0], [0], [1], [0, 0, 1, 1], [], []>} : vector<512x16xf32>, vector<16x128xf32>, vector<512x128xf32> -> vector<512x128xf32>
    %c0_3 = arith.constant 0 : index
    %c0_4 = arith.constant 0 : index
    %3 = vector.load %arg2[%c0_3, %c0_4] : memref<1x128xf32, #tpu.memory_space<vmem>>, vector<1x128xf32>
    %c0_5 = arith.constant 0 : index
    %c0_6 = arith.constant 0 : index
    %4 = vector.load %arg3[%c0_5, %c0_6] : memref<1x128xf32, #tpu.memory_space<vmem>>, vector<1x128xf32>
    %cst_7 = arith.constant dense<0.000000e+00> : vector<128xf32>
    %5 = vector.multi_reduction <add>, %2, %cst_7 [0] : vector<512x128xf32> to vector<128xf32>
    %6 = vector.shape_cast %5 : vector<128xf32> to vector<1x128xf32>
    %7 = arith.mulf %2, %2 : vector<512x128xf32>
    %cst_8 = arith.constant dense<0.000000e+00> : vector<128xf32>
    %8 = vector.multi_reduction <add>, %7, %cst_8 [0] : vector<512x128xf32> to vector<128xf32>
    %9 = vector.shape_cast %8 : vector<128xf32> to vector<1x128xf32>
    %cst_9 = arith.constant 0.00222222228 : f32
    %10 = vector.broadcast %cst_9 : f32 to vector<1x128xf32>
    %11 = arith.mulf %6, %10 : vector<1x128xf32>
    %cst_10 = arith.constant 0.00222222228 : f32
    %12 = vector.broadcast %cst_10 : f32 to vector<1x128xf32>
    %13 = arith.mulf %9, %12 : vector<1x128xf32>
    %14 = arith.mulf %11, %11 : vector<1x128xf32>
    %15 = arith.subf %13, %14 : vector<1x128xf32>
    %cst_11 = arith.constant 9.99999974E-6 : f32
    %16 = vector.broadcast %cst_11 : f32 to vector<1x128xf32>
    %17 = arith.addf %15, %16 : vector<1x128xf32>
    %18 = math.rsqrt %17 : vector<1x128xf32>
    %19 = arith.mulf %3, %18 : vector<1x128xf32>
    %20 = arith.mulf %11, %19 : vector<1x128xf32>
    %21 = arith.subf %4, %20 : vector<1x128xf32>
    %22 = vector.broadcast %19 : vector<1x128xf32> to vector<512x128xf32>
    %23 = arith.mulf %2, %22 : vector<512x128xf32>
    %24 = vector.broadcast %21 : vector<1x128xf32> to vector<512x128xf32>
    %25 = arith.addf %23, %24 : vector<512x128xf32>
    %cst_12 = arith.constant 0.000000e+00 : f32
    %26 = vector.broadcast %cst_12 : f32 to vector<512x128xf32>
    %27 = arith.maximumf %25, %26 : vector<512x128xf32>
    %c0_13 = arith.constant 0 : index
    %c0_14 = arith.constant 0 : index
    %28 = vector.load %arg9[%c0_13, %c0_14] : memref<512x512xf32, #tpu.memory_space<vmem>>, vector<512x512xf32>
    %cst_15 = arith.constant dense<0.000000e+00> : vector<512x128xf32>
    %29 = tpu.matmul %28, %27, %cst_15 {dimension_numbers = #tpu.dot_dimension_numbers<[1], [0], [0], [1], [0, 0, 1, 1], [], []>} : vector<512x512xf32>, vector<512x128xf32>, vector<512x128xf32> -> vector<512x128xf32>
    %30 = vector.extract_strided_slice %29 {offsets = [0, 0], sizes = [128, 128], strides = [1, 1]} : vector<512x128xf32> to vector<128x128xf32>
    %31 = vector.extract_strided_slice %29 {offsets = [128, 0], sizes = [128, 128], strides = [1, 1]} : vector<512x128xf32> to vector<128x128xf32>
    %32 = arith.maximumf %30, %31 : vector<128x128xf32>
    %33 = vector.extract_strided_slice %29 {offsets = [256, 0], sizes = [128, 128], strides = [1, 1]} : vector<512x128xf32> to vector<128x128xf32>
    %34 = vector.extract_strided_slice %29 {offsets = [384, 0], sizes = [128, 128], strides = [1, 1]} : vector<512x128xf32> to vector<128x128xf32>
    %35 = arith.maximumf %33, %34 : vector<128x128xf32>
    %36 = arith.maximumf %32, %35 : vector<128x128xf32>
    %c0_16 = arith.constant 0 : index
    %c0_17 = arith.constant 0 : index
    %37 = vector.load %arg10[%c0_16, %c0_17] : memref<512x128xf32, #tpu.memory_space<vmem>>, vector<512x128xf32>
    %cst_18 = arith.constant dense<0.000000e+00> : vector<512x128xf32>
    %38 = tpu.matmul %37, %36, %cst_18 {dimension_numbers = #tpu.dot_dimension_numbers<[1], [0], [0], [1], [0, 0, 1, 1], [], []>} : vector<512x128xf32>, vector<128x128xf32>, vector<512x128xf32> -> vector<512x128xf32>
    %39 = vector.extract_strided_slice %38 {offsets = [0, 0], sizes = [128, 128], strides = [1, 1]} : vector<512x128xf32> to vector<128x128xf32>
    %40 = vector.extract_strided_slice %38 {offsets = [128, 0], sizes = [128, 128], strides = [1, 1]} : vector<512x128xf32> to vector<128x128xf32>
    %41 = vector.extract_strided_slice %38 {offsets = [256, 0], sizes = [128, 128], strides = [1, 1]} : vector<512x128xf32> to vector<128x128xf32>
    %42 = vector.extract_strided_slice %38 {offsets = [384, 0], sizes = [128, 128], strides = [1, 1]} : vector<512x128xf32> to vector<128x128xf32>
    %43 = tpu.concatenate %39, %40, %41, %42 in 1 : vector<128x128xf32>, vector<128x128xf32>, vector<128x128xf32>, vector<128x128xf32> -> vector<128x512xf32>
    %c0_19 = arith.constant 0 : index
    %c0_20 = arith.constant 0 : index
    %44 = vector.load %arg4[%c0_19, %c0_20] : memref<512x128xf32, #tpu.memory_space<vmem>>, vector<512x128xf32>
    %cst_21 = arith.constant dense<0.000000e+00> : vector<128x128xf32>
    %45 = tpu.matmul %43, %44, %cst_21 {dimension_numbers = #tpu.dot_dimension_numbers<[1], [0], [0], [1], [0, 0, 1, 1], [], []>} : vector<128x512xf32>, vector<512x128xf32>, vector<128x128xf32> -> vector<128x128xf32>
    %c0_22 = arith.constant 0 : index
    %c0_23 = arith.constant 0 : index
    %46 = vector.load %arg5[%c0_22, %c0_23] : memref<1x128xf32, #tpu.memory_space<vmem>>, vector<1x128xf32>
    %c0_24 = arith.constant 0 : index
    %c0_25 = arith.constant 0 : index
    %47 = vector.load %arg6[%c0_24, %c0_25] : memref<1x128xf32, #tpu.memory_space<vmem>>, vector<1x128xf32>
    %cst_26 = arith.constant dense<0.000000e+00> : vector<128xf32>
    %48 = vector.multi_reduction <add>, %45, %cst_26 [0] : vector<128x128xf32> to vector<128xf32>
    %49 = vector.shape_cast %48 : vector<128xf32> to vector<1x128xf32>
    %50 = arith.mulf %45, %45 : vector<128x128xf32>
    %cst_27 = arith.constant dense<0.000000e+00> : vector<128xf32>
    %51 = vector.multi_reduction <add>, %50, %cst_27 [0] : vector<128x128xf32> to vector<128xf32>
    %52 = vector.shape_cast %51 : vector<128xf32> to vector<1x128xf32>
    %cst_28 = arith.constant 0.013888889 : f32
    %53 = vector.broadcast %cst_28 : f32 to vector<1x128xf32>
    %54 = arith.mulf %49, %53 : vector<1x128xf32>
    %cst_29 = arith.constant 0.013888889 : f32
    %55 = vector.broadcast %cst_29 : f32 to vector<1x128xf32>
    %56 = arith.mulf %52, %55 : vector<1x128xf32>
    %57 = arith.mulf %54, %54 : vector<1x128xf32>
    %58 = arith.subf %56, %57 : vector<1x128xf32>
    %cst_30 = arith.constant 9.99999974E-6 : f32
    %59 = vector.broadcast %cst_30 : f32 to vector<1x128xf32>
    %60 = arith.addf %58, %59 : vector<1x128xf32>
    %61 = math.rsqrt %60 : vector<1x128xf32>
    %62 = arith.mulf %46, %61 : vector<1x128xf32>
    %63 = arith.mulf %54, %62 : vector<1x128xf32>
    %64 = arith.subf %47, %63 : vector<1x128xf32>
    %65 = vector.broadcast %62 : vector<1x128xf32> to vector<128x128xf32>
    %66 = arith.mulf %45, %65 : vector<128x128xf32>
    %67 = vector.broadcast %64 : vector<1x128xf32> to vector<128x128xf32>
    %68 = arith.addf %66, %67 : vector<128x128xf32>
    %cst_31 = arith.constant 0.000000e+00 : f32
    %69 = vector.broadcast %cst_31 : f32 to vector<128x128xf32>
    %70 = arith.maximumf %68, %69 : vector<128x128xf32>
    %c0_32 = arith.constant 0 : index
    %c0_33 = arith.constant 0 : index
    %71 = vector.load %arg11[%c0_32, %c0_33] : memref<96x128xf32, #tpu.memory_space<vmem>>, vector<96x128xf32>
    %cst_34 = arith.constant dense<0.000000e+00> : vector<96x128xf32>
    %72 = tpu.matmul %71, %70, %cst_34 {dimension_numbers = #tpu.dot_dimension_numbers<[1], [0], [0], [1], [0, 0, 1, 1], [], []>} : vector<96x128xf32>, vector<128x128xf32>, vector<96x128xf32> -> vector<96x128xf32>
    %73 = vector.extract_strided_slice %72 {offsets = [0, 0], sizes = [24, 128], strides = [1, 1]} : vector<96x128xf32> to vector<24x128xf32>
    %74 = vector.extract_strided_slice %72 {offsets = [24, 0], sizes = [24, 128], strides = [1, 1]} : vector<96x128xf32> to vector<24x128xf32>
    %75 = arith.maximumf %73, %74 : vector<24x128xf32>
    %76 = vector.extract_strided_slice %72 {offsets = [48, 0], sizes = [24, 128], strides = [1, 1]} : vector<96x128xf32> to vector<24x128xf32>
    %77 = vector.extract_strided_slice %72 {offsets = [72, 0], sizes = [24, 128], strides = [1, 1]} : vector<96x128xf32> to vector<24x128xf32>
    %78 = arith.maximumf %76, %77 : vector<24x128xf32>
    %79 = arith.maximumf %75, %78 : vector<24x128xf32>
    %c0_35 = arith.constant 0 : index
    %c0_36 = arith.constant 0 : index
    %80 = vector.load %arg7[%c0_35, %c0_36] : memref<128x128xf32, #tpu.memory_space<vmem>>, vector<128x128xf32>
    %cst_37 = arith.constant dense<0.000000e+00> : vector<24x128xf32>
    %81 = tpu.matmul %79, %80, %cst_37 {dimension_numbers = #tpu.dot_dimension_numbers<[1], [0], [0], [1], [0, 0, 1, 1], [], []>} : vector<24x128xf32>, vector<128x128xf32>, vector<24x128xf32> -> vector<24x128xf32>
    %c0_38 = arith.constant 0 : index
    %c0_39 = arith.constant 0 : index
    %82 = vector.load %arg8[%c0_38, %c0_39] : memref<1x128xf32, #tpu.memory_space<vmem>>, vector<1x128xf32>
    %83 = vector.broadcast %82 : vector<1x128xf32> to vector<24x128xf32>
    %84 = arith.addf %81, %83 : vector<24x128xf32>
    %cst_40 = arith.constant 5.000000e-01 : f32
    %85 = vector.broadcast %cst_40 : f32 to vector<24x128xf32>
    %86 = arith.mulf %85, %84 : vector<24x128xf32>
    %87 = math.tanh %86 : vector<24x128xf32>
    %cst_41 = arith.constant 5.000000e-01 : f32
    %88 = vector.broadcast %cst_41 : f32 to vector<24x128xf32>
    %89 = arith.mulf %88, %87 : vector<24x128xf32>
    %cst_42 = arith.constant 5.000000e-01 : f32
    %90 = vector.broadcast %cst_42 : f32 to vector<24x128xf32>
    %91 = arith.addf %89, %90 : vector<24x128xf32>
    %c0_43 = arith.constant 0 : index
    %c0_44 = arith.constant 0 : index
    %92 = vector.load %arg12[%c0_43, %c0_44] : memref<24x128xf32, #tpu.memory_space<vmem>>, vector<24x128xf32>
    tpu.vector_store %arg12[%c0_43, %c0_44], %91 {strides = array<i32>} : memref<24x128xf32, #tpu.memory_space<vmem>>, vector<24x128xf32>,
    return
  }
}

</mosaic_0001>

<bundles_post_ra>
// kernel: simple_cnn_forward.1
= control target key start
LH: loop header
LB: loop body
LE: loop exit
PB: predicated region body
PF: predicated region fallthrough
CT: control target
= control target key end

     0   :  { %vm107_vm0 = vcmask 130048   ;;  %vm4521_vm1 = vmmov 0   ;;  %s7504_s1 = inlined_call_operand.vmem [shape: f32[16,128], index: 1, kind: input, shape index: {}]   ;;  %s7505_s0 = inlined_call_operand.vmem [shape: f32[512,16], index: 0, kind: input, shape index: {}]   ;;  %s7506_s9 = inlined_call_operand.vmem [shape: f32[512,512], index: 9, kind: input, shape index: {}]   ;;  %s7507_s2 = inlined_call_operand.vmem [shape: f32[1,128], index: 2, kind: input, shape index: {}]   ;;  %s7508_s3 = inlined_call_operand.vmem [shape: f32[1,128], index: 3, kind: input, shape index: {}]   ;;  %s7509_s10 = inlined_call_operand.vmem [shape: f32[512,128], index: 10, kind: input, shape index: {}]   ;;  %s7510_s4 = inlined_call_operand.vmem [shape: f32[512,128], index: 4, kind: input, shape index: {}]   ;;  %s7511_s11 = inlined_call_operand.vmem [shape: f32[96,128], index: 11, kind: input, shape index: {}]   ;;  %s7512_s5 = inlined_call_operand.vmem [shape: f32[1,128], index: 5, kind: input, shape index: {}]   ;;  %s7513_s6 = inlined_call_operand.vmem [shape: f32[1,128], index: 6, kind: input, shape index: {}]   ;;  %s7514_s7 = inlined_call_operand.vmem [shape: f32[128,128], index: 7, kind: input, shape index: {}]   ;;  %s7515_s8 = inlined_call_operand.vmem [shape: f32[1,128], index: 8, kind: input, shape index: {}]   ;;  %s7516_s12 = inlined_call_operand.vmem [shape: f32[24,128], index: 12, kind: output, shape index: {}]  }
   0x1   :  { %v105_v0 = vld [vmem:[%s7504_s1] sm:$0xff]  ;;  %v106_v1 = vld [vmem:[%s7504_s1 + $0x8] sm:$0xff]  ;;  %v43_v5 = vld [vmem:[%s7505_s0 + $0x10] sm:$0xff] }
   0x2   :  { %v41_v2 = vld [vmem:[%s7505_s0] sm:$0xff]  ;;  %v4113_v3 = vpack.c.bf16 %v106_v1, %v105_v0  ;;  %v42_v4 = vld [vmem:[%s7505_s0 + $0x8] sm:$0xff]  ;;  %v44_v6 = vld [vmem:[%s7505_s0 + $0x18] sm:$0xff] }
   0x3   :  { %3798 = vmatprep.mubr.msk.f32.mxu0 %vm107_vm0, %v41_v2  ;;  %v45_v7 = vld [vmem:[%s7505_s0 + $0x20] sm:$0xff]  ;;  %v46_v8 = vld [vmem:[%s7505_s0 + $0x28] sm:$0xff]  ;;  %v47_v9 = vld [vmem:[%s7505_s0 + $0x30] sm:$0xff] }
   0x4   :  { %4114 = vmatprep.subr.bf16.mxu0 %v4113_v3  ;;  %v48_v10 = vld [vmem:[%s7505_s0 + $0x38] sm:$0xff]  ;;  %v49_v11 = vld [vmem:[%s7505_s0 + $0x40] sm:$0xff]  ;;  %v50_v12 = vld [vmem:[%s7505_s0 + $0x48] sm:$0xff] }
   0x5   :  { %4116 = vmatpush3.bf16.msra.mxu0 %v4113_v3  ;;  %v51_v13 = vld [vmem:[%s7505_s0 + $0x50] sm:$0xff]  ;;  %v52_v14 = vld [vmem:[%s7505_s0 + $0x58] sm:$0xff]  ;;  %v53_v15 = vld [vmem:[%s7505_s0 + $0x60] sm:$0xff] }
   0x6   :  { %v54_v16 = vld [vmem:[%s7505_s0 + $0x68] sm:$0xff]  ;;  %v55_v17 = vld [vmem:[%s7505_s0 + $0x70] sm:$0xff]  ;;  %v56_v18 = vld [vmem:[%s7505_s0 + $0x78] sm:$0xff] }
   0x7   :  { %v57_v19 = vld [vmem:[%s7505_s0 + $0x80] sm:$0xff]  ;;  %v58_v20 = vld [vmem:[%s7505_s0 + $0x88] sm:$0xff]  ;;  %v59_v21 = vld [vmem:[%s7505_s0 + $0x90] sm:$0xff] }
   0x8   :  { %3799 = vmatmul.mubr.msk.f32.vlgmr.msra.gmra.mrb[0].mxu0 %vm107_vm0, %v42_v4  ;;  %v60_v22 = vld [vmem:[%s7505_s0 + $0x98] sm:$0xff]  ;;  %v61_v23 = vld [vmem:[%s7505_s0 + $0xa0] sm:$0xff]  ;;  %v62_v24 = vld [vmem:[%s7505_s0 + $0xa8] sm:$0xff] }
   0x9   :  { %3801 = vmatprep.mubr.msk.f32.mxu0 %vm107_vm0, %v43_v5  ;;  %v63_v25 = vld [vmem:[%s7505_s0 + $0xb0] sm:$0xff]  ;;  %v64_v26 = vld [vmem:[%s7505_s0 + $0xb8] sm:$0xff]  ;;  %v65_v27 = vld [vmem:[%s7505_s0 + $0xc0] sm:$0xff] }
   0xa   :  { %v66_v28 = vld [vmem:[%s7505_s0 + $0xc8] sm:$0xff]  ;;  %v67_v29 = vld [vmem:[%s7505_s0 + $0xd0] sm:$0xff]  ;;  %v68_v30 = vld [vmem:[%s7505_s0 + $0xd8] sm:$0xff] }
   0xb   :  { %v69_v31 = vld [vmem:[%s7505_s0 + $0xe0] sm:$0xff]  ;;  %v70_v32 = vld [vmem:[%s7505_s0 + $0xe8] sm:$0xff]  ;;  %v71_v33 = vld [vmem:[%s7505_s0 + $0xf0] sm:$0xff] }
   0xc   :  { %3802 = vmatmul.mubr.msk.f32.gmra.mrb[2].mxu0 %vm107_vm0, %v44_v6  ;;  %v72_v34 = vld [vmem:[%s7505_s0 + $0xf8] sm:$0xff]  ;;  %v73_v35 = vld [vmem:[%s7505_s0 + $0x100] sm:$0xff]  ;;  %v74_v36 = vld [vmem:[%s7505_s0 + $0x108] sm:$0xff] }
   0xd   :  { %3804 = vmatprep.mubr.msk.f32.mxu0 %vm107_vm0, %v45_v7  ;;  %v75_v37 = vld [vmem:[%s7505_s0 + $0x110] sm:$0xff]  ;;  %v76_v38 = vld [vmem:[%s7505_s0 + $0x118] sm:$0xff]  ;;  %v77_v39 = vld [vmem:[%s7505_s0 + $0x120] sm:$0xff] }
   0xe   :  { %v78_v40 = vld [vmem:[%s7505_s0 + $0x128] sm:$0xff]  ;;  %v79_v41 = vld [vmem:[%s7505_s0 + $0x130] sm:$0xff]  ;;  %v80_v42 = vld [vmem:[%s7505_s0 + $0x138] sm:$0xff] }
   0xf   :  { %v81_v43 = vld [vmem:[%s7505_s0 + $0x140] sm:$0xff]  ;;  %v82_v44 = vld [vmem:[%s7505_s0 + $0x148] sm:$0xff]  ;;  %v83_v45 = vld [vmem:[%s7505_s0 + $0x150] sm:$0xff] }
  0x10   :  { %3805 = vmatmul.mubr.msk.f32.gmra.mrb[4].mxu0 %vm107_vm0, %v46_v8  ;;  %v84_v46 = vld [vmem:[%s7505_s0 + $0x158] sm:$0xff]  ;;  %v85_v47 = vld [vmem:[%s7505_s0 + $0x160] sm:$0xff]  ;;  %v86_v48 = vld [vmem:[%s7505_s0 + $0x168] sm:$0xff] }
  0x11   :  { %3807 = vmatprep.mubr.msk.f32.mxu0 %vm107_vm0, %v47_v9  ;;  %v87_v49 = vld [vmem:[%s7505_s0 + $0x170] sm:$0xff]  ;;  %v88_v50 = vld [vmem:[%s7505_s0 + $0x178] sm:$0xff]  ;;  %v89_v51 = vld [vmem:[%s7505_s0 + $0x180] sm:$0xff] }
  0x12   :  { %v90_v52 = vld [vmem:[%s7505_s0 + $0x188] sm:$0xff]  ;;  %v91_v53 = vld [vmem:[%s7505_s0 + $0x190] sm:$0xff]  ;;  %v92_v54 = vld [vmem:[%s7505_s0 + $0x198] sm:$0xff] }
  0x13   :  { %v93_v55 = vld [vmem:[%s7505_s0 + $0x1a0] sm:$0xff]  ;;  %v94_v56 = vld [vmem:[%s7505_s0 + $0x1a8] sm:$0xff]  ;;  %v95_v57 = vld [vmem:[%s7505_s0 + $0x1b0] sm:$0xff] }
  0x14   :  { %3808 = vmatmul.mubr.msk.f32.gmra.mrb[6].mxu0 %vm107_vm0, %v48_v10  ;;  %v96_v58 = vld [vmem:[%s7505_s0 + $0x1b8] sm:$0xff]  ;;  %v97_v59 = vld [vmem:[%s7505_s0 + $0x1c0] sm:$0xff]  ;;  %v98_v60 = vld [vmem:[%s7505_s0 + $0x1c8] sm:$0xff] }
  0x15   :  { %3810 = vmatprep.mubr.msk.f32.mxu0 %vm107_vm0, %v49_v11  ;;  %v99_v61 = vld [vmem:[%s7505_s0 + $0x1d0] sm:$0xff]  ;;  %v100_v62 = vld [vmem:[%s7505_s0 + $0x1d8] sm:$0xff]  ;;  %v101_v63 = vld [vmem:[%s7505_s0 + $0x1e0] sm:$0xff] }
  0x16   :  { %v102_v0 = vld [vmem:[%s7505_s0 + $0x1e8] sm:$0xff]  ;;  %v103_v1 = vld [vmem:[%s7505_s0 + $0x1f0] sm:$0xff]  ;;  %v104_v2 = vld [vmem:[%s7505_s0 + $0x1f8] sm:$0xff] }
  0x18   :  { %3811 = vmatmul.mubr.msk.f32.gmra.mrb[8].mxu0 %vm107_vm0, %v50_v12 }
  0x19   :  { %3813 = vmatprep.mubr.msk.f32.mxu0 %vm107_vm0, %v51_v13 }
  0x1c   :  { %3814 = vmatmul.mubr.msk.f32.gmra.mrb[10].mxu0 %vm107_vm0, %v52_v14 }
  0x1d   :  { %3816 = vmatprep.mubr.msk.f32.mxu0 %vm107_vm0, %v53_v15 }
  0x20   :  { %3817 = vmatmul.mubr.msk.f32.gmra.mrb[12].mxu0 %vm107_vm0, %v54_v16 }
  0x21   :  { %3819 = vmatprep.mubr.msk.f32.mxu0 %vm107_vm0, %v55_v17 }
  0x24   :  { %3820 = vmatmul.mubr.msk.f32.gmra.mrb[14].mxu0 %vm107_vm0, %v56_v18 }
  0x25   :  { %3822 = vmatprep.mubr.msk.f32.mxu0 %vm107_vm0, %v57_v19 }
  0x28   :  { %3823 = vmatmul.mubr.msk.f32.gmra.mrb[16].mxu0 %vm107_vm0, %v58_v20 }
  0x29   :  { %3825 = vmatprep.mubr.msk.f32.mxu0 %vm107_vm0, %v59_v21 }
  0x2c   :  { %3826 = vmatmul.mubr.msk.f32.gmra.mrb[18].mxu0 %vm107_vm0, %v60_v22 }
  0x2d   :  { %3828 = vmatprep.mubr.msk.f32.mxu0 %vm107_vm0, %v61_v23 }
  0x30   :  { %3829 = vmatmul.mubr.msk.f32.gmra.mrb[20].mxu0 %vm107_vm0, %v62_v24 }
  0x31   :  { %3831 = vmatprep.mubr.msk.f32.mxu0 %vm107_vm0, %v63_v25 }
  0x34   :  { %3832 = vmatmul.mubr.msk.f32.gmra.mrb[22].mxu0 %vm107_vm0, %v64_v26 }
  0x35   :  { %3834 = vmatprep.mubr.msk.f32.mxu0 %vm107_vm0, %v65_v27 }
  0x38   :  { %3835 = vmatmul.mubr.msk.f32.gmra.mrb[24].mxu0 %vm107_vm0, %v66_v28 }
  0x39   :  { %3837 = vmatprep.mubr.msk.f32.mxu0 %vm107_vm0, %v67_v29 }
  0x3c   :  { %3838 = vmatmul.mubr.msk.f32.gmra.mrb[26].mxu0 %vm107_vm0, %v68_v30 }
  0x3d   :  { %3840 = vmatprep.mubr.msk.f32.mxu0 %vm107_vm0, %v69_v31 }
  0x40   :  { %3841 = vmatmul.mubr.msk.f32.gmra.mrb[28].mxu0 %vm107_vm0, %v70_v32 }
  0x41   :  { %3843 = vmatprep.mubr.msk.f32.mxu0 %vm107_vm0, %v71_v33 }
  0x44   :  { %3844 = vmatmul.mubr.msk.f32.gmra.mrb[30].mxu0 %vm107_vm0, %v72_v34 }
  0x45   :  { %3846 = vmatprep.mubr.msk.f32.mxu0 %vm107_vm0, %v73_v35 }
  0x48   :  { %3847 = vmatmul.mubr.msk.f32.gmra.mrb[32].mxu0 %vm107_vm0, %v74_v36 }
  0x49   :  { %3849 = vmatprep.mubr.msk.f32.mxu0 %vm107_vm0, %v75_v37 }
  0x4c   :  { %3850 = vmatmul.mubr.msk.f32.gmra.mrb[34].mxu0 %vm107_vm0, %v76_v38 }
  0x4d   :  { %3852 = vmatprep.mubr.msk.f32.mxu0 %vm107_vm0, %v77_v39 }
  0x50   :  { %3853 = vmatmul.mubr.msk.f32.gmra.mrb[36].mxu0 %vm107_vm0, %v78_v40 }
  0x51   :  { %3855 = vmatprep.mubr.msk.f32.mxu0 %vm107_vm0, %v79_v41 }
  0x54   :  { %3856 = vmatmul.mubr.msk.f32.gmra.mrb[38].mxu0 %vm107_vm0, %v80_v42 }
  0x55   :  { %3858 = vmatprep.mubr.msk.f32.mxu0 %vm107_vm0, %v81_v43 }
  0x58   :  { %3859 = vmatmul.mubr.msk.f32.gmra.mrb[40].mxu0 %vm107_vm0, %v82_v44 }
  0x59   :  { %3861 = vmatprep.mubr.msk.f32.mxu0 %vm107_vm0, %v83_v45 }
  0x5c   :  { %3862 = vmatmul.mubr.msk.f32.gmra.mrb[42].mxu0 %vm107_vm0, %v84_v46 }
  0x5d   :  { %3864 = vmatprep.mubr.msk.f32.mxu0 %vm107_vm0, %v85_v47 }
  0x60   :  { %3865 = vmatmul.mubr.msk.f32.gmra.mrb[44].mxu0 %vm107_vm0, %v86_v48 }
  0x61   :  { %3867 = vmatprep.mubr.msk.f32.mxu0 %vm107_vm0, %v87_v49 }
  0x64   :  { %3868 = vmatmul.mubr.msk.f32.gmra.mrb[46].mxu0 %vm107_vm0, %v88_v50 }
  0x65   :  { %3870 = vmatprep.mubr.msk.f32.mxu0 %vm107_vm0, %v89_v51 }
  0x68   :  { %3871 = vmatmul.mubr.msk.f32.gmra.mrb[48].mxu0 %vm107_vm0, %v90_v52 }
  0x69   :  { %3873 = vmatprep.mubr.msk.f32.mxu0 %vm107_vm0, %v91_v53 }
  0x6c   :  { %3874 = vmatmul.mubr.msk.f32.gmra.mrb[50].mxu0 %vm107_vm0, %v92_v54 }
  0x6d   :  { %3876 = vmatprep.mubr.msk.f32.mxu0 %vm107_vm0, %v93_v55 }
  0x70   :  { %3877 = vmatmul.mubr.msk.f32.gmra.mrb[52].mxu0 %vm107_vm0, %v94_v56 }
  0x71   :  { %3879 = vmatprep.mubr.msk.f32.mxu0 %vm107_vm0, %v95_v57 }
  0x74   :  { %3880 = vmatmul.mubr.msk.f32.gmra.mrb[54].mxu0 %vm107_vm0, %v96_v58 }
  0x75   :  { %3882 = vmatprep.mubr.msk.f32.mxu0 %vm107_vm0, %v97_v59 }
  0x78   :  { %3883 = vmatmul.mubr.msk.f32.gmra.mrb[56].mxu0 %vm107_vm0, %v98_v60 }
  0x79   :  { %3885 = vmatprep.mubr.msk.f32.mxu0 %vm107_vm0, %v99_v61 }
  0x7c   :  { %3886 = vmatmul.mubr.msk.f32.gmra.mrb[58].mxu0 %vm107_vm0, %v100_v62 }
  0x7d   :  { %3888 = vmatprep.mubr.msk.f32.mxu0 %vm107_vm0, %v101_v63 }
  0x80   :  { %3889 = vmatmul.mubr.msk.f32.gmra.mrb[60].mxu0 %vm107_vm0, %v102_v0 }
  0x81   :  { %3891 = vmatprep.mubr.msk.f32.mxu0 %vm107_vm0, %v103_v1 }
  0x84   :  { %3892 = vmatmul.mubr.msk.f32.gmra.mrb[62].mxu0 %vm107_vm0, %v104_v2 }
  0xdb   :  { %v4850_v3 = vpop.f32.mrb[0].mxu0 }
  0xdc   :  { %v757_v4 = vmul.f32 %v4850_v3, %v4850_v3  ;;  %v4854_v5 = vpop.f32.mrb[1].mxu0 }
  0xdd   :  { %v687_v6 = vadd.f32 %v4850_v3, %v4854_v5  ;;  %v756_v7 = vmul.f32 %v4854_v5, %v4854_v5 }
  0xdf   :  { %v820_v8 = vadd.f32 %v757_v4, %v756_v7  ;;  %v4860_v9 = vpop.f32.mrb[2].mxu0 }
  0xe0   :  { %v4862_v10 = vpop.f32.mrb[3].mxu0  ;;  %v759_v13 = vmul.f32 %v4860_v9, %v4860_v9 }
  0xe1   :  { %v688_v11 = vadd.f32 %v687_v6, %v4862_v10  ;;  %v758_v12 = vmul.f32 %v4862_v10, %v4862_v10 }
  0xe3   :  { %v689_v14 = vadd.f32 %v4860_v9, %v688_v11  ;;  %v821_v15 = vadd.f32 %v820_v8, %v758_v12  ;;  %v4870_v16 = vpop.f32.mrb[4].mxu0 }
  0xe4   :  { %v4872_v17 = vpop.f32.mrb[5].mxu0  ;;  %v761_v21 = vmul.f32 %v4870_v16, %v4870_v16 }
  0xe5   :  { %v822_v18 = vadd.f32 %v821_v15, %v759_v13  ;;  %v690_v19 = vadd.f32 %v689_v14, %v4872_v17  ;;  %v760_v20 = vmul.f32 %v4872_v17, %v4872_v17 }
  0xe7   :  { %v823_v22 = vadd.f32 %v822_v18, %v760_v20  ;;  %v4879_v23 = vpop.f32.mrb[6].mxu0  ;;  %v691_v24 = vadd.f32 %v4870_v16, %v690_v19 }
  0xe8   :  { %v4882_v25 = vpop.f32.mrb[7].mxu0  ;;  %v763_v29 = vmul.f32 %v4879_v23, %v4879_v23 }
  0xe9   :  { %v692_v26 = vadd.f32 %v691_v24, %v4882_v25  ;;  %v762_v27 = vmul.f32 %v4882_v25, %v4882_v25  ;;  %v824_v28 = vadd.f32 %v823_v22, %v761_v21 }
  0xeb   :  { %v825_v30 = vadd.f32 %v824_v28, %v762_v27  ;;  %v4889_v31 = vpop.f32.mrb[8].mxu0  ;;  %v693_v32 = vadd.f32 %v4879_v23, %v692_v26 }
  0xec   :  { %v4892_v33 = vpop.f32.mrb[9].mxu0  ;;  %v765_v37 = vmul.f32 %v4889_v31, %v4889_v31 }
  0xed   :  { %v694_v34 = vadd.f32 %v693_v32, %v4892_v33  ;;  %v764_v35 = vmul.f32 %v4892_v33, %v4892_v33  ;;  %v826_v36 = vadd.f32 %v825_v30, %v763_v29 }
  0xef   :  { %v827_v38 = vadd.f32 %v826_v36, %v764_v35  ;;  %v4899_v39 = vpop.f32.mrb[10].mxu0  ;;  %v695_v40 = vadd.f32 %v4889_v31, %v694_v34 }
  0xf0   :  { %v4902_v41 = vpop.f32.mrb[11].mxu0  ;;  %v767_v45 = vmul.f32 %v4899_v39, %v4899_v39 }
  0xf1   :  { %v696_v42 = vadd.f32 %v695_v40, %v4902_v41  ;;  %v766_v43 = vmul.f32 %v4902_v41, %v4902_v41  ;;  %v828_v44 = vadd.f32 %v827_v38, %v765_v37 }
  0xf3   :  { %v829_v46 = vadd.f32 %v828_v44, %v766_v43  ;;  %v4909_v47 = vpop.f32.mrb[12].mxu0  ;;  %v697_v48 = vadd.f32 %v4899_v39, %v696_v42 }
  0xf4   :  { %v4912_v49 = vpop.f32.mrb[13].mxu0  ;;  %v769_v53 = vmul.f32 %v4909_v47, %v4909_v47 }
  0xf5   :  { %v698_v50 = vadd.f32 %v697_v48, %v4912_v49  ;;  %v768_v51 = vmul.f32 %v4912_v49, %v4912_v49  ;;  %v830_v52 = vadd.f32 %v829_v46, %v767_v45 }
  0xf7   :  { %v831_v54 = vadd.f32 %v830_v52, %v768_v51  ;;  %v4919_v55 = vpop.f32.mrb[14].mxu0  ;;  %v699_v56 = vadd.f32 %v4909_v47, %v698_v50 }
  0xf8   :  { %v4922_v57 = vpop.f32.mrb[15].mxu0  ;;  %v771_v61 = vmul.f32 %v4919_v55, %v4919_v55 }
  0xf9   :  { %v700_v58 = vadd.f32 %v699_v56, %v4922_v57  ;;  %v770_v59 = vmul.f32 %v4922_v57, %v4922_v57  ;;  %v832_v60 = vadd.f32 %v831_v54, %v769_v53 }
  0xfb   :  { %v833_v62 = vadd.f32 %v832_v60, %v770_v59  ;;  %v4929_v63 = vpop.f32.mrb[16].mxu0  ;;  %v701_v0 = vadd.f32 %v4919_v55, %v700_v58 }
  0xfc   :  { %v4932_v1 = vpop.f32.mrb[17].mxu0  ;;  %v773_v7 = vmul.f32 %v4929_v63, %v4929_v63 }
  0xfd   :  { %v702_v2 = vadd.f32 %v701_v0, %v4932_v1  ;;  %v772_v4 = vmul.f32 %v4932_v1, %v4932_v1  ;;  %v834_v6 = vadd.f32 %v833_v62, %v771_v61 }
  0xff   :  { %v835_v8 = vadd.f32 %v834_v6, %v772_v4  ;;  %v4939_v11 = vpop.f32.mrb[18].mxu0  ;;  %v703_v12 = vadd.f32 %v4929_v63, %v702_v2 }
 0x100   :  { %v4942_v13 = vpop.f32.mrb[19].mxu0  ;;  %v775_v19 = vmul.f32 %v4939_v11, %v4939_v11 }
 0x101   :  { %v704_v14 = vadd.f32 %v703_v12, %v4942_v13  ;;  %v774_v15 = vmul.f32 %v4942_v13, %v4942_v13  ;;  %v836_v18 = vadd.f32 %v835_v8, %v773_v7 }
 0x103   :  { %v837_v20 = vadd.f32 %v836_v18, %v774_v15  ;;  %v4949_v21 = vpop.f32.mrb[20].mxu0  ;;  %v705_v22 = vadd.f32 %v4939_v11, %v704_v14 }
 0x104   :  { %v4952_v24 = vpop.f32.mrb[21].mxu0  ;;  %v777_v29 = vmul.f32 %v4949_v21, %v4949_v21 }
 0x105   :  { %v706_v26 = vadd.f32 %v705_v22, %v4952_v24  ;;  %v776_v27 = vmul.f32 %v4952_v24, %v4952_v24  ;;  %v838_v28 = vadd.f32 %v837_v20, %v775_v19 }
 0x107   :  { %v839_v30 = vadd.f32 %v838_v28, %v776_v27  ;;  %v4959_v32 = vpop.f32.mrb[22].mxu0  ;;  %v707_v34 = vadd.f32 %v4949_v21, %v706_v26 }
 0x108   :  { %v4962_v35 = vpop.f32.mrb[23].mxu0  ;;  %v779_v40 = vmul.f32 %v4959_v32, %v4959_v32 }
 0x109   :  { %v708_v36 = vadd.f32 %v707_v34, %v4962_v35  ;;  %v778_v37 = vmul.f32 %v4962_v35, %v4962_v35  ;;  %v840_v38 = vadd.f32 %v839_v30, %v777_v29 }
 0x10b   :  { %v841_v42 = vadd.f32 %v840_v38, %v778_v37  ;;  %v4969_v43 = vpop.f32.mrb[24].mxu0  ;;  %v709_v44 = vadd.f32 %v4959_v32, %v708_v36 }
 0x10c   :  { %v4972_v45 = vpop.f32.mrb[25].mxu0  ;;  %v781_v51 = vmul.f32 %v4969_v43, %v4969_v43 }
 0x10d   :  { %v710_v46 = vadd.f32 %v709_v44, %v4972_v45  ;;  %v780_v48 = vmul.f32 %v4972_v45, %v4972_v45  ;;  %v842_v50 = vadd.f32 %v841_v42, %v779_v40 }
 0x10f   :  { %v843_v52 = vadd.f32 %v842_v50, %v780_v48  ;;  %v4979_v53 = vpop.f32.mrb[26].mxu0  ;;  %v711_v54 = vadd.f32 %v4969_v43, %v710_v46 }
 0x110   :  { %v4982_v56 = vpop.f32.mrb[27].mxu0  ;;  %v783_v61 = vmul.f32 %v4979_v53, %v4979_v53 }
 0x111   :  { %v712_v58 = vadd.f32 %v711_v54, %v4982_v56  ;;  %v782_v59 = vmul.f32 %v4982_v56, %v4982_v56  ;;  %v844_v60 = vadd.f32 %v843_v52, %v781_v51 }
 0x113   :  { %v845_v62 = vadd.f32 %v844_v60, %v782_v59  ;;  %v4989_v0 = vpop.f32.mrb[28].mxu0  ;;  %v713_v2 = vadd.f32 %v4979_v53, %v712_v58 }
 0x114   :  { %v4992_v4 = vpop.f32.mrb[29].mxu0  ;;  %v785_v12 = vmul.f32 %v4989_v0, %v4989_v0 }
 0x115   :  { %v714_v6 = vadd.f32 %v713_v2, %v4992_v4  ;;  %v784_v7 = vmul.f32 %v4992_v4, %v4992_v4  ;;  %v846_v8 = vadd.f32 %v845_v62, %v783_v61 }
 0x117   :  { %v847_v14 = vadd.f32 %v846_v8, %v784_v7  ;;  %v4999_v15 = vpop.f32.mrb[30].mxu0  ;;  %v715_v18 = vadd.f32 %v4989_v0, %v714_v6 }
 0x118   :  { %v5002_v19 = vpop.f32.mrb[31].mxu0  ;;  %v787_v27 = vmul.f32 %v4999_v15, %v4999_v15 }
 0x119   :  { %v716_v20 = vadd.f32 %v715_v18, %v5002_v19  ;;  %v786_v22 = vmul.f32 %v5002_v19, %v5002_v19  ;;  %v848_v26 = vadd.f32 %v847_v14, %v785_v12 }
 0x11b   :  { %v849_v28 = vadd.f32 %v848_v26, %v786_v22  ;;  %v5009_v29 = vpop.f32.mrb[32].mxu0  ;;  %v717_v30 = vadd.f32 %v4999_v15, %v716_v20 }
 0x11c   :  { %v5012_v34 = vpop.f32.mrb[33].mxu0  ;;  %v789_v40 = vmul.f32 %v5009_v29, %v5009_v29 }
 0x11d   :  { %v718_v36 = vadd.f32 %v717_v30, %v5012_v34  ;;  %v788_v37 = vmul.f32 %v5012_v34, %v5012_v34  ;;  %v850_v38 = vadd.f32 %v849_v28, %v787_v27 }
 0x11f   :  { %v851_v42 = vadd.f32 %v850_v38, %v788_v37  ;;  %v5019_v44 = vpop.f32.mrb[34].mxu0  ;;  %v719_v46 = vadd.f32 %v5009_v29, %v718_v36 }
 0x120   :  { %v5022_v48 = vpop.f32.mrb[35].mxu0  ;;  %v791_v54 = vmul.f32 %v5019_v44, %v5019_v44 }
 0x121   :  { %v720_v50 = vadd.f32 %v719_v46, %v5022_v48  ;;  %v790_v51 = vmul.f32 %v5022_v48, %v5022_v48  ;;  %v852_v52 = vadd.f32 %v851_v42, %v789_v40 }
 0x123   :  { %v853_v58 = vadd.f32 %v852_v52, %v790_v51  ;;  %v5029_v59 = vpop.f32.mrb[36].mxu0  ;;  %v721_v60 = vadd.f32 %v5019_v44, %v720_v50 }
 0x124   :  { %v5032_v61 = vpop.f32.mrb[37].mxu0  ;;  %v793_v7 = vmul.f32 %v5029_v59, %v5029_v59 }
 0x125   :  { %v722_v62 = vadd.f32 %v721_v60, %v5032_v61  ;;  %v792_v2 = vmul.f32 %v5032_v61, %v5032_v61  ;;  %v854_v6 = vadd.f32 %v853_v58, %v791_v54 }
 0x127   :  { %v855_v8 = vadd.f32 %v854_v6, %v792_v2  ;;  %v5039_v12 = vpop.f32.mrb[38].mxu0  ;;  %v723_v14 = vadd.f32 %v5029_v59, %v722_v62  ;;  %v7517_v2 = vmov 0.0|0.0  }
 0x128   :  { %7547 = vst [vmem:[#allocation2_spill] sm:$0xff] %v5039_v12  ;;  %v5042_v18 = vpop.f32.mrb[39].mxu0  ;;  %v795_v27 = vmul.f32 %v5039_v12, %v5039_v12  ;;  %4117 = vmatprep.subr.bf16.mxu0 %v7517_v2  ;;  %4365 = vmatprep.subr.bf16.mxu1 %v7517_v2 }
 0x129   :  { %7548 = vst [vmem:[#allocation3_spill] sm:$0xff] %v5042_v18  ;;  %v724_v20 = vadd.f32 %v723_v14, %v5042_v18  ;;  %v794_v22 = vmul.f32 %v5042_v18, %v5042_v18  ;;  %v856_v26 = vadd.f32 %v855_v8, %v793_v7 }
 0x12b   :  { %v857_v28 = vadd.f32 %v856_v26, %v794_v22  ;;  %v5049_v30 = vpop.f32.mrb[40].mxu0  ;;  %v725_v36 = vadd.f32 %v5039_v12, %v724_v20 }
 0x12c   :  { %7549 = vst [vmem:[#allocation4_spill] sm:$0xff] %v5049_v30  ;;  %v5052_v37 = vpop.f32.mrb[41].mxu0  ;;  %v797_v46 = vmul.f32 %v5049_v30, %v5049_v30 }
 0x12d   :  { %7550 = vst [vmem:[#allocation5_spill] sm:$0xff] %v5052_v37  ;;  %v726_v38 = vadd.f32 %v725_v36, %v5052_v37  ;;  %v796_v40 = vmul.f32 %v5052_v37, %v5052_v37  ;;  %v858_v42 = vadd.f32 %v857_v28, %v795_v27 }
 0x12f   :  { %v859_v50 = vadd.f32 %v858_v42, %v796_v40  ;;  %v5059_v51 = vpop.f32.mrb[42].mxu0  ;;  %v727_v52 = vadd.f32 %v5049_v30, %v726_v38 }
 0x130   :  { %7551 = vst [vmem:[#allocation6_spill] sm:$0xff] %v5059_v51  ;;  %v5062_v54 = vpop.f32.mrb[43].mxu0  ;;  %v799_v6 = vmul.f32 %v5059_v51, %v5059_v51 }
 0x131   :  { %7552 = vst [vmem:[#allocation7_spill] sm:$0xff] %v5062_v54  ;;  %v728_v58 = vadd.f32 %v727_v52, %v5062_v54  ;;  %v798_v60 = vmul.f32 %v5062_v54, %v5062_v54  ;;  %v860_v62 = vadd.f32 %v859_v50, %v797_v46 }
 0x133   :  { %v861_v7 = vadd.f32 %v860_v62, %v798_v60  ;;  %v5071_v8 = vpop.f32.mrb[44].mxu0  ;;  %v729_v14 = vadd.f32 %v5059_v51, %v728_v58 }
 0x134   :  { %7553 = vst [vmem:[#allocation8_spill] sm:$0xff] %v5071_v8  ;;  %v5074_v20 = vpop.f32.mrb[45].mxu0  ;;  %v801_v28 = vmul.f32 %v5071_v8, %v5071_v8 }
 0x135   :  { %7554 = vst [vmem:[#allocation9_spill] sm:$0xff] %v5074_v20  ;;  %v730_v22 = vadd.f32 %v729_v14, %v5074_v20  ;;  %v800_v26 = vmul.f32 %v5074_v20, %v5074_v20  ;;  %v862_v27 = vadd.f32 %v861_v7, %v799_v6 }
 0x137   :  { %v863_v36 = vadd.f32 %v862_v27, %v800_v26  ;;  %v5081_v38 = vpop.f32.mrb[46].mxu0  ;;  %v731_v40 = vadd.f32 %v5071_v8, %v730_v22 }
 0x138   :  { %7555 = vst [vmem:[#allocation10_spill] sm:$0xff] %v5081_v38  ;;  %v5084_v42 = vpop.f32.mrb[47].mxu0  ;;  %v803_v58 = vmul.f32 %v5081_v38, %v5081_v38 }
 0x139   :  { %7556 = vst [vmem:[#allocation11_spill] sm:$0xff] %v5084_v42  ;;  %v732_v46 = vadd.f32 %v731_v40, %v5084_v42  ;;  %v802_v50 = vmul.f32 %v5084_v42, %v5084_v42  ;;  %v864_v52 = vadd.f32 %v863_v36, %v801_v28 }
 0x13b   :  { %v865_v60 = vadd.f32 %v864_v52, %v802_v50  ;;  %v5091_v62 = vpop.f32.mrb[48].mxu0  ;;  %v733_v6 = vadd.f32 %v5081_v38, %v732_v46 }
 0x13c   :  { %7557 = vst [vmem:[#allocation12_spill] sm:$0xff] %v5091_v62  ;;  %v5094_v7 = vpop.f32.mrb[49].mxu0  ;;  %v805_v27 = vmul.f32 %v5091_v62, %v5091_v62 }
 0x13d   :  { %7558 = vst [vmem:[#allocation13_spill] sm:$0xff] %v5094_v7  ;;  %v734_v14 = vadd.f32 %v733_v6, %v5094_v7  ;;  %v804_v22 = vmul.f32 %v5094_v7, %v5094_v7  ;;  %v866_v26 = vadd.f32 %v865_v60, %v803_v58 }
 0x13f   :  { %v867_v28 = vadd.f32 %v866_v26, %v804_v22  ;;  %v5101_v36 = vpop.f32.mrb[50].mxu0  ;;  %v735_v40 = vadd.f32 %v5091_v62, %v734_v14 }
 0x140   :  { %7559 = vst [vmem:[#allocation14_spill] sm:$0xff] %v5101_v36  ;;  %v5104_v50 = vpop.f32.mrb[51].mxu0  ;;  %v807_v2 = vmul.f32 %v5101_v36, %v5101_v36 }
 0x141   :  { %7560 = vst [vmem:[#allocation15_spill] sm:$0xff] %v5104_v50  ;;  %v736_v46 = vadd.f32 %v735_v40, %v5104_v50  ;;  %v806_v52 = vmul.f32 %v5104_v50, %v5104_v50  ;;  %v868_v6 = vadd.f32 %v867_v28, %v805_v27 }
 0x143   :  { %v869_v58 = vadd.f32 %v868_v6, %v806_v52  ;;  %v5111_v60 = vpop.f32.mrb[52].mxu0  ;;  %v737_v22 = vadd.f32 %v5101_v36, %v736_v46 }
 0x144   :  { %7561 = vst [vmem:[#allocation16_spill] sm:$0xff] %v5111_v60  ;;  %v5114_v26 = vpop.f32.mrb[53].mxu0  ;;  %v809_v50 = vmul.f32 %v5111_v60, %v5111_v60 }
 0x145   :  { %7562 = vst [vmem:[#allocation17_spill] sm:$0xff] %v5114_v26  ;;  %v738_v14 = vadd.f32 %v737_v22, %v5114_v26  ;;  %v808_v62 = vmul.f32 %v5114_v26, %v5114_v26  ;;  %v870_v40 = vadd.f32 %v869_v58, %v807_v2 }
 0x147   :  { %v871_v27 = vadd.f32 %v870_v40, %v808_v62  ;;  %v5121_v28 = vpop.f32.mrb[54].mxu0  ;;  %v739_v52 = vadd.f32 %v5111_v60, %v738_v14 }
 0x148   :  { %7563 = vst [vmem:[#allocation18_spill] sm:$0xff] %v5121_v28  ;;  %v5124_v6 = vpop.f32.mrb[55].mxu0  ;;  %v811_v26 = vmul.f32 %v5121_v28, %v5121_v28 }
 0x149   :  { %7564 = vst [vmem:[#allocation19_spill] sm:$0xff] %v5124_v6  ;;  %v740_v46 = vadd.f32 %v739_v52, %v5124_v6  ;;  %v810_v36 = vmul.f32 %v5124_v6, %v5124_v6  ;;  %v872_v22 = vadd.f32 %v871_v27, %v809_v50 }
 0x14b   :  { %v873_v2 = vadd.f32 %v872_v22, %v810_v36  ;;  %v5131_v58 = vpop.f32.mrb[56].mxu0  ;;  %v741_v62 = vadd.f32 %v5121_v28, %v740_v46 }
 0x14c   :  { %7565 = vst [vmem:[#allocation20_spill] sm:$0xff] %v5131_v58  ;;  %v5134_v40 = vpop.f32.mrb[57].mxu0  ;;  %v813_v6 = vmul.f32 %v5131_v58, %v5131_v58 }
 0x14d   :  { %7566 = vst [vmem:[#allocation21_spill] sm:$0xff] %v5134_v40  ;;  %v742_v14 = vadd.f32 %v741_v62, %v5134_v40  ;;  %v812_v60 = vmul.f32 %v5134_v40, %v5134_v40  ;;  %v874_v52 = vadd.f32 %v873_v2, %v811_v26 }
 0x14f   :  { %v875_v50 = vadd.f32 %v874_v52, %v812_v60  ;;  %v5141_v27 = vpop.f32.mrb[58].mxu0  ;;  %v743_v36 = vadd.f32 %v5131_v58, %v742_v14 }
 0x150   :  { %7567 = vst [vmem:[#allocation22_spill] sm:$0xff] %v5141_v27  ;;  %v5144_v22 = vpop.f32.mrb[59].mxu0  ;;  %v815_v40 = vmul.f32 %v5141_v27, %v5141_v27 }
 0x151   :  { %7568 = vst [vmem:[#allocation23_spill] sm:$0xff] %v5144_v22  ;;  %v744_v46 = vadd.f32 %v743_v36, %v5144_v22  ;;  %v814_v28 = vmul.f32 %v5144_v22, %v5144_v22  ;;  %v876_v62 = vadd.f32 %v875_v50, %v813_v6 }
 0x153   :  { %v877_v26 = vadd.f32 %v876_v62, %v814_v28  ;;  %v5151_v2 = vpop.f32.mrb[60].mxu0  ;;  %v745_v60 = vadd.f32 %v5141_v27, %v744_v46 }
 0x154   :  { %7569 = vst [vmem:[#allocation24_spill] sm:$0xff] %v5151_v2  ;;  %v5154_v52 = vpop.f32.mrb[61].mxu0  ;;  %v817_v22 = vmul.f32 %v5151_v2, %v5151_v2 }
 0x155   :  { %7570 = vst [vmem:[#allocation25_spill] sm:$0xff] %v5154_v52  ;;  %v746_v14 = vadd.f32 %v745_v60, %v5154_v52  ;;  %v816_v58 = vmul.f32 %v5154_v52, %v5154_v52  ;;  %v878_v36 = vadd.f32 %v877_v26, %v815_v40 }
 0x157   :  { %v879_v6 = vadd.f32 %v878_v36, %v816_v58  ;;  %v5161_v50 = vpop.f32.mrb[62].mxu0  ;;  %v747_v28 = vadd.f32 %v5151_v2, %v746_v14 }
 0x158   :  { %v676_v62 = vpop.f32.mrb[63].mxu0  ;;  %v819_v27 = vmul.f32 %v5161_v50, %v5161_v50 }
 0x159   :  { %v748_v7 = vadd.f32 %v747_v28, %v676_v62  ;;  %v818_v38 = vmul.f32 %v676_v62, %v676_v62  ;;  %v880_v46 = vadd.f32 %v879_v6, %v817_v22 }
 0x15b   :  { %v749_v60 = vadd.f32 %v5161_v50, %v748_v7  ;;  %v881_v42 = vadd.f32 %v880_v46, %v818_v38  ;;  %v1175_v38 = vld [vmem:[%s7506_s9 + $0x248] sm:$0xff] }
 0x15c   :  { %1512 = vmatprep.mubr.f32.mxu1 %v1175_v38 }
 0x15d   :  { %v750_v52 = vrot.slane %v749_v60, 4  ;;  %v882_v40 = vadd.f32 %v881_v42, %v819_v27  ;;  %v899_v42 = vlaneseq }
 0x15f   :  { %v751_v26 = vadd.f32 %v750_v52, %v749_v60  ;;  %v883_v8 = vrot.slane %v882_v40, 4 }
 0x161   :  { %v752_v20 = vrot.slane %v751_v26, 2  ;;  %v884_v58 = vadd.f32 %v883_v8, %v882_v40  ;;  %v900_v8 = vshrl.u32 %v899_v42, 7  ;;  %v7579_v42 = vld [vmem:[#allocation9_spill] sm:$0xff] }
 0x163   :  { %v753_v36 = vadd.f32 %v752_v20, %v751_v26  ;;  %v885_v51 = vrot.slane %v884_v58, 2 }
 0x165   :  { %v754_v54 = vrot.slane %v753_v36, 1  ;;  %v886_v14 = vadd.f32 %v885_v51, %v884_v58  ;;  %v685_v51 = vld [vmem:[%s7507_s2] sm:$0x1]  ;;  %v7573_v58 = vld [vmem:[#allocation3_spill] sm:$0xff] }
 0x167   :  { %v755_v2 = vadd.f32 %v754_v54, %v753_v36  ;;  %v887_v28 = vrot.slane %v886_v14, 1  ;;  %v5173_v54 = vsub.s32 0, %v900_v8  ;;  %v7574_v36 = vld [vmem:[#allocation2_spill] sm:$0xff] }
 0x169   :  { %v888_v30 = vadd.f32 %v887_v28, %v886_v14  ;;  %v889_v22 = vmul.f32 0.0022222223, %v755_v2  ;;  %7571 = vst [vmem:[#allocation26_spill] sm:$0xff] %v5173_v54  ;;  %v7575_v14 = vld [vmem:[#allocation5_spill] sm:$0xff]  ;;  %v7576_v28 = vld [vmem:[#allocation4_spill] sm:$0xff] }
 0x16b   :  { %v890_v6 = vmul.f32 0.0022222223, %v888_v30  ;;  %v891_v37 = vmul.f32 %v889_v22, %v889_v22 }
 0x16d   :  { %v892_v12 = vsub.f32 %v890_v6, %v891_v37  ;;  %v7578_v6 = vld [vmem:[#allocation6_spill] sm:$0xff] }
 0x16f   :  { %v893_v18 = vadd.f32 1e-05, %v892_v12  ;;  %v686_v12 = vld [vmem:[%s7508_s3] sm:$0x1] }
 0x171   :  { %4510 = vrsqrt.f32 %v893_v18 }
 0x17b   :  { %v4511_v20 = vpop.eup %4510 }
 0x17c   :  { %v895_v7 = vmul.f32 %v4511_v20, %v685_v51  ;;  %v7580_v51 = vld [vmem:[#allocation8_spill] sm:$0xff] }
 0x17e   :  { %v896_v30 = vmul.f32 %v895_v7, %v889_v22  ;;  %v5179_v37 = vrot.slane %v895_v7, %v5173_v54  ;;  %v7577_v22 = vld [vmem:[#allocation7_spill] sm:$0xff] }
 0x17f   :  { %v7581_v7 = vld [vmem:[#allocation11_spill] sm:$0xff] }
 0x180   :  { %v897_v27 = vsub.f32 %v686_v12, %v896_v30  ;;  %v966_v18 = vmul.f32 %v5179_v37, %v676_v62  ;;  %v5184_v2 = vmul.f32 %v5179_v37, %v4854_v5  ;;  %v5188_v52 = vmul.f32 %v4850_v3, %v5179_v37  ;;  %v7582_v30 = vld [vmem:[#allocation10_spill] sm:$0xff] }
 0x181   :  { %v5192_v46 = vmul.f32 %v5179_v37, %v4862_v10  ;;  %v5196_v60 = vmul.f32 %v4860_v9, %v5179_v37  ;;  %v5200_v40 = vmul.f32 %v5179_v37, %v4872_v17  ;;  %v5204_v5 = vmul.f32 %v4870_v16, %v5179_v37 }
 0x182   :  { %v5207_v62 = vrot.slane %v897_v27, %v5173_v54  ;;  %v5211_v3 = vmul.f32 %v5179_v37, %v4882_v25  ;;  %v5215_v10 = vmul.f32 %v4879_v23, %v5179_v37  ;;  %v5219_v9 = vmul.f32 %v5179_v37, %v4892_v33  ;;  %v7593_v54 = vld [vmem:[#allocation19_spill] sm:$0xff] }
 0x183   :  { %v5223_v17 = vmul.f32 %v4889_v31, %v5179_v37  ;;  %v5227_v16 = vmul.f32 %v5179_v37, %v4902_v41  ;;  %v5231_v25 = vmul.f32 %v4899_v39, %v5179_v37  ;;  %v5235_v23 = vmul.f32 %v5179_v37, %v4912_v49 }
 0x184   :  { %v5238_v26 = vadd.f32 %v5207_v62, %v966_v18  ;;  %v5242_v33 = vmul.f32 %v4909_v47, %v5179_v37  ;;  %v5246_v31 = vmul.f32 %v5179_v37, %v4922_v57  ;;  %v5250_v41 = vmul.f32 %v4919_v55, %v5179_v37  ;;  %v7583_v18 = vld [vmem:[#allocation13_spill] sm:$0xff] }
 0x185   :  { %v5254_v39 = vmul.f32 %v5179_v37, %v4932_v1  ;;  %v5258_v49 = vmul.f32 %v4929_v63, %v5179_v37  ;;  %v5262_v47 = vmul.f32 %v5179_v37, %v4942_v13  ;;  %v5266_v57 = vmul.f32 %v4939_v11, %v5179_v37 }
 0x186   :  { %7572 = vst [vmem:[#allocation27_spill] sm:$0xff] %v5238_v26  ;;  %v5270_v55 = vmul.f32 %v5179_v37, %v4952_v24  ;;  %v5274_v1 = vmul.f32 %v4949_v21, %v5179_v37  ;;  %v5278_v63 = vmul.f32 %v5179_v37, %v4962_v35  ;;  %v5282_v13 = vmul.f32 %v4959_v32, %v5179_v37  ;;  %v7595_v26 = vld [vmem:[#allocation18_spill] sm:$0xff] }
 0x187   :  { %v5286_v11 = vmul.f32 %v5179_v37, %v4972_v45  ;;  %v5290_v24 = vmul.f32 %v4969_v43, %v5179_v37  ;;  %v5294_v21 = vmul.f32 %v5179_v37, %v4982_v56  ;;  %v5298_v35 = vmul.f32 %v4979_v53, %v5179_v37 }
 0x188   :  { %v5302_v32 = vmul.f32 %v5179_v37, %v4992_v4  ;;  %v5306_v45 = vmul.f32 %v4989_v0, %v5179_v37  ;;  %v5310_v43 = vmul.f32 %v5179_v37, %v5002_v19  ;;  %v5314_v56 = vmul.f32 %v4999_v15, %v5179_v37 }
 0x189   :  { %v5318_v53 = vmul.f32 %v5179_v37, %v5012_v34  ;;  %v5322_v4 = vmul.f32 %v5009_v29, %v5179_v37  ;;  %v5326_v0 = vmul.f32 %v5179_v37, %v5022_v48  ;;  %v5330_v19 = vmul.f32 %v5019_v44, %v5179_v37 }
 0x18a   :  { %v5334_v15 = vmul.f32 %v5179_v37, %v5032_v61  ;;  %v5338_v34 = vmul.f32 %v5029_v59, %v5179_v37  ;;  %v5342_v29 = vmul.f32 %v5179_v37, %v7573_v58  ;;  %v5346_v48 = vmul.f32 %v7574_v36, %v5179_v37  ;;  %v7584_v36 = vld [vmem:[#allocation12_spill] sm:$0xff] }
 0x18b   :  { %v5350_v44 = vmul.f32 %v5179_v37, %v7575_v14  ;;  %v5354_v61 = vmul.f32 %v7576_v28, %v5179_v37  ;;  %v5358_v59 = vmul.f32 %v5179_v37, %v7577_v22  ;;  %v5362_v38 = vmul.f32 %v7578_v6, %v5179_v37  ;;  %v7585_v28 = vld [vmem:[#allocation15_spill] sm:$0xff]  ;;  %v7587_v6 = vld [vmem:[#allocation14_spill] sm:$0xff] }
 0x18c   :  { %v5366_v8 = vmul.f32 %v5179_v37, %v7579_v42  ;;  %v5370_v20 = vmul.f32 %v7580_v51, %v5179_v37  ;;  %v5374_v12 = vmul.f32 %v5179_v37, %v7581_v7  ;;  %v5378_v27 = vmul.f32 %v7582_v30, %v5179_v37  ;;  %v7589_v51 = vld [vmem:[#allocation17_spill] sm:$0xff]  ;;  %v7591_v30 = vld [vmem:[#allocation16_spill] sm:$0xff] }
 0x18d   :  { %v5382_v58 = vmul.f32 %v5179_v37, %v7583_v18  ;;  %v5386_v14 = vmul.f32 %v7584_v36, %v5179_v37  ;;  %v5390_v22 = vmul.f32 %v5179_v37, %v7585_v28  ;;  %v5394_v42 = vmul.f32 %v7587_v6, %v5179_v37 }
 0x18e   :  { %v5398_v7 = vmul.f32 %v5179_v37, %v7589_v51  ;;  %v5402_v18 = vmul.f32 %v7591_v30, %v5179_v37  ;;  %v5406_v36 = vmul.f32 %v5179_v37, %v7593_v54  ;;  %v5410_v28 = vmul.f32 %v7595_v26, %v5179_v37 }
 0x18f   :  { %7586 = vst [vmem:[#allocation3_spill] sm:$0xff] %v5390_v22  ;;  %7588 = vst [vmem:[#allocation2_spill] sm:$0xff] %v5394_v42  ;;  %v7597_v22 = vld [vmem:[#allocation21_spill] sm:$0xff]  ;;  %v7598_v42 = vld [vmem:[#allocation20_spill] sm:$0xff] }
 0x190   :  { %7590 = vst [vmem:[#allocation5_spill] sm:$0xff] %v5398_v7  ;;  %7592 = vst [vmem:[#allocation4_spill] sm:$0xff] %v5402_v18  ;;  %v5414_v6 = vmul.f32 %v5179_v37, %v7597_v22  ;;  %v5418_v51 = vmul.f32 %v7598_v42, %v5179_v37  ;;  %v7599_v7 = vld [vmem:[#allocation23_spill] sm:$0xff]  ;;  %v7600_v18 = vld [vmem:[#allocation22_spill] sm:$0xff]  ;;  %v5438_v42 = vmul.f32 %v5161_v50, %v5179_v37 }
 0x191   :  { %7594 = vst [vmem:[#allocation7_spill] sm:$0xff] %v5406_v36  ;;  %7596 = vst [vmem:[#allocation6_spill] sm:$0xff] %v5410_v28  ;;  %v5422_v30 = vmul.f32 %v5179_v37, %v7599_v7  ;;  %v5426_v54 = vmul.f32 %v7600_v18, %v5179_v37  ;;  %v7601_v36 = vld [vmem:[#allocation25_spill] sm:$0xff]  ;;  %v7602_v28 = vld [vmem:[#allocation24_spill] sm:$0xff]  ;;  %v5442_v7 = vadd.f32 %v5207_v62, %v5184_v2 }
 0x192   :  { %v5430_v26 = vmul.f32 %v5179_v37, %v7601_v36  ;;  %v5434_v22 = vmul.f32 %v7602_v28, %v5179_v37  ;;  %v5446_v18 = vadd.f32 %v5207_v62, %v5188_v52  ;;  %v5450_v36 = vadd.f32 %v5207_v62, %v5192_v46 }
 0x193   :  { %v5454_v28 = vadd.f32 %v5207_v62, %v5196_v60  ;;  %v5458_v50 = vadd.f32 %v5207_v62, %v5200_v40  ;;  %v5462_v37 = vadd.f32 %v5207_v62, %v5204_v5  ;;  %v5466_v2 = vadd.f32 %v5207_v62, %v5211_v3 }
 0x194   :  { %v5470_v52 = vadd.f32 %v5207_v62, %v5215_v10  ;;  %v5474_v46 = vadd.f32 %v5207_v62, %v5219_v9  ;;  %v5478_v60 = vadd.f32 %v5207_v62, %v5223_v17  ;;  %v5482_v40 = vadd.f32 %v5207_v62, %v5227_v16 }
 0x195   :  { %v5486_v5 = vadd.f32 %v5207_v62, %v5231_v25  ;;  %v5490_v3 = vadd.f32 %v5207_v62, %v5235_v23  ;;  %v5494_v10 = vadd.f32 %v5207_v62, %v5242_v33  ;;  %v5498_v9 = vadd.f32 %v5207_v62, %v5246_v31 }
 0x196   :  { %v5502_v17 = vadd.f32 %v5207_v62, %v5250_v41  ;;  %v5506_v16 = vadd.f32 %v5207_v62, %v5254_v39  ;;  %v5510_v25 = vadd.f32 %v5207_v62, %v5258_v49  ;;  %v5514_v23 = vadd.f32 %v5207_v62, %v5262_v47 }
 0x197   :  { %v5518_v33 = vadd.f32 %v5207_v62, %v5266_v57  ;;  %v5522_v31 = vadd.f32 %v5207_v62, %v5270_v55  ;;  %v5526_v41 = vadd.f32 %v5207_v62, %v5274_v1  ;;  %v5530_v39 = vadd.f32 %v5207_v62, %v5278_v63 }
 0x198   :  { %v5534_v49 = vadd.f32 %v5207_v62, %v5282_v13  ;;  %v5538_v47 = vadd.f32 %v5207_v62, %v5286_v11  ;;  %v5542_v57 = vadd.f32 %v5207_v62, %v5290_v24  ;;  %v5546_v55 = vadd.f32 %v5207_v62, %v5294_v21 }
 0x199   :  { %v5550_v1 = vadd.f32 %v5207_v62, %v5298_v35  ;;  %v5554_v63 = vadd.f32 %v5207_v62, %v5302_v32  ;;  %v5558_v13 = vadd.f32 %v5207_v62, %v5306_v45  ;;  %v5562_v11 = vadd.f32 %v5207_v62, %v5310_v43 }
 0x19a   :  { %v5566_v24 = vadd.f32 %v5207_v62, %v5314_v56  ;;  %v5570_v21 = vadd.f32 %v5207_v62, %v5318_v53  ;;  %v5574_v35 = vadd.f32 %v5207_v62, %v5322_v4  ;;  %v5578_v32 = vadd.f32 %v5207_v62, %v5326_v0 }
 0x19b   :  { %v5582_v45 = vadd.f32 %v5207_v62, %v5330_v19  ;;  %v5586_v43 = vadd.f32 %v5207_v62, %v5334_v15  ;;  %v5590_v56 = vadd.f32 %v5207_v62, %v5338_v34  ;;  %v5594_v53 = vadd.f32 %v5207_v62, %v5342_v29 }
 0x19c   :  { %v5598_v4 = vadd.f32 %v5207_v62, %v5346_v48  ;;  %v5602_v0 = vadd.f32 %v5207_v62, %v5350_v44  ;;  %v5606_v19 = vadd.f32 %v5207_v62, %v5354_v61  ;;  %v5610_v15 = vadd.f32 %v5207_v62, %v5358_v59 }
 0x19d   :  { %v5614_v34 = vadd.f32 %v5207_v62, %v5362_v38  ;;  %v5618_v29 = vadd.f32 %v5207_v62, %v5366_v8  ;;  %v5622_v48 = vadd.f32 %v5207_v62, %v5370_v20  ;;  %v5626_v44 = vadd.f32 %v5207_v62, %v5374_v12  ;;  %v7608_v8 = vld [vmem:[#allocation3_spill] sm:$0xff] }
 0x19e   :  { %v5630_v61 = vadd.f32 %v5207_v62, %v5378_v27  ;;  %v5634_v59 = vadd.f32 %v5207_v62, %v5382_v58  ;;  %v5638_v38 = vadd.f32 %v5207_v62, %v5386_v14  ;;  %v5642_v20 = vadd.f32 %v5207_v62, %v7608_v8 }
 0x19f   :  { %7603 = vst [vmem:[#allocation9_spill] sm:$0xff] %v5622_v48  ;;  %7604 = vst [vmem:[#allocation8_spill] sm:$0xff] %v5626_v44  ;;  %v7609_v48 = vld [vmem:[#allocation2_spill] sm:$0xff]  ;;  %v7610_v44 = vld [vmem:[#allocation5_spill] sm:$0xff] }
 0x1a0   :  { %7605 = vst [vmem:[#allocation11_spill] sm:$0xff] %v5630_v61  ;;  %7606 = vst [vmem:[#allocation10_spill] sm:$0xff] %v5634_v59  ;;  %v5646_v12 = vadd.f32 %v5207_v62, %v7609_v48  ;;  %v5650_v27 = vadd.f32 %v5207_v62, %v7610_v44  ;;  %v7611_v61 = vld [vmem:[#allocation4_spill] sm:$0xff]  ;;  %v7612_v59 = vld [vmem:[#allocation7_spill] sm:$0xff]  ;;  %v5666_v48 = vadd.f32 %v5207_v62, %v5414_v6 }
 0x1a1   :  { %7607 = vst [vmem:[#allocation13_spill] sm:$0xff] %v5638_v38  ;;  %v5654_v58 = vadd.f32 %v5207_v62, %v7611_v61  ;;  %v5658_v14 = vadd.f32 %v5207_v62, %v7612_v59  ;;  %v7614_v38 = vld [vmem:[#allocation6_spill] sm:$0xff]  ;;  %v5670_v44 = vadd.f32 %v5207_v62, %v5418_v51  ;;  %v5674_v61 = vadd.f32 %v5207_v62, %v5422_v30 }
 0x1a2   :  { %v5662_v8 = vadd.f32 %v5207_v62, %v7614_v38  ;;  %7616 = vst [vmem:[#allocation14_spill] sm:$0xff] %v5666_v48  ;;  %v5678_v59 = vadd.f32 %v5207_v62, %v5426_v54  ;;  %v5682_v38 = vadd.f32 %v5207_v62, %v5430_v26  ;;  %v5686_v6 = vadd.f32 %v5207_v62, %v5434_v22 }
 0x1a3   :  { %7613 = vst [vmem:[#allocation12_spill] sm:$0xff] %v5658_v14  ;;  %7617 = vst [vmem:[#allocation17_spill] sm:$0xff] %v5670_v44  ;;  %v5690_v51 = vadd.f32 %v5207_v62, %v5438_v42  ;;  %v1038_v30 = vmax.f32 %v5442_v7, 0.0  ;;  %v1040_v54 = vmax.f32 %v5450_v36, 0.0  ;;  %v1042_v26 = vmax.f32 %v5458_v50, 0.0 }
 0x1a4   :  { %7615 = vst [vmem:[#allocation15_spill] sm:$0xff] %v5662_v8  ;;  %7618 = vst [vmem:[#allocation16_spill] sm:$0xff] %v5674_v61  ;;  %v1039_v61 = vmax.f32 %v5446_v18, 0.0  ;;  %v1044_v22 = vmax.f32 %v5466_v2, 0.0  ;;  %v1046_v62 = vmax.f32 %v5474_v46, 0.0  ;;  %v1047_v42 = vmax.f32 %v5478_v60, 0.0 }
 0x1a5   :  { %7619 = vst [vmem:[#allocation19_spill] sm:$0xff] %v5678_v59  ;;  %7620 = vst [vmem:[#allocation18_spill] sm:$0xff] %v5682_v38  ;;  %v1041_v59 = vmax.f32 %v5454_v28, 0.0  ;;  %v1043_v38 = vmax.f32 %v5462_v37, 0.0  ;;  %v1048_v7 = vmax.f32 %v5482_v40, 0.0  ;;  %v1049_v18 = vmax.f32 %v5486_v5, 0.0 }
 0x1a6   :  { %7621 = vst [vmem:[#allocation21_spill] sm:$0xff] %v5686_v6  ;;  %7622 = vst [vmem:[#allocation20_spill] sm:$0xff] %v5690_v51  ;;  %v1045_v6 = vmax.f32 %v5470_v52, 0.0  ;;  %v1050_v36 = vmax.f32 %v5490_v3, 0.0  ;;  %v1051_v28 = vmax.f32 %v5494_v10, 0.0  ;;  %v1052_v50 = vmax.f32 %v5498_v9, 0.0 }
 0x1a7   :  { %v1053_v37 = vmax.f32 %v5502_v17, 0.0  ;;  %v1054_v2 = vmax.f32 %v5506_v16, 0.0  ;;  %v1055_v52 = vmax.f32 %v5510_v25, 0.0  ;;  %v1056_v46 = vmax.f32 %v5514_v23, 0.0  ;;  %v7624_v48 = vld [vmem:[#allocation9_spill] sm:$0xff]  ;;  %v7625_v44 = vld [vmem:[#allocation8_spill] sm:$0xff] }
 0x1a8   :  { %v1057_v60 = vmax.f32 %v5518_v33, 0.0  ;;  %v1058_v40 = vmax.f32 %v5522_v31, 0.0  ;;  %v1059_v5 = vmax.f32 %v5526_v41, 0.0  ;;  %v1060_v3 = vmax.f32 %v5530_v39, 0.0  ;;  %v7626_v51 = vld [vmem:[#allocation11_spill] sm:$0xff]  ;;  %v7627_v8 = vld [vmem:[#allocation10_spill] sm:$0xff] }
 0x1a9   :  { %v1061_v10 = vmax.f32 %v5534_v49, 0.0  ;;  %v1062_v9 = vmax.f32 %v5538_v47, 0.0  ;;  %v1063_v17 = vmax.f32 %v5542_v57, 0.0  ;;  %v1064_v16 = vmax.f32 %v5546_v55, 0.0  ;;  %v7628_v14 = vld [vmem:[#allocation13_spill] sm:$0xff] }
 0x1aa   :  { %v1065_v25 = vmax.f32 %v5550_v1, 0.0  ;;  %v1066_v23 = vmax.f32 %v5554_v63, 0.0  ;;  %v1067_v33 = vmax.f32 %v5558_v13, 0.0  ;;  %v1068_v31 = vmax.f32 %v5562_v11, 0.0 }
 0x1ab   :  { %v1069_v41 = vmax.f32 %v5566_v24, 0.0  ;;  %v1070_v39 = vmax.f32 %v5570_v21, 0.0  ;;  %v1071_v49 = vmax.f32 %v5574_v35, 0.0  ;;  %v1072_v47 = vmax.f32 %v5578_v32, 0.0 }
 0x1ac   :  { %v1073_v57 = vmax.f32 %v5582_v45, 0.0  ;;  %v1074_v55 = vmax.f32 %v5586_v43, 0.0  ;;  %v1075_v1 = vmax.f32 %v5590_v56, 0.0  ;;  %v1076_v63 = vmax.f32 %v5594_v53, 0.0 }
 0x1ad   :  { %v1077_v13 = vmax.f32 %v5598_v4, 0.0  ;;  %v1078_v11 = vmax.f32 %v5602_v0, 0.0  ;;  %v1079_v24 = vmax.f32 %v5606_v19, 0.0  ;;  %v1080_v21 = vmax.f32 %v5610_v15, 0.0 }
 0x1ae   :  { %v1081_v35 = vmax.f32 %v5614_v34, 0.0  ;;  %v1082_v32 = vmax.f32 %v5618_v29, 0.0  ;;  %v1083_v45 = vmax.f32 %v7624_v48, 0.0  ;;  %v1084_v43 = vmax.f32 %v7625_v44, 0.0  ;;  %v7629_v29 = vld [vmem:[#allocation12_spill] sm:$0xff]  ;;  %v7630_v44 = vld [vmem:[#allocation15_spill] sm:$0xff] }
 0x1af   :  { %v1085_v56 = vmax.f32 %v7626_v51, 0.0  ;;  %v1086_v53 = vmax.f32 %v7627_v8, 0.0  ;;  %v1087_v4 = vmax.f32 %v7628_v14, 0.0  ;;  %v1088_v0 = vmax.f32 %v5642_v20, 0.0  ;;  %v7631_v8 = vld [vmem:[#allocation14_spill] sm:$0xff]  ;;  %v7632_v20 = vld [vmem:[#allocation17_spill] sm:$0xff] }
 0x1b0   :  { %v1089_v19 = vmax.f32 %v5646_v12, 0.0  ;;  %v1090_v15 = vmax.f32 %v5650_v27, 0.0  ;;  %v1091_v34 = vmax.f32 %v5654_v58, 0.0  ;;  %v1092_v48 = vmax.f32 %v7629_v29, 0.0  ;;  %v7633_v27 = vld [vmem:[#allocation16_spill] sm:$0xff]  ;;  %v7634_v29 = vld [vmem:[#allocation19_spill] sm:$0xff] }
 0x1b1   :  { %v1093_v51 = vmax.f32 %v7630_v44, 0.0  ;;  %v1094_v14 = vmax.f32 %v7631_v8, 0.0  ;;  %v1095_v12 = vmax.f32 %v7632_v20, 0.0  ;;  %v1096_v58 = vmax.f32 %v7633_v27, 0.0  ;;  %v7635_v8 = vld [vmem:[#allocation18_spill] sm:$0xff] }
 0x1b2   :  { %v1097_v44 = vmax.f32 %v7634_v29, 0.0  ;;  %v1098_v20 = vmax.f32 %v7635_v8, 0.0  ;;  %v4118_v27 = vpack.c.bf16 %v1039_v61, %v1038_v30  ;;  %v4121_v29 = vpack.c.bf16 %v1041_v59, %v1040_v54  ;;  %v7636_v59 = vld [vmem:[#allocation21_spill] sm:$0xff] }
 0x1b3   :  { %v4124_v8 = vpack.c.bf16 %v1043_v38, %v1042_v26  ;;  %v4127_v30 = vpack.c.bf16 %v1045_v6, %v1044_v22  ;;  %v4130_v61 = vpack.c.bf16 %v1047_v42, %v1046_v62  ;;  %v4133_v54 = vpack.c.bf16 %v1049_v18, %v1048_v7  ;;  %v7637_v42 = vld [vmem:[#allocation20_spill] sm:$0xff] }
 0x1b4   :  { %v1099_v26 = vmax.f32 %v7636_v59, 0.0  ;;  %4119 = vmatpush1.bf16.msra.mxu0 %v4118_v27  ;;  %4381 = vmatpush1.bf16.msra.mxu1 %v4118_v27  ;;  %v4136_v38 = vpack.c.bf16 %v1051_v28, %v1050_v36  ;;  %v4139_v6 = vpack.c.bf16 %v1053_v37, %v1052_v50  ;;  %v4142_v22 = vpack.c.bf16 %v1055_v52, %v1054_v2 }
 0x1b5   :  { %v1101_v62 = vmax.f32 %v7637_v42, 0.0  ;;  %v7638_v7 = vmov 0.0|0.0   ;;  %v4145_v18 = vpack.c.bf16 %v1057_v60, %v1056_v46  ;;  %v4148_v59 = vpack.c.bf16 %v1059_v5, %v1058_v40 }
 0x1b6   :  { %4120 = vmatprep.subr.bf16.mxu0 %v7638_v7  ;;  %4366 = vmatprep.subr.bf16.mxu1 %v7638_v7  ;;  %v4151_v27 = vpack.c.bf16 %v1061_v10, %v1060_v3  ;;  %v5758_v28 = vpack.c.bf16 %v1063_v17, %v1062_v9  ;;  %v5760_v36 = vpack.c.bf16 %v1065_v25, %v1064_v16  ;;  %v7639_v5 = vmov 0.0|0.0  }
 0x1b7   :  { %v5762_v37 = vpack.c.bf16 %v1067_v33, %v1066_v23  ;;  %v5764_v50 = vpack.c.bf16 %v1069_v41, %v1068_v31  ;;  %v5766_v2 = vpack.c.bf16 %v1071_v49, %v1070_v39  ;;  %v5768_v52 = vpack.c.bf16 %v1073_v57, %v1072_v47  ;;  %v7640_v31 = vld [vmem:[#allocation27_spill] sm:$0xff]  ;;  %v1174_v49 = vld [vmem:[%s7506_s9 + $0x240] sm:$0xff] }
 0x1b8   :  { %v5770_v42 = vpack.c.bf16 %v1075_v1, %v1074_v55  ;;  %v5772_v7 = vpack.c.bf16 %v1077_v13, %v1076_v63  ;;  %4122 = vmatpush1.bf16.msra.mxu0 %v4121_v29  ;;  %4382 = vmatpush1.bf16.msra.mxu1 %v4121_v29  ;;  %v5774_v46 = vpack.c.bf16 %v1079_v24, %v1078_v11  ;;  %v7641_v41 = vmax.f32 %v7640_v31, 0.0  ;;  %v1179_v47 = vld [vmem:[%s7506_s9 + $0x268] sm:$0xff]  ;;  %v1178_v57 = vld [vmem:[%s7506_s9 + $0x260] sm:$0xff] }
 0x1b9   :  { %v5776_v60 = vpack.c.bf16 %v1081_v35, %v1080_v21  ;;  %v5778_v40 = vpack.c.bf16 %v1083_v45, %v1082_v32  ;;  %4123 = vmatprep.subr.bf16.mxu0 %v7639_v5  ;;  %4367 = vmatprep.subr.bf16.mxu1 %v7639_v5  ;;  %v5782_v3 = vpack.c.bf16 %v1085_v56, %v1084_v43  ;;  %v1183_v55 = vld [vmem:[%s7506_s9 + $0x288] sm:$0xff]  ;;  %v1182_v1 = vld [vmem:[%s7506_s9 + $0x280] sm:$0xff] }
 0x1ba   :  { %v5784_v10 = vpack.c.bf16 %v1087_v4, %v1086_v53  ;;  %v5786_v9 = vpack.c.bf16 %v1089_v19, %v1088_v0  ;;  %v5788_v17 = vpack.c.bf16 %v1091_v34, %v1090_v15  ;;  %v5790_v16 = vpack.c.bf16 %v1093_v51, %v1092_v48  ;;  %v1187_v63 = vld [vmem:[%s7506_s9 + $0x2a8] sm:$0xff]  ;;  %v1186_v13 = vld [vmem:[%s7506_s9 + $0x2a0] sm:$0xff] }
 0x1bb   :  { %v5792_v25 = vpack.c.bf16 %v1095_v12, %v1094_v14  ;;  %v5794_v23 = vpack.c.bf16 %v1097_v44, %v1096_v58  ;;  %v5796_v33 = vpack.c.bf16 %v1099_v26, %v1098_v20  ;;  %v5800_v39 = vpack.c.bf16 %v1101_v62, %v7641_v41  ;;  %v1191_v11 = vld [vmem:[%s7506_s9 + $0x2c8] sm:$0xff]  ;;  %v1190_v24 = vld [vmem:[%s7506_s9 + $0x2c0] sm:$0xff] }
 0x1bc   :  { %4125 = vmatpush1.bf16.msra.mxu0 %v4124_v8  ;;  %4383 = vmatpush1.bf16.msra.mxu1 %v4124_v8  ;;  %v1195_v21 = vld [vmem:[%s7506_s9 + $0x2e8] sm:$0xff]  ;;  %v1194_v35 = vld [vmem:[%s7506_s9 + $0x2e0] sm:$0xff] }
 0x1bd   :  { %4126 = vmatprep.subr.bf16.mxu0 %v7639_v5  ;;  %4368 = vmatprep.subr.bf16.mxu1 %v7639_v5  ;;  %v1199_v32 = vld [vmem:[%s7506_s9 + $0x308] sm:$0xff]  ;;  %v1198_v45 = vld [vmem:[%s7506_s9 + $0x300] sm:$0xff] }
 0x1be   :  { %v1203_v43 = vld [vmem:[%s7506_s9 + $0x328] sm:$0xff]  ;;  %v1202_v56 = vld [vmem:[%s7506_s9 + $0x320] sm:$0xff] }
 0x1bf   :  { %v1207_v53 = vld [vmem:[%s7506_s9 + $0x348] sm:$0xff]  ;;  %v1206_v4 = vld [vmem:[%s7506_s9 + $0x340] sm:$0xff] }
 0x1c0   :  { %4128 = vmatpush1.bf16.msra.mxu0 %v4127_v30  ;;  %4384 = vmatpush1.bf16.msra.mxu1 %v4127_v30  ;;  %v1211_v0 = vld [vmem:[%s7506_s9 + $0x368] sm:$0xff]  ;;  %v1210_v19 = vld [vmem:[%s7506_s9 + $0x360] sm:$0xff] }
 0x1c1   :  { %4129 = vmatprep.subr.bf16.mxu0 %v7639_v5  ;;  %4369 = vmatprep.subr.bf16.mxu1 %v7639_v5  ;;  %v1215_v15 = vld [vmem:[%s7506_s9 + $0x388] sm:$0xff]  ;;  %v1214_v34 = vld [vmem:[%s7506_s9 + $0x380] sm:$0xff] }
 0x1c2   :  { %v1219_v48 = vld [vmem:[%s7506_s9 + $0x3a8] sm:$0xff]  ;;  %v1218_v51 = vld [vmem:[%s7506_s9 + $0x3a0] sm:$0xff] }
 0x1c3   :  { %v1223_v14 = vld [vmem:[%s7506_s9 + $0x3c8] sm:$0xff]  ;;  %v1222_v12 = vld [vmem:[%s7506_s9 + $0x3c0] sm:$0xff] }
 0x1c4   :  { %4131 = vmatpush1.bf16.msra.mxu0 %v4130_v61  ;;  %4385 = vmatpush1.bf16.msra.mxu1 %v4130_v61  ;;  %v1227_v58 = vld [vmem:[%s7506_s9 + $0x3e8] sm:$0xff]  ;;  %v1226_v44 = vld [vmem:[%s7506_s9 + $0x3e0] sm:$0xff] }
 0x1c5   :  { %4132 = vmatprep.subr.bf16.mxu0 %v7639_v5  ;;  %4370 = vmatprep.subr.bf16.mxu1 %v7639_v5  ;;  %v1231_v20 = vld [vmem:[%s7506_s9 + $0x408] sm:$0xff]  ;;  %v1230_v8 = vld [vmem:[%s7506_s9 + $0x400] sm:$0xff] }
 0x1c6   :  { %v1103_v29 = vld [vmem:[%s7506_s9 + $0x8] sm:$0xff]  ;;  %v1102_v30 = vld [vmem:[%s7506_s9] sm:$0xff] }
 0x1c7   :  { %v1235_v61 = vld [vmem:[%s7506_s9 + $0x428] sm:$0xff]  ;;  %1422 = vmatprep.mubr.f32.mxu0 %v1103_v29  ;;  %v1234_v26 = vld [vmem:[%s7506_s9 + $0x420] sm:$0xff] }
 0x1c8   :  { %4134 = vmatpush1.bf16.msra.mxu0 %v4133_v54  ;;  %4386 = vmatpush1.bf16.msra.mxu1 %v4133_v54  ;;  %v1107_v54 = vld [vmem:[%s7506_s9 + $0x28] sm:$0xff]  ;;  %v1238_v62 = vld [vmem:[%s7506_s9 + $0x440] sm:$0xff] }
 0x1c9   :  { %4135 = vmatprep.subr.bf16.mxu0 %v7639_v5  ;;  %4371 = vmatprep.subr.bf16.mxu1 %v7639_v5  ;;  %v1135_v31 = vld [vmem:[%s7506_s9 + $0x108] sm:$0xff]  ;;  %v1262_v41 = vld [vmem:[%s7506_s9 + $0x500] sm:$0xff] }
 0x1ca   :  { %v1295_v29 = vld [vmem:[%s7506_s9 + $0x608] sm:$0xff] }
 0x1cc   :  { %4137 = vmatpush1.bf16.msra.mxu0 %v4136_v38  ;;  %4387 = vmatpush1.bf16.msra.mxu1 %v4136_v38  ;;  %v1106_v38 = vld [vmem:[%s7506_s9 + $0x20] sm:$0xff] }
 0x1cd   :  { %4138 = vmatprep.subr.bf16.mxu0 %v7639_v5  ;;  %4372 = vmatprep.subr.bf16.mxu1 %v7639_v5 }
 0x1d0   :  { %4140 = vmatpush1.bf16.msra.mxu0 %v4139_v6  ;;  %4388 = vmatpush1.bf16.msra.mxu1 %v4139_v6  ;;  %v1239_v6 = vld [vmem:[%s7506_s9 + $0x448] sm:$0xff] }
 0x1d1   :  { %4141 = vmatprep.subr.bf16.mxu0 %v7639_v5  ;;  %4373 = vmatprep.subr.bf16.mxu1 %v7639_v5 }
 0x1d4   :  { %4143 = vmatpush1.bf16.msra.mxu0 %v4142_v22  ;;  %4389 = vmatpush1.bf16.msra.mxu1 %v4142_v22  ;;  %v1111_v22 = vld [vmem:[%s7506_s9 + $0x48] sm:$0xff] }
 0x1d5   :  { %4144 = vmatprep.subr.bf16.mxu0 %v7639_v5  ;;  %4374 = vmatprep.subr.bf16.mxu1 %v7639_v5 }
 0x1d8   :  { %4146 = vmatpush1.bf16.msra.mxu0 %v4145_v18  ;;  %4390 = vmatpush1.bf16.msra.mxu1 %v4145_v18  ;;  %v1243_v18 = vld [vmem:[%s7506_s9 + $0x468] sm:$0xff] }
 0x1d9   :  { %4147 = vmatprep.subr.bf16.mxu0 %v7639_v5  ;;  %4375 = vmatprep.subr.bf16.mxu1 %v7639_v5 }
 0x1dc   :  { %4149 = vmatpush1.bf16.msra.mxu0 %v4148_v59  ;;  %4391 = vmatpush1.bf16.msra.mxu1 %v4148_v59  ;;  %v1115_v59 = vld [vmem:[%s7506_s9 + $0x68] sm:$0xff] }
 0x1dd   :  { %4150 = vmatprep.subr.bf16.mxu0 %v7639_v5  ;;  %4376 = vmatprep.subr.bf16.mxu1 %v7639_v5 }
 0x1e0   :  { %4152 = vmatpush1.bf16.msra.mxu0 %v4151_v27  ;;  %4392 = vmatpush1.bf16.msra.mxu1 %v4151_v27  ;;  %v1242_v27 = vld [vmem:[%s7506_s9 + $0x460] sm:$0xff] }
 0x1e1   :  { %4153 = vmatprep.subr.bf16.mxu0 %v7639_v5  ;;  %4377 = vmatprep.subr.bf16.mxu1 %v7639_v5 }
 0x1e4   :  { %4155 = vmatpush1.bf16.msra.mxu0 %v5758_v28  ;;  %4393 = vmatpush1.bf16.msra.mxu1 %v5758_v28  ;;  %v1114_v28 = vld [vmem:[%s7506_s9 + $0x60] sm:$0xff] }
 0x1e5   :  { %4156 = vmatprep.subr.bf16.mxu0 %v7639_v5  ;;  %4378 = vmatprep.subr.bf16.mxu1 %v7639_v5 }
 0x1e8   :  { %4158 = vmatpush1.bf16.msra.mxu0 %v5760_v36  ;;  %4394 = vmatpush1.bf16.msra.mxu1 %v5760_v36  ;;  %v1247_v36 = vld [vmem:[%s7506_s9 + $0x488] sm:$0xff] }
 0x1e9   :  { %4159 = vmatprep.subr.bf16.mxu0 %v7639_v5  ;;  %4379 = vmatprep.subr.bf16.mxu1 %v7639_v5 }
 0x1ec   :  { %4161 = vmatpush1.bf16.msra.mxu0 %v5762_v37  ;;  %4395 = vmatpush1.bf16.msra.mxu1 %v5762_v37  ;;  %v1119_v37 = vld [vmem:[%s7506_s9 + $0x88] sm:$0xff] }
 0x1ed   :  { %4162 = vmatprep.subr.bf16.mxu0 %v7639_v5  ;;  %4380 = vmatprep.subr.bf16.mxu1 %v7639_v5 }
 0x1f0   :  { %4164 = vmatpush1.bf16.msra.mxu0 %v5764_v50  ;;  %4396 = vmatpush1.bf16.msra.mxu1 %v5764_v50  ;;  %v1246_v50 = vld [vmem:[%s7506_s9 + $0x480] sm:$0xff] }
 0x1f1   :  { %4165 = vmatprep.subr.bf16.mxu1 %v7639_v5 }
 0x1f3   :  { %1513 = vmatmul.mubr.f32.vlgmr.msra.gmra.mrb[0].mxu1 %v1174_v49  ;;  %1423 = vmatmul.mubr.f32.vlgmr.msra.gmra.mrb[64].mxu0 %v1102_v30  ;;  %v1267_v49 = vld [vmem:[%s7506_s9 + $0x528] sm:$0xff]  ;;  %v1294_v30 = vld [vmem:[%s7506_s9 + $0x600] sm:$0xff] }
 0x1f4   :  { %4167 = vmatpush1.bf16.msra.mxu1 %v5766_v2  ;;  %1517 = vmatprep.mubr.f32.mxu1 %v1179_v47  ;;  %v1118_v2 = vld [vmem:[%s7506_s9 + $0x80] sm:$0xff]  ;;  %v1139_v47 = vld [vmem:[%s7506_s9 + $0x128] sm:$0xff] }
 0x1f5   :  { %4168 = vmatprep.subr.bf16.mxu1 %v7639_v5  ;;  %1427 = vmatprep.mubr.f32.mxu0 %v1107_v54  ;;  %v1299_v54 = vld [vmem:[%s7506_s9 + $0x628] sm:$0xff] }
 0x1f7   :  { %1518 = vmatmul.mubr.f32.gmra.mrb[2].mxu1 %v1178_v57  ;;  %1428 = vmatmul.mubr.f32.gmra.mrb[66].mxu0 %v1106_v38  ;;  %v1266_v57 = vld [vmem:[%s7506_s9 + $0x520] sm:$0xff] }
 0x1f8   :  { %4170 = vmatpush1.bf16.msra.mxu1 %v5768_v52  ;;  %1522 = vmatprep.mubr.f32.mxu1 %v1183_v55  ;;  %v1251_v52 = vld [vmem:[%s7506_s9 + $0x4a8] sm:$0xff]  ;;  %v1138_v55 = vld [vmem:[%s7506_s9 + $0x120] sm:$0xff] }
 0x1f9   :  { %4171 = vmatprep.subr.bf16.mxu1 %v7639_v5  ;;  %1432 = vmatprep.mubr.f32.mxu0 %v1111_v22  ;;  %v1298_v38 = vld [vmem:[%s7506_s9 + $0x620] sm:$0xff]  ;;  %v1303_v22 = vld [vmem:[%s7506_s9 + $0x648] sm:$0xff] }
 0x1fb   :  { %1523 = vmatmul.mubr.f32.gmra.mrb[4].mxu1 %v1182_v1  ;;  %v1271_v1 = vld [vmem:[%s7506_s9 + $0x548] sm:$0xff] }
 0x1fc   :  { %4173 = vmatpush1.bf16.msra.mxu1 %v5770_v42  ;;  %1527 = vmatprep.mubr.f32.mxu1 %v1187_v63  ;;  %v1123_v42 = vld [vmem:[%s7506_s9 + $0xa8] sm:$0xff] }
 0x1fd   :  { %4174 = vmatprep.subr.bf16.mxu1 %v7639_v5  ;;  %v1143_v63 = vld [vmem:[%s7506_s9 + $0x148] sm:$0xff] }
 0x1ff   :  { %1528 = vmatmul.mubr.f32.gmra.mrb[6].mxu1 %v1186_v13  ;;  %v1270_v13 = vld [vmem:[%s7506_s9 + $0x540] sm:$0xff] }
 0x200   :  { %4176 = vmatpush1.bf16.msra.mxu1 %v5772_v7  ;;  %1532 = vmatprep.mubr.f32.mxu1 %v1191_v11  ;;  %v1110_v7 = vld [vmem:[%s7506_s9 + $0x40] sm:$0xff] }
 0x201   :  { %4177 = vmatprep.subr.bf16.mxu1 %v7639_v5  ;;  %1433 = vmatmul.mubr.f32.gmra.mrb[68].mxu0 %v1110_v7  ;;  %v1142_v11 = vld [vmem:[%s7506_s9 + $0x140] sm:$0xff]  ;;  %v1307_v7 = vld [vmem:[%s7506_s9 + $0x668] sm:$0xff] }
 0x202   :  { %1437 = vmatprep.mubr.f32.mxu0 %v1115_v59  ;;  %v1311_v59 = vld [vmem:[%s7506_s9 + $0x688] sm:$0xff] }
 0x203   :  { %1533 = vmatmul.mubr.f32.gmra.mrb[8].mxu1 %v1190_v24  ;;  %v1275_v24 = vld [vmem:[%s7506_s9 + $0x568] sm:$0xff] }
 0x204   :  { %4179 = vmatpush1.bf16.msra.mxu1 %v5774_v46  ;;  %1537 = vmatprep.mubr.f32.mxu1 %v1195_v21  ;;  %v1250_v46 = vld [vmem:[%s7506_s9 + $0x4a0] sm:$0xff]  ;;  %v1147_v21 = vld [vmem:[%s7506_s9 + $0x168] sm:$0xff] }
 0x205   :  { %4180 = vmatprep.subr.bf16.mxu1 %v7639_v5  ;;  %1438 = vmatmul.mubr.f32.gmra.mrb[70].mxu0 %v1114_v28  ;;  %v1315_v28 = vld [vmem:[%s7506_s9 + $0x6a8] sm:$0xff] }
 0x206   :  { %1442 = vmatprep.mubr.f32.mxu0 %v1119_v37  ;;  %v1319_v37 = vld [vmem:[%s7506_s9 + $0x6c8] sm:$0xff] }
 0x207   :  { %1538 = vmatmul.mubr.f32.gmra.mrb[10].mxu1 %v1194_v35  ;;  %v1274_v35 = vld [vmem:[%s7506_s9 + $0x560] sm:$0xff] }
 0x208   :  { %4182 = vmatpush1.bf16.msra.mxu1 %v5776_v60  ;;  %1542 = vmatprep.mubr.f32.mxu1 %v1199_v32  ;;  %v1122_v60 = vld [vmem:[%s7506_s9 + $0xa0] sm:$0xff] }
 0x209   :  { %4183 = vmatprep.subr.bf16.mxu1 %v7639_v5  ;;  %1443 = vmatmul.mubr.f32.gmra.mrb[72].mxu0 %v1118_v2  ;;  %v1146_v32 = vld [vmem:[%s7506_s9 + $0x160] sm:$0xff]  ;;  %v1323_v2 = vld [vmem:[%s7506_s9 + $0x6e8] sm:$0xff] }
 0x20a   :  { %1447 = vmatprep.mubr.f32.mxu0 %v1123_v42  ;;  %v1327_v42 = vld [vmem:[%s7506_s9 + $0x708] sm:$0xff] }
 0x20b   :  { %1543 = vmatmul.mubr.f32.gmra.mrb[12].mxu1 %v1198_v45  ;;  %v1279_v45 = vld [vmem:[%s7506_s9 + $0x588] sm:$0xff] }
 0x20c   :  { %4185 = vmatpush1.bf16.msra.mxu1 %v5778_v40  ;;  %1547 = vmatprep.mubr.f32.mxu1 %v1203_v43  ;;  %v1255_v40 = vld [vmem:[%s7506_s9 + $0x4c8] sm:$0xff] }
 0x20d   :  { %4186 = vmatprep.subr.bf16.mxu1 %v7639_v5  ;;  %1448 = vmatmul.mubr.f32.gmra.mrb[74].mxu0 %v1122_v60  ;;  %v1151_v43 = vld [vmem:[%s7506_s9 + $0x188] sm:$0xff] }
 0x20e   :  { %v1331_v60 = vld [vmem:[%s7506_s9 + $0x728] sm:$0xff] }
 0x20f   :  { %1548 = vmatmul.mubr.f32.gmra.mrb[14].mxu1 %v1202_v56  ;;  %v1278_v56 = vld [vmem:[%s7506_s9 + $0x580] sm:$0xff] }
 0x210   :  { %4188 = vmatpush1.bf16.msra.mxu1 %v5782_v3  ;;  %1552 = vmatprep.mubr.f32.mxu1 %v1207_v53  ;;  %v1127_v3 = vld [vmem:[%s7506_s9 + $0xc8] sm:$0xff]  ;;  %v1150_v53 = vld [vmem:[%s7506_s9 + $0x180] sm:$0xff] }
 0x211   :  { %4189 = vmatprep.subr.bf16.mxu1 %v7639_v5  ;;  %1452 = vmatprep.mubr.f32.mxu0 %v1127_v3  ;;  %v1335_v3 = vld [vmem:[%s7506_s9 + $0x748] sm:$0xff] }
 0x213   :  { %1553 = vmatmul.mubr.f32.gmra.mrb[16].mxu1 %v1206_v4  ;;  %v1283_v4 = vld [vmem:[%s7506_s9 + $0x5a8] sm:$0xff] }
 0x214   :  { %4191 = vmatpush1.bf16.msra.mxu1 %v5784_v10  ;;  %1557 = vmatprep.mubr.f32.mxu1 %v1211_v0  ;;  %v1254_v10 = vld [vmem:[%s7506_s9 + $0x4c0] sm:$0xff]  ;;  %v1155_v0 = vld [vmem:[%s7506_s9 + $0x1a8] sm:$0xff] }
 0x215   :  { %4192 = vmatprep.subr.bf16.mxu1 %v7639_v5 }
 0x217   :  { %1558 = vmatmul.mubr.f32.gmra.mrb[18].mxu1 %v1210_v19  ;;  %v1282_v19 = vld [vmem:[%s7506_s9 + $0x5a0] sm:$0xff] }
 0x218   :  { %4194 = vmatpush1.bf16.msra.mxu1 %v5786_v9  ;;  %1562 = vmatprep.mubr.f32.mxu1 %v1215_v15  ;;  %v1126_v9 = vld [vmem:[%s7506_s9 + $0xc0] sm:$0xff] }
 0x219   :  { %4195 = vmatprep.subr.bf16.mxu1 %v7639_v5  ;;  %1453 = vmatmul.mubr.f32.gmra.mrb[76].mxu0 %v1126_v9  ;;  %v1154_v15 = vld [vmem:[%s7506_s9 + $0x1a0] sm:$0xff]  ;;  %v1339_v9 = vld [vmem:[%s7506_s9 + $0x768] sm:$0xff] }
 0x21b   :  { %1563 = vmatmul.mubr.f32.gmra.mrb[20].mxu1 %v1214_v34  ;;  %v1287_v34 = vld [vmem:[%s7506_s9 + $0x5c8] sm:$0xff] }
 0x21c   :  { %4197 = vmatpush1.bf16.msra.mxu1 %v5788_v17  ;;  %1567 = vmatprep.mubr.f32.mxu1 %v1219_v48  ;;  %v1259_v17 = vld [vmem:[%s7506_s9 + $0x4e8] sm:$0xff] }
 0x21d   :  { %4198 = vmatprep.subr.bf16.mxu1 %v7639_v5  ;;  %v1159_v48 = vld [vmem:[%s7506_s9 + $0x1c8] sm:$0xff] }
 0x21f   :  { %1568 = vmatmul.mubr.f32.gmra.mrb[22].mxu1 %v1218_v51  ;;  %v1286_v51 = vld [vmem:[%s7506_s9 + $0x5c0] sm:$0xff] }
 0x220   :  { %4200 = vmatpush1.bf16.msra.mxu1 %v5790_v16  ;;  %1572 = vmatprep.mubr.f32.mxu1 %v1223_v14  ;;  %v1131_v16 = vld [vmem:[%s7506_s9 + $0xe8] sm:$0xff]  ;;  %v1158_v14 = vld [vmem:[%s7506_s9 + $0x1c0] sm:$0xff] }
 0x221   :  { %4201 = vmatprep.subr.bf16.mxu1 %v7639_v5  ;;  %1457 = vmatprep.mubr.f32.mxu0 %v1131_v16  ;;  %v1343_v16 = vld [vmem:[%s7506_s9 + $0x788] sm:$0xff] }
 0x223   :  { %1573 = vmatmul.mubr.f32.gmra.mrb[24].mxu1 %v1222_v12  ;;  %v1291_v12 = vld [vmem:[%s7506_s9 + $0x5e8] sm:$0xff] }
 0x224   :  { %4203 = vmatpush1.bf16.msra.mxu1 %v5792_v25  ;;  %1577 = vmatprep.mubr.f32.mxu1 %v1227_v58  ;;  %v1258_v25 = vld [vmem:[%s7506_s9 + $0x4e0] sm:$0xff]  ;;  %v1163_v58 = vld [vmem:[%s7506_s9 + $0x1e8] sm:$0xff] }
 0x225   :  { %4204 = vmatprep.subr.bf16.mxu1 %v7639_v5 }
 0x227   :  { %1578 = vmatmul.mubr.f32.gmra.mrb[26].mxu1 %v1226_v44  ;;  %v1290_v44 = vld [vmem:[%s7506_s9 + $0x5e0] sm:$0xff] }
 0x228   :  { %4206 = vmatpush1.bf16.msra.mxu1 %v5794_v23  ;;  %1582 = vmatprep.mubr.f32.mxu1 %v1231_v20  ;;  %v1130_v23 = vld [vmem:[%s7506_s9 + $0xe0] sm:$0xff] }
 0x229   :  { %4207 = vmatprep.subr.bf16.mxu1 %v7639_v5  ;;  %1458 = vmatmul.mubr.f32.gmra.mrb[78].mxu0 %v1130_v23  ;;  %v1162_v20 = vld [vmem:[%s7506_s9 + $0x1e0] sm:$0xff]  ;;  %v1347_v23 = vld [vmem:[%s7506_s9 + $0x7a8] sm:$0xff] }
 0x22a   :  { %1462 = vmatprep.mubr.f32.mxu0 %v1135_v31  ;;  %v1351_v31 = vld [vmem:[%s7506_s9 + $0x7c8] sm:$0xff] }
 0x22b   :  { %1583 = vmatmul.mubr.f32.gmra.mrb[28].mxu1 %v1230_v8  ;;  %v1167_v8 = vld [vmem:[%s7506_s9 + $0x208] sm:$0xff] }
 0x22c   :  { %4209 = vmatpush1.bf16.msra.mxu1 %v5796_v33  ;;  %1587 = vmatprep.mubr.f32.mxu1 %v1235_v61  ;;  %v1263_v33 = vld [vmem:[%s7506_s9 + $0x508] sm:$0xff]  ;;  %v1166_v61 = vld [vmem:[%s7506_s9 + $0x200] sm:$0xff] }
 0x22d   :  { %4210 = vmatprep.subr.bf16.mxu1 %v7639_v5 }
 0x22f   :  { %1588 = vmatmul.mubr.f32.gmra.mrb[30].mxu1 %v1234_v26  ;;  %v1171_v26 = vld [vmem:[%s7506_s9 + $0x228] sm:$0xff] }
 0x230   :  { %4212 = vmatpush1.bf16.msra.mxu1 %v5800_v39  ;;  %1592 = vmatprep.mubr.f32.mxu1 %v1239_v6  ;;  %v1134_v39 = vld [vmem:[%s7506_s9 + $0x100] sm:$0xff] }
 0x231   :  { %1463 = vmatmul.mubr.f32.gmra.mrb[80].mxu0 %v1134_v39  ;;  %v1170_v6 = vld [vmem:[%s7506_s9 + $0x220] sm:$0xff]  ;;  %v1355_v39 = vld [vmem:[%s7506_s9 + $0x7e8] sm:$0xff] }
 0x232   :  { %1467 = vmatprep.mubr.f32.mxu0 %v1139_v47  ;;  %v1105_v47 = vld [vmem:[%s7506_s9 + $0x18] sm:$0xff] }
 0x233   :  { %1593 = vmatmul.mubr.f32.gmra.mrb[32].mxu1 %v1238_v62  ;;  %v1302_v62 = vld [vmem:[%s7506_s9 + $0x640] sm:$0xff] }
 0x234   :  { %1597 = vmatprep.mubr.f32.mxu1 %v1243_v18  ;;  %v1306_v18 = vld [vmem:[%s7506_s9 + $0x660] sm:$0xff] }
 0x235   :  { %1468 = vmatmul.mubr.f32.gmra.mrb[82].mxu0 %v1138_v55  ;;  %v1109_v55 = vld [vmem:[%s7506_s9 + $0x38] sm:$0xff] }
 0x236   :  { %1472 = vmatprep.mubr.f32.mxu0 %v1143_v63  ;;  %v1113_v63 = vld [vmem:[%s7506_s9 + $0x58] sm:$0xff] }
 0x237   :  { %1598 = vmatmul.mubr.f32.gmra.mrb[34].mxu1 %v1242_v27  ;;  %v1310_v27 = vld [vmem:[%s7506_s9 + $0x680] sm:$0xff] }
 0x238   :  { %1602 = vmatprep.mubr.f32.mxu1 %v1247_v36  ;;  %v1314_v36 = vld [vmem:[%s7506_s9 + $0x6a0] sm:$0xff] }
 0x239   :  { %1473 = vmatmul.mubr.f32.gmra.mrb[84].mxu0 %v1142_v11  ;;  %v1117_v11 = vld [vmem:[%s7506_s9 + $0x78] sm:$0xff] }
 0x23a   :  { %1477 = vmatprep.mubr.f32.mxu0 %v1147_v21  ;;  %v1121_v21 = vld [vmem:[%s7506_s9 + $0x98] sm:$0xff] }
 0x23b   :  { %1603 = vmatmul.mubr.f32.gmra.mrb[36].mxu1 %v1246_v50  ;;  %v1318_v50 = vld [vmem:[%s7506_s9 + $0x6c0] sm:$0xff] }
 0x23c   :  { %1607 = vmatprep.mubr.f32.mxu1 %v1251_v52  ;;  %v1322_v52 = vld [vmem:[%s7506_s9 + $0x6e0] sm:$0xff] }
 0x23d   :  { %1478 = vmatmul.mubr.f32.gmra.mrb[86].mxu0 %v1146_v32  ;;  %v1125_v32 = vld [vmem:[%s7506_s9 + $0xb8] sm:$0xff] }
 0x23e   :  { %1482 = vmatprep.mubr.f32.mxu0 %v1151_v43  ;;  %v1129_v43 = vld [vmem:[%s7506_s9 + $0xd8] sm:$0xff] }
 0x23f   :  { %1608 = vmatmul.mubr.f32.gmra.mrb[38].mxu1 %v1250_v46  ;;  %v1326_v46 = vld [vmem:[%s7506_s9 + $0x700] sm:$0xff] }
 0x240   :  { %1612 = vmatprep.mubr.f32.mxu1 %v1255_v40  ;;  %v1330_v40 = vld [vmem:[%s7506_s9 + $0x720] sm:$0xff] }
 0x241   :  { %1483 = vmatmul.mubr.f32.gmra.mrb[88].mxu0 %v1150_v53  ;;  %v1133_v53 = vld [vmem:[%s7506_s9 + $0xf8] sm:$0xff] }
 0x242   :  { %1487 = vmatprep.mubr.f32.mxu0 %v1155_v0  ;;  %v1137_v0 = vld [vmem:[%s7506_s9 + $0x118] sm:$0xff] }
 0x243   :  { %1613 = vmatmul.mubr.f32.gmra.mrb[40].mxu1 %v1254_v10  ;;  %v1334_v10 = vld [vmem:[%s7506_s9 + $0x740] sm:$0xff] }
 0x244   :  { %1617 = vmatprep.mubr.f32.mxu1 %v1259_v17  ;;  %v1338_v17 = vld [vmem:[%s7506_s9 + $0x760] sm:$0xff] }
 0x245   :  { %1488 = vmatmul.mubr.f32.gmra.mrb[90].mxu0 %v1154_v15  ;;  %v1141_v15 = vld [vmem:[%s7506_s9 + $0x138] sm:$0xff] }
 0x246   :  { %1492 = vmatprep.mubr.f32.mxu0 %v1159_v48  ;;  %v1145_v48 = vld [vmem:[%s7506_s9 + $0x158] sm:$0xff] }
 0x247   :  { %1618 = vmatmul.mubr.f32.gmra.mrb[42].mxu1 %v1258_v25  ;;  %v1342_v25 = vld [vmem:[%s7506_s9 + $0x780] sm:$0xff] }
 0x248   :  { %1622 = vmatprep.mubr.f32.mxu1 %v1263_v33  ;;  %v1346_v33 = vld [vmem:[%s7506_s9 + $0x7a0] sm:$0xff] }
 0x249   :  { %1493 = vmatmul.mubr.f32.gmra.mrb[92].mxu0 %v1158_v14  ;;  %v1149_v14 = vld [vmem:[%s7506_s9 + $0x178] sm:$0xff] }
 0x24a   :  { %1497 = vmatprep.mubr.f32.mxu0 %v1163_v58  ;;  %v1153_v58 = vld [vmem:[%s7506_s9 + $0x198] sm:$0xff] }
 0x24b   :  { %1623 = vmatmul.mubr.f32.gmra.mrb[44].mxu1 %v1262_v41  ;;  %v1350_v41 = vld [vmem:[%s7506_s9 + $0x7c0] sm:$0xff] }
 0x24c   :  { %1627 = vmatprep.mubr.f32.mxu1 %v1267_v49  ;;  %v1354_v49 = vld [vmem:[%s7506_s9 + $0x7e0] sm:$0xff] }
 0x24d   :  { %1498 = vmatmul.mubr.f32.gmra.mrb[94].mxu0 %v1162_v20  ;;  %v1157_v20 = vld [vmem:[%s7506_s9 + $0x1b8] sm:$0xff] }
 0x24e   :  { %1502 = vmatprep.mubr.f32.mxu0 %v1167_v8  ;;  %v1161_v8 = vld [vmem:[%s7506_s9 + $0x1d8] sm:$0xff] }
 0x24f   :  { %1628 = vmatmul.mubr.f32.gmra.mrb[46].mxu1 %v1266_v57  ;;  %v1104_v57 = vld [vmem:[%s7506_s9 + $0x10] sm:$0xff] }
 0x250   :  { %1632 = vmatprep.mubr.f32.mxu1 %v1271_v1  ;;  %v1108_v1 = vld [vmem:[%s7506_s9 + $0x30] sm:$0xff] }
 0x251   :  { %1503 = vmatmul.mubr.f32.gmra.mrb[96].mxu0 %v1166_v61  ;;  %v1165_v61 = vld [vmem:[%s7506_s9 + $0x1f8] sm:$0xff] }
 0x252   :  { %1507 = vmatprep.mubr.f32.mxu0 %v1171_v26  ;;  %v1169_v26 = vld [vmem:[%s7506_s9 + $0x218] sm:$0xff] }
 0x253   :  { %1633 = vmatmul.mubr.f32.gmra.mrb[48].mxu1 %v1270_v13  ;;  %v1112_v13 = vld [vmem:[%s7506_s9 + $0x50] sm:$0xff] }
 0x254   :  { %1637 = vmatprep.mubr.f32.mxu1 %v1275_v24  ;;  %v1116_v24 = vld [vmem:[%s7506_s9 + $0x70] sm:$0xff] }
 0x255   :  { %1508 = vmatmul.mubr.f32.gmra.mrb[98].mxu0 %v1170_v6  ;;  %v1173_v6 = vld [vmem:[%s7506_s9 + $0x238] sm:$0xff] }
 0x257   :  { %1638 = vmatmul.mubr.f32.gmra.mrb[50].mxu1 %v1274_v35  ;;  %v1120_v35 = vld [vmem:[%s7506_s9 + $0x90] sm:$0xff] }
 0x258   :  { %1642 = vmatprep.mubr.f32.mxu1 %v1279_v45  ;;  %v1124_v45 = vld [vmem:[%s7506_s9 + $0xb0] sm:$0xff] }
 0x25b   :  { %1643 = vmatmul.mubr.f32.gmra.mrb[52].mxu1 %v1278_v56  ;;  %v1128_v56 = vld [vmem:[%s7506_s9 + $0xd0] sm:$0xff] }
 0x25c   :  { %1647 = vmatprep.mubr.f32.mxu1 %v1283_v4  ;;  %v1132_v4 = vld [vmem:[%s7506_s9 + $0xf0] sm:$0xff] }
 0x25f   :  { %1648 = vmatmul.mubr.f32.gmra.mrb[54].mxu1 %v1282_v19  ;;  %v1136_v19 = vld [vmem:[%s7506_s9 + $0x110] sm:$0xff] }
 0x260   :  { %1652 = vmatprep.mubr.f32.mxu1 %v1287_v34  ;;  %v1140_v34 = vld [vmem:[%s7506_s9 + $0x130] sm:$0xff] }
 0x263   :  { %1653 = vmatmul.mubr.f32.gmra.mrb[56].mxu1 %v1286_v51  ;;  %v1144_v51 = vld [vmem:[%s7506_s9 + $0x150] sm:$0xff] }
 0x264   :  { %1657 = vmatprep.mubr.f32.mxu1 %v1291_v12  ;;  %v1148_v12 = vld [vmem:[%s7506_s9 + $0x170] sm:$0xff] }
 0x267   :  { %1658 = vmatmul.mubr.f32.gmra.mrb[58].mxu1 %v1290_v44  ;;  %v1152_v44 = vld [vmem:[%s7506_s9 + $0x190] sm:$0xff] }
 0x268   :  { %1662 = vmatprep.mubr.f32.mxu1 %v1295_v29  ;;  %v1156_v29 = vld [vmem:[%s7506_s9 + $0x1b0] sm:$0xff] }
 0x26b   :  { %1663 = vmatmul.mubr.f32.gmra.mrb[60].mxu1 %v1294_v30  ;;  %v1160_v30 = vld [vmem:[%s7506_s9 + $0x1d0] sm:$0xff] }
 0x26c   :  { %1667 = vmatprep.mubr.f32.mxu1 %v1299_v54  ;;  %v1164_v54 = vld [vmem:[%s7506_s9 + $0x1f0] sm:$0xff] }
 0x26f   :  { %1668 = vmatmul.mubr.f32.gmra.mrb[62].mxu1 %v1298_v38  ;;  %v1168_v38 = vld [vmem:[%s7506_s9 + $0x210] sm:$0xff] }
 0x270   :  { %1672 = vmatprep.mubr.f32.mxu1 %v1303_v22  ;;  %v1172_v22 = vld [vmem:[%s7506_s9 + $0x230] sm:$0xff] }
 0x273   :  { %1673 = vmatmul.mubr.f32.gmra.mrb[64].mxu1 %v1302_v62  ;;  %v1177_v62 = vld [vmem:[%s7506_s9 + $0x258] sm:$0xff] }
 0x274   :  { %1677 = vmatprep.mubr.f32.mxu1 %v1307_v7  ;;  %v1176_v7 = vld [vmem:[%s7506_s9 + $0x250] sm:$0xff] }
 0x277   :  { %1678 = vmatmul.mubr.f32.gmra.mrb[66].mxu1 %v1306_v18  ;;  %v1181_v18 = vld [vmem:[%s7506_s9 + $0x278] sm:$0xff] }
 0x278   :  { %1682 = vmatprep.mubr.f32.mxu1 %v1311_v59  ;;  %v1180_v59 = vld [vmem:[%s7506_s9 + $0x270] sm:$0xff] }
 0x27b   :  { %1683 = vmatmul.mubr.f32.gmra.mrb[68].mxu1 %v1310_v27  ;;  %v1185_v27 = vld [vmem:[%s7506_s9 + $0x298] sm:$0xff] }
 0x27c   :  { %1687 = vmatprep.mubr.f32.mxu1 %v1315_v28  ;;  %v1184_v28 = vld [vmem:[%s7506_s9 + $0x290] sm:$0xff] }
 0x27f   :  { %1688 = vmatmul.mubr.f32.gmra.mrb[70].mxu1 %v1314_v36  ;;  %v1189_v36 = vld [vmem:[%s7506_s9 + $0x2b8] sm:$0xff] }
 0x280   :  { %1692 = vmatprep.mubr.f32.mxu1 %v1319_v37  ;;  %v1188_v37 = vld [vmem:[%s7506_s9 + $0x2b0] sm:$0xff] }
 0x283   :  { %1693 = vmatmul.mubr.f32.gmra.mrb[72].mxu1 %v1318_v50  ;;  %v1193_v50 = vld [vmem:[%s7506_s9 + $0x2d8] sm:$0xff] }
 0x284   :  { %1697 = vmatprep.mubr.f32.mxu1 %v1323_v2 }
 0x287   :  { %1698 = vmatmul.mubr.f32.gmra.mrb[74].mxu1 %v1322_v52 }
 0x288   :  { %1702 = vmatprep.mubr.f32.mxu1 %v1327_v42  ;;  %v1192_v42 = vld [vmem:[%s7506_s9 + $0x2d0] sm:$0xff] }
 0x28b   :  { %1703 = vmatmul.mubr.f32.gmra.mrb[76].mxu1 %v1326_v46  ;;  %v1197_v46 = vld [vmem:[%s7506_s9 + $0x2f8] sm:$0xff] }
 0x28c   :  { %1707 = vmatprep.mubr.f32.mxu1 %v1331_v60 }
 0x28f   :  { %1708 = vmatmul.mubr.f32.gmra.mrb[78].mxu1 %v1330_v40 }
 0x290   :  { %1712 = vmatprep.mubr.f32.mxu1 %v1335_v3  ;;  %v1196_v3 = vld [vmem:[%s7506_s9 + $0x2f0] sm:$0xff] }
 0x293   :  { %1713 = vmatmul.mubr.f32.gmra.mrb[80].mxu1 %v1334_v10  ;;  %v1201_v10 = vld [vmem:[%s7506_s9 + $0x318] sm:$0xff] }
 0x294   :  { %1717 = vmatprep.mubr.f32.mxu1 %v1339_v9 }
 0x297   :  { %1718 = vmatmul.mubr.f32.gmra.mrb[82].mxu1 %v1338_v17 }
 0x298   :  { %1722 = vmatprep.mubr.f32.mxu1 %v1343_v16  ;;  %v1200_v16 = vld [vmem:[%s7506_s9 + $0x310] sm:$0xff] }
 0x29b   :  { %1723 = vmatmul.mubr.f32.gmra.mrb[84].mxu1 %v1342_v25  ;;  %v1205_v25 = vld [vmem:[%s7506_s9 + $0x338] sm:$0xff] }
 0x29c   :  { %1727 = vmatprep.mubr.f32.mxu1 %v1347_v23 }
 0x29f   :  { %1728 = vmatmul.mubr.f32.gmra.mrb[86].mxu1 %v1346_v33 }
 0x2a0   :  { %1732 = vmatprep.mubr.f32.mxu1 %v1351_v31  ;;  %v1204_v31 = vld [vmem:[%s7506_s9 + $0x330] sm:$0xff] }
 0x2a3   :  { %1733 = vmatmul.mubr.f32.gmra.mrb[88].mxu1 %v1350_v41  ;;  %v1209_v41 = vld [vmem:[%s7506_s9 + $0x358] sm:$0xff] }
 0x2a4   :  { %1737 = vmatprep.mubr.f32.mxu1 %v1355_v39 }
 0x2a7   :  { %1738 = vmatmul.mubr.f32.gmra.mrb[90].mxu1 %v1354_v49 }
 0x2a8   :  { %1807 = vmatprep.mubr.f32.mxu1 %v1105_v47  ;;  %v1208_v47 = vld [vmem:[%s7506_s9 + $0x350] sm:$0xff] }
 0x2ab   :  { %1808 = vmatmul.mubr.f32.vlgmr.msra.gmra.mrb[92].mxu1 %v1104_v57  ;;  %v1213_v57 = vld [vmem:[%s7506_s9 + $0x378] sm:$0xff] }
 0x2ac   :  { %1812 = vmatprep.mubr.f32.mxu1 %v1109_v55 }
 0x2af   :  { %1813 = vmatmul.mubr.f32.gmra.mrb[94].mxu1 %v1108_v1 }
 0x2b0   :  { %1817 = vmatprep.mubr.f32.mxu1 %v1113_v63  ;;  %v1212_v63 = vld [vmem:[%s7506_s9 + $0x370] sm:$0xff] }
 0x2b3   :  { %1818 = vmatmul.mubr.f32.gmra.mrb[96].mxu1 %v1112_v13  ;;  %v1217_v13 = vld [vmem:[%s7506_s9 + $0x398] sm:$0xff] }
 0x2b4   :  { %1822 = vmatprep.mubr.f32.mxu1 %v1117_v11 }
 0x2b7   :  { %1823 = vmatmul.mubr.f32.gmra.mrb[98].mxu1 %v1116_v24 }
 0x2b8   :  { %1827 = vmatprep.mubr.f32.mxu1 %v1121_v21  ;;  %v1216_v21 = vld [vmem:[%s7506_s9 + $0x390] sm:$0xff] }
 0x2bb   :  { %1828 = vmatmul.mubr.f32.gmra.mrb[100].mxu1 %v1120_v35  ;;  %v1221_v35 = vld [vmem:[%s7506_s9 + $0x3b8] sm:$0xff] }
 0x2bc   :  { %1832 = vmatprep.mubr.f32.mxu1 %v1125_v32 }
 0x2bf   :  { %1833 = vmatmul.mubr.f32.gmra.mrb[102].mxu1 %v1124_v45 }
 0x2c0   :  { %1837 = vmatprep.mubr.f32.mxu1 %v1129_v43  ;;  %v1220_v43 = vld [vmem:[%s7506_s9 + $0x3b0] sm:$0xff] }
 0x2c3   :  { %1838 = vmatmul.mubr.f32.gmra.mrb[104].mxu1 %v1128_v56  ;;  %v1225_v56 = vld [vmem:[%s7506_s9 + $0x3d8] sm:$0xff] }
 0x2c4   :  { %1842 = vmatprep.mubr.f32.mxu1 %v1133_v53 }
 0x2c6   :  { %v6384_v2 = vpop.f32.mrb[64].mxu0 }
 0x2c7   :  { %1843 = vmatmul.mubr.f32.gmra.mrb[106].mxu1 %v1132_v4  ;;  %v1426_v52 = vpop.f32.mrb[65].mxu0 }
 0x2c8   :  { %1847 = vmatprep.mubr.f32.mxu1 %v1137_v0  ;;  %v1224_v0 = vld [vmem:[%s7506_s9 + $0x3d0] sm:$0xff]  ;;  %v1257_v52 = vld [vmem:[%s7506_s9 + $0x4d8] sm:$0xff] }
 0x2ca   :  { %v6392_v60 = vpop.f32.mrb[66].mxu0 }
 0x2cb   :  { %1848 = vmatmul.mubr.f32.gmra.mrb[108].mxu1 %v1136_v19  ;;  %v1431_v40 = vpop.f32.mrb[67].mxu0  ;;  %v1229_v19 = vld [vmem:[%s7506_s9 + $0x3f8] sm:$0xff] }
 0x2cc   :  { %1852 = vmatprep.mubr.f32.mxu1 %v1141_v15  ;;  %v1256_v40 = vld [vmem:[%s7506_s9 + $0x4d0] sm:$0xff] }
 0x2cf   :  { %1853 = vmatmul.mubr.f32.gmra.mrb[110].mxu1 %v1140_v34 }
 0x2d0   :  { %1857 = vmatprep.mubr.f32.mxu1 %v1145_v48  ;;  %v1228_v48 = vld [vmem:[%s7506_s9 + $0x3f0] sm:$0xff] }
 0x2d3   :  { %1858 = vmatmul.mubr.f32.gmra.mrb[112].mxu1 %v1144_v51  ;;  %v1233_v51 = vld [vmem:[%s7506_s9 + $0x418] sm:$0xff] }
 0x2d4   :  { %1862 = vmatprep.mubr.f32.mxu1 %v1149_v14  ;;  %v6400_v9 = vpop.f32.mrb[68].mxu0 }
 0x2d5   :  { %v1436_v17 = vpop.f32.mrb[69].mxu0 }
 0x2d7   :  { %1863 = vmatmul.mubr.f32.gmra.mrb[114].mxu1 %v1148_v12 }
 0x2d8   :  { %1867 = vmatprep.mubr.f32.mxu1 %v1153_v58  ;;  %v6408_v23 = vpop.f32.mrb[70].mxu0  ;;  %v1232_v58 = vld [vmem:[%s7506_s9 + $0x410] sm:$0xff] }
 0x2d9   :  { %v1441_v33 = vpop.f32.mrb[71].mxu0 }
 0x2da   :  { %v1264_v33 = vld [vmem:[%s7506_s9 + $0x510] sm:$0xff] }
 0x2db   :  { %1868 = vmatmul.mubr.f32.gmra.mrb[116].mxu1 %v1152_v44  ;;  %v1237_v44 = vld [vmem:[%s7506_s9 + $0x438] sm:$0xff] }
 0x2dc   :  { %1872 = vmatprep.mubr.f32.mxu1 %v1157_v20  ;;  %v6416_v39 = vpop.f32.mrb[72].mxu0 }
 0x2dd   :  { %v1446_v49 = vpop.f32.mrb[73].mxu0 }
 0x2de   :  { %v1273_v49 = vld [vmem:[%s7506_s9 + $0x558] sm:$0xff] }
 0x2df   :  { %1873 = vmatmul.mubr.f32.gmra.mrb[118].mxu1 %v1156_v29 }
 0x2e0   :  { %1877 = vmatprep.mubr.f32.mxu1 %v1161_v8  ;;  %v6424_v55 = vpop.f32.mrb[74].mxu0  ;;  %v1236_v8 = vld [vmem:[%s7506_s9 + $0x430] sm:$0xff] }
 0x2e1   :  { %v1451_v1 = vpop.f32.mrb[75].mxu0 }
 0x2e2   :  { %v1276_v1 = vld [vmem:[%s7506_s9 + $0x570] sm:$0xff] }
 0x2e3   :  { %1878 = vmatmul.mubr.f32.gmra.mrb[120].mxu1 %v1160_v30  ;;  %v1241_v30 = vld [vmem:[%s7506_s9 + $0x458] sm:$0xff] }
 0x2e4   :  { %1882 = vmatprep.mubr.f32.mxu1 %v1165_v61 }
 0x2e7   :  { %1883 = vmatmul.mubr.f32.gmra.mrb[122].mxu1 %v1164_v54 }
 0x2e8   :  { %1887 = vmatprep.mubr.f32.mxu1 %v1169_v26  ;;  %v1240_v26 = vld [vmem:[%s7506_s9 + $0x450] sm:$0xff] }
 0x2eb   :  { %1888 = vmatmul.mubr.f32.gmra.mrb[124].mxu1 %v1168_v38  ;;  %v1245_v38 = vld [vmem:[%s7506_s9 + $0x478] sm:$0xff] }
 0x2ec   :  { %1892 = vmatprep.mubr.f32.mxu1 %v1173_v6  ;;  %v6432_v11 = vpop.f32.mrb[76].mxu0 }
 0x2ed   :  { %v1456_v24 = vpop.f32.mrb[77].mxu0 }
 0x2ee   :  { %v1285_v24 = vld [vmem:[%s7506_s9 + $0x5b8] sm:$0xff] }
 0x2ef   :  { %1893 = vmatmul.mubr.f32.gmra.mrb[126].mxu1 %v1172_v22 }
 0x2f0   :  { %1897 = vmatprep.mubr.f32.mxu1 %v1177_v62  ;;  %v1244_v62 = vld [vmem:[%s7506_s9 + $0x470] sm:$0xff] }
 0x2f3   :  { %1898 = vmatmul.mubr.f32.gmra.mrb[0].mxu1 %v1176_v7  ;;  %v1249_v7 = vld [vmem:[%s7506_s9 + $0x498] sm:$0xff] }
 0x2f4   :  { %1902 = vmatprep.mubr.f32.mxu1 %v1181_v18 }
 0x2f7   :  { %1903 = vmatmul.mubr.f32.gmra.mrb[2].mxu1 %v1180_v59 }
 0x2f8   :  { %1907 = vmatprep.mubr.f32.mxu1 %v1185_v27  ;;  %v1248_v27 = vld [vmem:[%s7506_s9 + $0x490] sm:$0xff] }
 0x2fb   :  { %1908 = vmatmul.mubr.f32.gmra.mrb[4].mxu1 %v1184_v28  ;;  %v1253_v28 = vld [vmem:[%s7506_s9 + $0x4b8] sm:$0xff] }
 0x2fc   :  { %1912 = vmatprep.mubr.f32.mxu1 %v1189_v36  ;;  %v6440_v32 = vpop.f32.mrb[78].mxu0 }
 0x2fd   :  { %v1461_v45 = vpop.f32.mrb[79].mxu0 }
 0x2fe   :  { %v1288_v45 = vld [vmem:[%s7506_s9 + $0x5d0] sm:$0xff] }
 0x2ff   :  { %1913 = vmatmul.mubr.f32.gmra.mrb[6].mxu1 %v1188_v37 }
 0x300   :  { %1917 = vmatprep.mubr.f32.mxu1 %v1193_v50  ;;  %v1252_v50 = vld [vmem:[%s7506_s9 + $0x4b0] sm:$0xff] }
 0x303   :  { %1918 = vmatmul.mubr.f32.gmra.mrb[8].mxu1 %v1192_v42 }
 0x304   :  { %1922 = vmatprep.mubr.f32.mxu1 %v1197_v46  ;;  %v6448_v53 = vpop.f32.mrb[80].mxu0 }
 0x305   :  { %v1466_v4 = vpop.f32.mrb[81].mxu0 }
 0x306   :  { %v1297_v4 = vld [vmem:[%s7506_s9 + $0x618] sm:$0xff] }
 0x307   :  { %1923 = vmatmul.mubr.f32.gmra.mrb[10].mxu1 %v1196_v3  ;;  %v1261_v3 = vld [vmem:[%s7506_s9 + $0x4f8] sm:$0xff] }
 0x308   :  { %1927 = vmatprep.mubr.f32.mxu1 %v1201_v10  ;;  %v6456_v15 = vpop.f32.mrb[82].mxu0 }
 0x309   :  { %v1471_v34 = vpop.f32.mrb[83].mxu0 }
 0x30a   :  { %v1300_v34 = vld [vmem:[%s7506_s9 + $0x630] sm:$0xff] }
 0x30b   :  { %1928 = vmatmul.mubr.f32.gmra.mrb[12].mxu1 %v1200_v16  ;;  %v1260_v16 = vld [vmem:[%s7506_s9 + $0x4f0] sm:$0xff] }
 0x30c   :  { %1932 = vmatprep.mubr.f32.mxu1 %v1205_v25  ;;  %v6464_v14 = vpop.f32.mrb[84].mxu0  ;;  %v1265_v25 = vld [vmem:[%s7506_s9 + $0x518] sm:$0xff] }
 0x30d   :  { %v1476_v12 = vpop.f32.mrb[85].mxu0 }
 0x30e   :  { %v1309_v12 = vld [vmem:[%s7506_s9 + $0x678] sm:$0xff] }
 0x30f   :  { %1933 = vmatmul.mubr.f32.gmra.mrb[14].mxu1 %v1204_v31  ;;  %v1269_v31 = vld [vmem:[%s7506_s9 + $0x538] sm:$0xff] }
 0x310   :  { %1937 = vmatprep.mubr.f32.mxu1 %v1209_v41  ;;  %v6472_v20 = vpop.f32.mrb[86].mxu0  ;;  %v1268_v41 = vld [vmem:[%s7506_s9 + $0x530] sm:$0xff] }
 0x311   :  { %v1481_v29 = vpop.f32.mrb[87].mxu0 }
 0x312   :  { %v1312_v29 = vld [vmem:[%s7506_s9 + $0x690] sm:$0xff] }
 0x313   :  { %1938 = vmatmul.mubr.f32.gmra.mrb[16].mxu1 %v1208_v47  ;;  %v1272_v47 = vld [vmem:[%s7506_s9 + $0x550] sm:$0xff] }
 0x314   :  { %1942 = vmatprep.mubr.f32.mxu1 %v1213_v57  ;;  %v6480_v61 = vpop.f32.mrb[88].mxu0  ;;  %v1277_v57 = vld [vmem:[%s7506_s9 + $0x578] sm:$0xff] }
 0x315   :  { %v1486_v54 = vpop.f32.mrb[89].mxu0 }
 0x316   :  { %v1321_v54 = vld [vmem:[%s7506_s9 + $0x6d8] sm:$0xff] }
 0x317   :  { %1943 = vmatmul.mubr.f32.gmra.mrb[18].mxu1 %v1212_v63  ;;  %v1281_v63 = vld [vmem:[%s7506_s9 + $0x598] sm:$0xff] }
 0x318   :  { %1947 = vmatprep.mubr.f32.mxu1 %v1217_v13  ;;  %v6488_v6 = vpop.f32.mrb[90].mxu0  ;;  %v1280_v13 = vld [vmem:[%s7506_s9 + $0x590] sm:$0xff] }
 0x319   :  { %v1491_v22 = vpop.f32.mrb[91].mxu0 }
 0x31b   :  { %1948 = vmatmul.mubr.f32.gmra.mrb[20].mxu1 %v1216_v21  ;;  %v1284_v21 = vld [vmem:[%s7506_s9 + $0x5b0] sm:$0xff] }
 0x31c   :  { %1952 = vmatprep.mubr.f32.mxu1 %v1221_v35  ;;  %v6496_v18 = vpop.f32.mrb[92].mxu0  ;;  %v1289_v35 = vld [vmem:[%s7506_s9 + $0x5d8] sm:$0xff] }
 0x31d   :  { %v1496_v59 = vpop.f32.mrb[93].mxu0 }
 0x31f   :  { %1953 = vmatmul.mubr.f32.gmra.mrb[22].mxu1 %v1220_v43  ;;  %v1293_v43 = vld [vmem:[%s7506_s9 + $0x5f8] sm:$0xff] }
 0x320   :  { %1957 = vmatprep.mubr.f32.mxu1 %v1225_v56  ;;  %v6504_v36 = vpop.f32.mrb[94].mxu0  ;;  %v1292_v56 = vld [vmem:[%s7506_s9 + $0x5f0] sm:$0xff] }
 0x321   :  { %v1501_v37 = vpop.f32.mrb[95].mxu0 }
 0x322   :  { %v1329_v37 = vld [vmem:[%s7506_s9 + $0x718] sm:$0xff] }
 0x323   :  { %1958 = vmatmul.mubr.f32.gmra.mrb[24].mxu1 %v1224_v0  ;;  %v1296_v0 = vld [vmem:[%s7506_s9 + $0x610] sm:$0xff] }
 0x324   :  { %1962 = vmatprep.mubr.f32.mxu1 %v1229_v19  ;;  %v6512_v42 = vpop.f32.mrb[96].mxu0  ;;  %v1301_v19 = vld [vmem:[%s7506_s9 + $0x638] sm:$0xff] }
 0x325   :  { %v1506_v46 = vpop.f32.mrb[97].mxu0 }
 0x327   :  { %1963 = vmatmul.mubr.f32.gmra.mrb[26].mxu1 %v1228_v48  ;;  %v1305_v48 = vld [vmem:[%s7506_s9 + $0x658] sm:$0xff] }
 0x328   :  { %1967 = vmatprep.mubr.f32.mxu1 %v1233_v51  ;;  %v6520_v10 = vpop.f32.mrb[98].mxu0  ;;  %v1304_v51 = vld [vmem:[%s7506_s9 + $0x650] sm:$0xff] }
 0x329   :  { %v1511_v17 = vpop.f32.mrb[99].mxu0 }
 0x32b   :  { %1968 = vmatmul.mubr.f32.gmra.mrb[28].mxu1 %v1232_v58  ;;  %v1308_v58 = vld [vmem:[%s7506_s9 + $0x670] sm:$0xff] }
 0x32c   :  { %1972 = vmatprep.mubr.f32.mxu1 %v1237_v44  ;;  %v1313_v44 = vld [vmem:[%s7506_s9 + $0x698] sm:$0xff] }
 0x32f   :  { %1973 = vmatmul.mubr.f32.gmra.mrb[30].mxu1 %v1236_v8  ;;  %v1317_v8 = vld [vmem:[%s7506_s9 + $0x6b8] sm:$0xff] }
 0x330   :  { %1977 = vmatprep.mubr.f32.mxu1 %v1241_v30  ;;  %v1316_v30 = vld [vmem:[%s7506_s9 + $0x6b0] sm:$0xff] }
 0x333   :  { %1978 = vmatmul.mubr.f32.gmra.mrb[32].mxu1 %v1240_v26 }
 0x334   :  { %1982 = vmatprep.mubr.f32.mxu1 %v1245_v38 }
 0x337   :  { %1983 = vmatmul.mubr.f32.gmra.mrb[34].mxu1 %v1244_v62  ;;  %v1320_v62 = vld [vmem:[%s7506_s9 + $0x6d0] sm:$0xff] }
 0x338   :  { %1987 = vmatprep.mubr.f32.mxu1 %v1249_v7  ;;  %v1325_v7 = vld [vmem:[%s7506_s9 + $0x6f8] sm:$0xff] }
 0x33b   :  { %1988 = vmatmul.mubr.f32.gmra.mrb[36].mxu1 %v1248_v27 }
 0x33c   :  { %1992 = vmatprep.mubr.f32.mxu1 %v1253_v28 }
 0x33f   :  { %1993 = vmatmul.mubr.f32.gmra.mrb[38].mxu1 %v1252_v50 }
 0x340   :  { %1997 = vmatprep.mubr.f32.mxu1 %v1257_v52 }
 0x343   :  { %1998 = vmatmul.mubr.f32.gmra.mrb[40].mxu1 %v1256_v40  ;;  %v1333_v40 = vld [vmem:[%s7506_s9 + $0x738] sm:$0xff] }
 0x344   :  { %2002 = vmatprep.mubr.f32.mxu1 %v1261_v3 }
 0x347   :  { %2003 = vmatmul.mubr.f32.gmra.mrb[42].mxu1 %v1260_v16 }
 0x348   :  { %2007 = vmatprep.mubr.f32.mxu1 %v1265_v25  ;;  %v1337_v25 = vld [vmem:[%s7506_s9 + $0x758] sm:$0xff] }
 0x34b   :  { %2008 = vmatmul.mubr.f32.gmra.mrb[44].mxu1 %v1264_v33 }
 0x34c   :  { %2012 = vmatprep.mubr.f32.mxu1 %v1269_v31 }
 0x34f   :  { %2013 = vmatmul.mubr.f32.gmra.mrb[46].mxu1 %v1268_v41 }
 0x350   :  { %2017 = vmatprep.mubr.f32.mxu1 %v1273_v49  ;;  %v1341_v49 = vld [vmem:[%s7506_s9 + $0x778] sm:$0xff] }
 0x353   :  { %2018 = vmatmul.mubr.f32.gmra.mrb[48].mxu1 %v1272_v47 }
 0x354   :  { %2022 = vmatprep.mubr.f32.mxu1 %v1277_v57 }
 0x357   :  { %2023 = vmatmul.mubr.f32.gmra.mrb[50].mxu1 %v1276_v1 }
 0x358   :  { %2027 = vmatprep.mubr.f32.mxu1 %v1281_v63  ;;  %v1345_v63 = vld [vmem:[%s7506_s9 + $0x798] sm:$0xff] }
 0x35b   :  { %2028 = vmatmul.mubr.f32.gmra.mrb[52].mxu1 %v1280_v13 }
 0x35c   :  { %2032 = vmatprep.mubr.f32.mxu1 %v1285_v24 }
 0x35f   :  { %2033 = vmatmul.mubr.f32.gmra.mrb[54].mxu1 %v1284_v21 }
 0x360   :  { %2037 = vmatprep.mubr.f32.mxu1 %v1289_v35  ;;  %v1349_v35 = vld [vmem:[%s7506_s9 + $0x7b8] sm:$0xff] }
 0x363   :  { %2038 = vmatmul.mubr.f32.gmra.mrb[56].mxu1 %v1288_v45 }
 0x364   :  { %2042 = vmatprep.mubr.f32.mxu1 %v1293_v43 }
 0x367   :  { %2043 = vmatmul.mubr.f32.gmra.mrb[58].mxu1 %v1292_v56 }
 0x368   :  { %2047 = vmatprep.mubr.f32.mxu1 %v1297_v4  ;;  %v1353_v4 = vld [vmem:[%s7506_s9 + $0x7d8] sm:$0xff] }
 0x36b   :  { %2048 = vmatmul.mubr.f32.gmra.mrb[60].mxu1 %v1296_v0 }
 0x36c   :  { %2052 = vmatprep.mubr.f32.mxu1 %v1301_v19 }
 0x36f   :  { %2053 = vmatmul.mubr.f32.gmra.mrb[62].mxu1 %v1300_v34 }
 0x370   :  { %2057 = vmatprep.mubr.f32.mxu1 %v1305_v48  ;;  %v1357_v48 = vld [vmem:[%s7506_s9 + $0x7f8] sm:$0xff] }
 0x373   :  { %2058 = vmatmul.mubr.f32.gmra.mrb[64].mxu1 %v1304_v51 }
 0x374   :  { %2062 = vmatprep.mubr.f32.mxu1 %v1309_v12 }
 0x377   :  { %2063 = vmatmul.mubr.f32.gmra.mrb[66].mxu1 %v1308_v58 }
 0x378   :  { %2067 = vmatprep.mubr.f32.mxu1 %v1313_v44 }
 0x37b   :  { %2068 = vmatmul.mubr.f32.gmra.mrb[68].mxu1 %v1312_v29 }
 0x37c   :  { %2072 = vmatprep.mubr.f32.mxu1 %v1317_v8 }
 0x37e   :  { %v1809_v26 = vpop.f32.mrb[92].mxu1 }
 0x37f   :  { %v6613_v38 = vadd.f32 %v1809_v26, %v6384_v2  ;;  %v1811_v22 = vpop.f32.mrb[93].mxu1  ;;  %2073 = vmatmul.mubr.f32.gmra.mrb[70].mxu1 %v1316_v30  ;;  %v1324_v2 = vld [vmem:[%s7506_s9 + $0x6f0] sm:$0xff] }
 0x380   :  { %2077 = vmatprep.mubr.f32.mxu1 %v1321_v54 }
 0x382   :  { %v1814_v59 = vpop.f32.mrb[94].mxu1 }
 0x383   :  { %v6622_v27 = vadd.f32 %v1814_v59, %v6392_v60  ;;  %v1816_v28 = vpop.f32.mrb[95].mxu1  ;;  %2078 = vmatmul.mubr.f32.gmra.mrb[72].mxu1 %v1320_v62  ;;  %v1328_v60 = vld [vmem:[%s7506_s9 + $0x710] sm:$0xff] }
 0x384   :  { %2082 = vmatprep.mubr.f32.mxu1 %v1325_v7 }
 0x386   :  { %v1819_v50 = vpop.f32.mrb[96].mxu1 }
 0x387   :  { %v6631_v52 = vadd.f32 %v1819_v50, %v6400_v9  ;;  %v1821_v46 = vpop.f32.mrb[97].mxu1  ;;  %2083 = vmatmul.mubr.f32.gmra.mrb[74].mxu1 %v1324_v2  ;;  %v1332_v9 = vld [vmem:[%s7506_s9 + $0x730] sm:$0xff] }
 0x388   :  { %2087 = vmatprep.mubr.f32.mxu1 %v1329_v37 }
 0x38a   :  { %v1824_v3 = vpop.f32.mrb[98].mxu1 }
 0x38b   :  { %v6640_v17 = vadd.f32 %v1824_v3, %v6408_v23  ;;  %v1826_v16 = vpop.f32.mrb[99].mxu1  ;;  %2088 = vmatmul.mubr.f32.gmra.mrb[76].mxu1 %v1328_v60  ;;  %v1336_v23 = vld [vmem:[%s7506_s9 + $0x750] sm:$0xff] }
 0x38c   :  { %2092 = vmatprep.mubr.f32.mxu1 %v1333_v40 }
 0x38e   :  { %v1829_v33 = vpop.f32.mrb[100].mxu1 }
 0x38f   :  { %v6649_v31 = vadd.f32 %v1829_v33, %v6416_v39  ;;  %v1831_v41 = vpop.f32.mrb[101].mxu1  ;;  %2093 = vmatmul.mubr.f32.gmra.mrb[78].mxu1 %v1332_v9  ;;  %v1340_v39 = vld [vmem:[%s7506_s9 + $0x770] sm:$0xff] }
 0x390   :  { %2097 = vmatprep.mubr.f32.mxu1 %v1337_v25 }
 0x392   :  { %v1834_v47 = vpop.f32.mrb[102].mxu1 }
 0x393   :  { %v6658_v57 = vadd.f32 %v1834_v47, %v6424_v55  ;;  %v1836_v1 = vpop.f32.mrb[103].mxu1  ;;  %2098 = vmatmul.mubr.f32.gmra.mrb[80].mxu1 %v1336_v23  ;;  %v1344_v55 = vld [vmem:[%s7506_s9 + $0x790] sm:$0xff] }
 0x394   :  { %2102 = vmatprep.mubr.f32.mxu1 %v1341_v49 }
 0x396   :  { %v1839_v13 = vpop.f32.mrb[104].mxu1 }
 0x397   :  { %v6667_v24 = vadd.f32 %v1839_v13, %v6432_v11  ;;  %v1841_v21 = vpop.f32.mrb[105].mxu1  ;;  %2103 = vmatmul.mubr.f32.gmra.mrb[82].mxu1 %v1340_v39  ;;  %v1348_v11 = vld [vmem:[%s7506_s9 + $0x7b0] sm:$0xff] }
 0x398   :  { %2107 = vmatprep.mubr.f32.mxu1 %v1345_v63 }
 0x39a   :  { %v1844_v45 = vpop.f32.mrb[106].mxu1 }
 0x39b   :  { %v6676_v43 = vadd.f32 %v1844_v45, %v6440_v32  ;;  %v1846_v56 = vpop.f32.mrb[107].mxu1  ;;  %2108 = vmatmul.mubr.f32.gmra.mrb[84].mxu1 %v1344_v55  ;;  %v1352_v32 = vld [vmem:[%s7506_s9 + $0x7d0] sm:$0xff] }
 0x39c   :  { %2112 = vmatprep.mubr.f32.mxu1 %v1349_v35 }
 0x39e   :  { %v1849_v0 = vpop.f32.mrb[108].mxu1 }
 0x39f   :  { %v6685_v19 = vadd.f32 %v1849_v0, %v6448_v53  ;;  %v1851_v34 = vpop.f32.mrb[109].mxu1  ;;  %2113 = vmatmul.mubr.f32.gmra.mrb[86].mxu1 %v1348_v11  ;;  %v1356_v53 = vld [vmem:[%s7506_s9 + $0x7f0] sm:$0xff] }
 0x3a0   :  { %2117 = vmatprep.mubr.f32.mxu1 %v1353_v4 }
 0x3a2   :  { %v1854_v51 = vpop.f32.mrb[110].mxu1 }
 0x3a3   :  { %v6694_v12 = vadd.f32 %v1854_v51, %v6456_v15  ;;  %v1856_v58 = vpop.f32.mrb[111].mxu1  ;;  %2118 = vmatmul.mubr.f32.gmra.mrb[88].mxu1 %v1352_v32 }
 0x3a4   :  { %2122 = vmatprep.mubr.f32.mxu1 %v1357_v48 }
 0x3a6   :  { %v1859_v44 = vpop.f32.mrb[112].mxu1 }
 0x3a7   :  { %v6700_v29 = vadd.f32 %v1859_v44, %v6464_v14  ;;  %v1861_v8 = vpop.f32.mrb[113].mxu1  ;;  %2123 = vmatmul.mubr.f32.gmra.mrb[90].mxu1 %v1356_v53 }
 0x3aa   :  { %v1864_v30 = vpop.f32.mrb[114].mxu1 }
 0x3ab   :  { %v6703_v54 = vadd.f32 %v1864_v30, %v6472_v20  ;;  %v1866_v26 = vpop.f32.mrb[115].mxu1 }
 0x3ae   :  { %v1869_v15 = vpop.f32.mrb[116].mxu1 }
 0x3af   :  { %v6706_v22 = vadd.f32 %v1869_v15, %v6480_v61  ;;  %v1871_v62 = vpop.f32.mrb[117].mxu1 }
 0x3b2   :  { %v1874_v7 = vpop.f32.mrb[118].mxu1 }
 0x3b3   :  { %v6709_v59 = vadd.f32 %v1874_v7, %v6488_v6  ;;  %v1876_v28 = vpop.f32.mrb[119].mxu1 }
 0x3b6   :  { %v1879_v2 = vpop.f32.mrb[120].mxu1 }
 0x3b7   :  { %v6712_v14 = vadd.f32 %v1879_v2, %v6496_v18  ;;  %v1881_v37 = vpop.f32.mrb[121].mxu1 }
 0x3ba   :  { %v1884_v50 = vpop.f32.mrb[122].mxu1 }
 0x3bb   :  { %v6715_v20 = vadd.f32 %v1884_v50, %v6504_v36  ;;  %v1886_v46 = vpop.f32.mrb[123].mxu1 }
 0x3be   :  { %v1889_v60 = vpop.f32.mrb[124].mxu1 }
 0x3bf   :  { %v6718_v61 = vadd.f32 %v1889_v60, %v6512_v42  ;;  %v1891_v40 = vpop.f32.mrb[125].mxu1 }
 0x3c1   :  { %v2128_v6 = vmax.f32 %v6613_v38, %v6718_v61 }
 0x3c2   :  { %v1894_v3 = vpop.f32.mrb[126].mxu1 }
 0x3c3   :  { %v6723_v16 = vadd.f32 %v1894_v3, %v6520_v10  ;;  %v1896_v18 = vpop.f32.mrb[127].mxu1 }
 0x3c5   :  { %v2129_v9 = vmax.f32 %v6622_v27, %v6723_v16 }
 0x3c6   :  { %v6727_v25 = vpop.f32.mrb[0].mxu1 }
 0x3c7   :  { %v1901_v33 = vpop.f32.mrb[1].mxu1 }
 0x3ca   :  { %v6731_v42 = vpop.f32.mrb[2].mxu1 }
 0x3cb   :  { %v1906_v23 = vpop.f32.mrb[3].mxu1 }
 0x3ce   :  { %v6735_v49 = vpop.f32.mrb[4].mxu1 }
 0x3cf   :  { %v1911_v47 = vpop.f32.mrb[5].mxu1 }
 0x3d2   :  { %v6739_v1 = vpop.f32.mrb[6].mxu1 }
 0x3d3   :  { %v1916_v63 = vpop.f32.mrb[7].mxu1 }
 0x3d4   :  { %v2176_v63 = vld [vmem:[%s7509_s10] sm:$0xff] }
 0x3d5   :  { %3926 = vmatprep.mubr.f32.mxu0 %v2176_v63 }
 0x3d6   :  { %v6743_v13 = vpop.f32.mrb[8].mxu1 }
 0x3d7   :  { %v1921_v55 = vpop.f32.mrb[9].mxu1 }
 0x3da   :  { %v6747_v35 = vpop.f32.mrb[10].mxu1 }
 0x3db   :  { %v1926_v56 = vpop.f32.mrb[11].mxu1 }
 0x3de   :  { %v6751_v11 = vpop.f32.mrb[12].mxu1 }
 0x3df   :  { %v1931_v0 = vpop.f32.mrb[13].mxu1 }
 0x3e2   :  { %v6755_v34 = vpop.f32.mrb[14].mxu1 }
 0x3e3   :  { %v1936_v48 = vpop.f32.mrb[15].mxu1 }
 0x3e6   :  { %v6759_v51 = vpop.f32.mrb[16].mxu1 }
 0x3e7   :  { %v1941_v53 = vpop.f32.mrb[17].mxu1 }
 0x3ea   :  { %v6763_v44 = vpop.f32.mrb[18].mxu1 }
 0x3eb   :  { %v1946_v30 = vpop.f32.mrb[19].mxu1 }
 0x3ee   :  { %v6767_v26 = vpop.f32.mrb[20].mxu1 }
 0x3ef   :  { %v1951_v62 = vpop.f32.mrb[21].mxu1 }
 0x3f2   :  { %v6771_v7 = vpop.f32.mrb[22].mxu1 }
 0x3f3   :  { %v1956_v2 = vpop.f32.mrb[23].mxu1 }
 0x3f6   :  { %v6775_v37 = vpop.f32.mrb[24].mxu1 }
 0x3f7   :  { %v1961_v46 = vpop.f32.mrb[25].mxu1 }
 0x3fa   :  { %v6779_v60 = vpop.f32.mrb[26].mxu1 }
 0x3fb   :  { %v1966_v3 = vpop.f32.mrb[27].mxu1 }
 0x3fe   :  { %v1969_v18 = vpop.f32.mrb[28].mxu1 }
 0x3ff   :  { %v1971_v33 = vpop.f32.mrb[29].mxu1 }
 0x402   :  { %v1974_v23 = vpop.f32.mrb[30].mxu1 }
 0x403   :  { %v1976_v47 = vpop.f32.mrb[31].mxu1 }
 0x406   :  { %v1979_v55 = vpop.f32.mrb[32].mxu1 }
 0x407   :  { %v1981_v56 = vpop.f32.mrb[33].mxu1 }
 0x40a   :  { %v1984_v0 = vpop.f32.mrb[34].mxu1 }
 0x40b   :  { %v1986_v48 = vpop.f32.mrb[35].mxu1 }
 0x40e   :  { %v1989_v53 = vpop.f32.mrb[36].mxu1 }
 0x40f   :  { %v1991_v30 = vpop.f32.mrb[37].mxu1 }
 0x412   :  { %v1994_v62 = vpop.f32.mrb[38].mxu1 }
 0x413   :  { %v1996_v2 = vpop.f32.mrb[39].mxu1 }
 0x416   :  { %v1999_v46 = vpop.f32.mrb[40].mxu1 }
 0x417   :  { %v2001_v40 = vpop.f32.mrb[41].mxu1 }
 0x41a   :  { %v2004_v3 = vpop.f32.mrb[42].mxu1 }
 0x41b   :  { %v2006_v50 = vpop.f32.mrb[43].mxu1 }
 0x41e   :  { %v2009_v33 = vpop.f32.mrb[44].mxu1 }
 0x41f   :  { %v2011_v28 = vpop.f32.mrb[45].mxu1 }
 0x422   :  { %v6786_v47 = vpop.f32.mrb[46].mxu1 }
 0x423   :  { %v2016_v15 = vpop.f32.mrb[47].mxu1 }
 0x426   :  { %v6788_v8 = vpop.f32.mrb[48].mxu1 }
 0x427   :  { %v2021_v63 = vpop.f32.mrb[49].mxu1 }
 0x42a   :  { %v6790_v58 = vpop.f32.mrb[50].mxu1 }
 0x42b   :  { %v2026_v56 = vpop.f32.mrb[51].mxu1 }
 0x42e   :  { %v6792_v48 = vpop.f32.mrb[52].mxu1 }
 0x42f   :  { %v2031_v30 = vpop.f32.mrb[53].mxu1 }
 0x432   :  { %v6794_v32 = vpop.f32.mrb[54].mxu1 }
 0x433   :  { %v2036_v2 = vpop.f32.mrb[55].mxu1 }
 0x436   :  { %v6796_v40 = vpop.f32.mrb[56].mxu1 }
 0x437   :  { %v2041_v50 = vpop.f32.mrb[57].mxu1 }
 0x43a   :  { %v6798_v4 = vpop.f32.mrb[58].mxu1 }
 0x43b   :  { %v2046_v28 = vpop.f32.mrb[59].mxu1 }
 0x43c   :  { %v7642_v28 = vmax.f32 %v6631_v52, %v6727_v25 }
 0x43e   :  { %v2049_v45 = vpop.f32.mrb[60].mxu1 }
 0x43f   :  { %v2144_v15 = vmax.f32 %v1969_v18, %v2049_v45  ;;  %v2051_v21 = vpop.f32.mrb[61].mxu1 }
 0x441   :  { %v2160_v63 = vmax.f32 %v2128_v6, %v2144_v15  ;;  %v7643_v6 = vmax.f32 %v6640_v17, %v6731_v42 }
 0x442   :  { %v2054_v56 = vpop.f32.mrb[62].mxu1 }
 0x443   :  { %v2145_v39 = vmax.f32 %v1974_v23, %v2054_v56  ;;  %v2056_v10 = vpop.f32.mrb[63].mxu1 }
 0x445   :  { %v2161_v30 = vmax.f32 %v2129_v9, %v2145_v39  ;;  %v7644_v39 = vmax.f32 %v6649_v31, %v6735_v49 }
 0x446   :  { %v2059_v2 = vpop.f32.mrb[64].mxu1 }
 0x447   :  { %v2146_v41 = vmax.f32 %v1979_v55, %v2059_v2  ;;  %v2061_v50 = vpop.f32.mrb[65].mxu1  ;;  %v4213_v36 = vpack.c.bf16 %v2161_v30, %v2160_v63 }
 0x449   :  { %v2162_v45 = vmax.f32 %v7642_v28, %v2146_v41  ;;  %4214 = vmatprep.subr.bf16.mxu0 %v4213_v36 }
 0x44a   :  { %v2064_v21 = vpop.f32.mrb[66].mxu1  ;;  %4216 = vmatpush3.bf16.msra.mxu0 %v4213_v36  ;;  %v7645_v36 = vmax.f32 %v6658_v57, %v6739_v1 }
 0x44b   :  { %v2147_v38 = vmax.f32 %v1984_v0, %v2064_v21  ;;  %v2066_v61 = vpop.f32.mrb[67].mxu1 }
 0x44c   :  { %v7650_v61 = vmax.f32 %v6700_v29, %v6759_v51 }
 0x44d   :  { %v2163_v10 = vmax.f32 %v7643_v6, %v2147_v38 }
 0x44e   :  { %v2069_v18 = vpop.f32.mrb[68].mxu1 }
 0x44f   :  { %v2148_v27 = vmax.f32 %v1989_v53, %v2069_v18  ;;  %v2071_v16 = vpop.f32.mrb[69].mxu1  ;;  %v4217_v9 = vpack.c.bf16 %v2163_v10, %v2162_v45  ;;  %v7646_v53 = vmax.f32 %v6667_v24, %v6743_v13  ;;  %v7651_v10 = vmax.f32 %v6703_v54, %v6763_v44 }
 0x450   :  { %v7652_v16 = vmax.f32 %v6706_v22, %v6767_v26 }
 0x451   :  { %v2164_v23 = vmax.f32 %v7644_v39, %v2148_v27  ;;  %4218 = vmatprep.subr.bf16.mxu0 %v4217_v9  ;;  %v7653_v39 = vmax.f32 %v6709_v59, %v6771_v7 }
 0x452   :  { %v2074_v52 = vpop.f32.mrb[70].mxu1  ;;  %4220 = vmatpush3.bf16.msra.mxu0 %v4217_v9 }
 0x453   :  { %v2149_v25 = vmax.f32 %v1994_v62, %v2074_v52  ;;  %v2076_v41 = vpop.f32.mrb[71].mxu1  ;;  %v7647_v62 = vmax.f32 %v6676_v43, %v6747_v35 }
 0x455   :  { %v2165_v55 = vmax.f32 %v7645_v36, %v2149_v25  ;;  %v7654_v25 = vmax.f32 %v6712_v14, %v6775_v37  ;;  %v7655_v36 = vmax.f32 %v6715_v20, %v6779_v60  ;;  %v2642_v14 = vld [vmem:[%s7510_s4 + $0x88] sm:$0xff]  ;;  %v2643_v60 = vld [vmem:[%s7510_s4 + $0x90] sm:$0xff] }
 0x456   :  { %v2079_v0 = vpop.f32.mrb[72].mxu1  ;;  %v2626_v20 = vld [vmem:[%s7510_s4 + $0x8] sm:$0xff] }
 0x457   :  { %v2150_v17 = vmax.f32 %v1999_v46, %v2079_v0  ;;  %v2081_v42 = vpop.f32.mrb[73].mxu1  ;;  %v4221_v15 = vpack.c.bf16 %v2165_v55, %v2164_v23  ;;  %v7648_v46 = vmax.f32 %v6685_v19, %v6751_v11  ;;  %v2177_v55 = vld [vmem:[%s7509_s10 + $0x8] sm:$0xff] }
 0x458   :  { %v2178_v42 = vld [vmem:[%s7509_s10 + $0x10] sm:$0xff] }
 0x459   :  { %v2166_v63 = vmax.f32 %v7646_v53, %v2150_v17  ;;  %4222 = vmatprep.subr.bf16.mxu0 %v4221_v15  ;;  %v2644_v17 = vld [vmem:[%s7510_s4 + $0x98] sm:$0xff]  ;;  %v2627_v53 = vld [vmem:[%s7510_s4 + $0x10] sm:$0xff] }
 0x45a   :  { %v2084_v31 = vpop.f32.mrb[74].mxu1  ;;  %4224 = vmatpush3.bf16.msra.mxu0 %v4221_v15  ;;  %v4249_v15 = vpack.c.bf16 %v2644_v17, %v2643_v60  ;;  %v2649_v60 = vld [vmem:[%s7510_s4 + $0xc0] sm:$0xff] }
 0x45b   :  { %v2151_v49 = vmax.f32 %v2004_v3, %v2084_v31  ;;  %v2086_v56 = vpop.f32.mrb[75].mxu1  ;;  %v7649_v3 = vmax.f32 %v6694_v12, %v6755_v34  ;;  %v2645_v31 = vld [vmem:[%s7510_s4 + $0xa0] sm:$0xff] }
 0x45c   :  { %v2179_v56 = vld [vmem:[%s7509_s10 + $0x18] sm:$0xff] }
 0x45d   :  { %v2167_v30 = vmax.f32 %v7647_v62, %v2151_v49  ;;  %v2646_v49 = vld [vmem:[%s7510_s4 + $0xa8] sm:$0xff] }
 0x45e   :  { %v2089_v2 = vpop.f32.mrb[76].mxu1 }
 0x45f   :  { %v2152_v57 = vmax.f32 %v2009_v33, %v2089_v2  ;;  %v2091_v1 = vpop.f32.mrb[77].mxu1  ;;  %v4225_v50 = vpack.c.bf16 %v2167_v30, %v2166_v63  ;;  %v2628_v63 = vld [vmem:[%s7510_s4 + $0x18] sm:$0xff]  ;;  %v2180_v30 = vld [vmem:[%s7509_s10 + $0x20] sm:$0xff]  ;;  %v4253_v2 = vpack.c.bf16 %v2646_v49, %v2645_v31 }
 0x460   :  { %v4251_v62 = vpack.c.bf16 %v2628_v63, %v2627_v53  ;;  %v2630_v1 = vld [vmem:[%s7510_s4 + $0x28] sm:$0xff]  ;;  %v2223_v31 = vld [vmem:[%s7509_s10 + $0x178] sm:$0xff]  ;;  %v2224_v49 = vld [vmem:[%s7509_s10 + $0x180] sm:$0xff] }
 0x461   :  { %v2168_v28 = vmax.f32 %v7648_v46, %v2152_v57  ;;  %4226 = vmatprep.subr.bf16.mxu0 %v4225_v50  ;;  %v2629_v57 = vld [vmem:[%s7510_s4 + $0x20] sm:$0xff]  ;;  %v2648_v46 = vld [vmem:[%s7510_s4 + $0xb8] sm:$0xff]  ;;  %v2634_v53 = vld [vmem:[%s7510_s4 + $0x48] sm:$0xff] }
 0x462   :  { %v2094_v24 = vpop.f32.mrb[78].mxu1  ;;  %4228 = vmatpush3.bf16.msra.mxu0 %v4225_v50  ;;  %v2647_v50 = vld [vmem:[%s7510_s4 + $0xb0] sm:$0xff] }
 0x463   :  { %v2153_v13 = vmax.f32 %v6786_v47, %v2094_v24  ;;  %v2096_v45 = vpop.f32.mrb[79].mxu1  ;;  %v4255_v24 = vpack.c.bf16 %v2630_v1, %v2629_v57  ;;  %v2651_v57 = vld [vmem:[%s7510_s4 + $0xd0] sm:$0xff]  ;;  %v2652_v1 = vld [vmem:[%s7510_s4 + $0xd8] sm:$0xff] }
 0x464   :  { %v4257_v45 = vpack.c.bf16 %v2648_v46, %v2647_v50  ;;  %v2229_v50 = vld [vmem:[%s7509_s10 + $0x1a8] sm:$0xff]  ;;  %v4265_v46 = vpack.c.bf16 %v2652_v1, %v2651_v57  ;;  %v2661_v1 = vld [vmem:[%s7510_s4 + $0x120] sm:$0xff] }
 0x465   :  { %v2169_v21 = vmax.f32 %v7649_v3, %v2153_v13  ;;  %v2182_v13 = vld [vmem:[%s7509_s10 + $0x30] sm:$0xff] }
 0x466   :  { %v2099_v43 = vpop.f32.mrb[80].mxu1  ;;  %v2631_v3 = vld [vmem:[%s7510_s4 + $0x30] sm:$0xff] }
 0x467   :  { %v2154_v35 = vmax.f32 %v6788_v8, %v2099_v43  ;;  %v2101_v33 = vpop.f32.mrb[81].mxu1  ;;  %v4229_v38 = vpack.c.bf16 %v2169_v21, %v2168_v28  ;;  %v2181_v28 = vld [vmem:[%s7509_s10 + $0x28] sm:$0xff]  ;;  %v2632_v21 = vld [vmem:[%s7510_s4 + $0x38] sm:$0xff] }
 0x468   :  { %v2183_v43 = vld [vmem:[%s7509_s10 + $0x38] sm:$0xff]  ;;  %v2184_v33 = vld [vmem:[%s7509_s10 + $0x40] sm:$0xff] }
 0x469   :  { %v2170_v19 = vmax.f32 %v7650_v61, %v2154_v35  ;;  %4230 = vmatprep.subr.bf16.mxu0 %v4229_v38  ;;  %v4259_v35 = vpack.c.bf16 %v2632_v21, %v2631_v3  ;;  %v2186_v61 = vld [vmem:[%s7509_s10 + $0x50] sm:$0xff]  ;;  %v2231_v3 = vld [vmem:[%s7509_s10 + $0x1b8] sm:$0xff]  ;;  %v2232_v21 = vld [vmem:[%s7509_s10 + $0x1c0] sm:$0xff] }
 0x46a   :  { %v2104_v11 = vpop.f32.mrb[82].mxu1  ;;  %4232 = vmatpush3.bf16.msra.mxu0 %v4229_v38  ;;  %v2185_v38 = vld [vmem:[%s7509_s10 + $0x48] sm:$0xff] }
 0x46b   :  { %v2155_v6 = vmax.f32 %v6790_v58, %v2104_v11  ;;  %v2106_v47 = vpop.f32.mrb[83].mxu1  ;;  %v2188_v11 = vld [vmem:[%s7509_s10 + $0x60] sm:$0xff] }
 0x46c   :  { %v2190_v47 = vld [vmem:[%s7509_s10 + $0x70] sm:$0xff] }
 0x46d   :  { %v2171_v12 = vmax.f32 %v7651_v10, %v2155_v6  ;;  %v2189_v6 = vld [vmem:[%s7509_s10 + $0x68] sm:$0xff]  ;;  %v2191_v10 = vld [vmem:[%s7509_s10 + $0x78] sm:$0xff] }
 0x46e   :  { %v2109_v34 = vpop.f32.mrb[84].mxu1 }
 0x46f   :  { %v2156_v18 = vmax.f32 %v6792_v48, %v2109_v34  ;;  %v2111_v8 = vpop.f32.mrb[85].mxu1  ;;  %v4233_v27 = vpack.c.bf16 %v2171_v12, %v2170_v19  ;;  %v2187_v19 = vld [vmem:[%s7509_s10 + $0x58] sm:$0xff]  ;;  %v2192_v12 = vld [vmem:[%s7509_s10 + $0x80] sm:$0xff]  ;;  %v2193_v34 = vld [vmem:[%s7509_s10 + $0x88] sm:$0xff] }
 0x470   :  { %v2195_v8 = vld [vmem:[%s7509_s10 + $0x98] sm:$0xff] }
 0x471   :  { %v2172_v29 = vmax.f32 %v7652_v16, %v2156_v18  ;;  %4234 = vmatprep.subr.bf16.mxu0 %v4233_v27  ;;  %v2194_v18 = vld [vmem:[%s7509_s10 + $0x90] sm:$0xff]  ;;  %v2197_v16 = vld [vmem:[%s7509_s10 + $0xa8] sm:$0xff] }
 0x472   :  { %v2114_v51 = vpop.f32.mrb[86].mxu1  ;;  %4236 = vmatpush3.bf16.msra.mxu0 %v4233_v27  ;;  %v2196_v27 = vld [vmem:[%s7509_s10 + $0xa0] sm:$0xff] }
 0x473   :  { %v2157_v9 = vmax.f32 %v6794_v32, %v2114_v51  ;;  %v2116_v58 = vpop.f32.mrb[87].mxu1  ;;  %v2199_v51 = vld [vmem:[%s7509_s10 + $0xb8] sm:$0xff] }
 0x474   :  { %v2201_v58 = vld [vmem:[%s7509_s10 + $0xc8] sm:$0xff] }
 0x475   :  { %v2173_v54 = vmax.f32 %v7653_v39, %v2157_v9  ;;  %v2200_v9 = vld [vmem:[%s7509_s10 + $0xc0] sm:$0xff]  ;;  %v2202_v39 = vld [vmem:[%s7509_s10 + $0xd0] sm:$0xff] }
 0x476   :  { %v2119_v44 = vpop.f32.mrb[88].mxu1 }
 0x477   :  { %v2158_v23 = vmax.f32 %v6796_v40, %v2119_v44  ;;  %v2121_v48 = vpop.f32.mrb[89].mxu1  ;;  %v4237_v52 = vpack.c.bf16 %v2173_v54, %v2172_v29  ;;  %v2641_v40 = vld [vmem:[%s7510_s4 + $0x80] sm:$0xff]  ;;  %v2198_v29 = vld [vmem:[%s7509_s10 + $0xb0] sm:$0xff]  ;;  %v2203_v54 = vld [vmem:[%s7509_s10 + $0xd8] sm:$0xff] }
 0x478   :  { %v4245_v37 = vpack.c.bf16 %v2642_v14, %v2641_v40  ;;  %v2204_v44 = vld [vmem:[%s7509_s10 + $0xe0] sm:$0xff]  ;;  %v2206_v48 = vld [vmem:[%s7509_s10 + $0xf0] sm:$0xff]  ;;  %v2217_v14 = vld [vmem:[%s7509_s10 + $0x148] sm:$0xff] }
 0x479   :  { %v2174_v22 = vmax.f32 %v7654_v25, %v2158_v23  ;;  %4238 = vmatprep.subr.bf16.mxu0 %v4237_v52  ;;  %v2205_v23 = vld [vmem:[%s7509_s10 + $0xe8] sm:$0xff]  ;;  %v2208_v25 = vld [vmem:[%s7509_s10 + $0x100] sm:$0xff] }
 0x47a   :  { %v2124_v26 = vpop.f32.mrb[90].mxu1  ;;  %4240 = vmatpush3.bf16.msra.mxu0 %v4237_v52  ;;  %v2207_v52 = vld [vmem:[%s7509_s10 + $0xf8] sm:$0xff]  ;;  %v2216_v40 = vld [vmem:[%s7509_s10 + $0x140] sm:$0xff] }
 0x47b   :  { %v2159_v41 = vmax.f32 %v6798_v4, %v2124_v26  ;;  %v2126_v32 = vpop.f32.mrb[91].mxu1  ;;  %v2625_v4 = vld [vmem:[%s7510_s4] sm:$0xff]  ;;  %v2210_v26 = vld [vmem:[%s7509_s10 + $0x110] sm:$0xff] }
 0x47c   :  { %v4247_v0 = vpack.c.bf16 %v2626_v20, %v2625_v4  ;;  %v2212_v32 = vld [vmem:[%s7509_s10 + $0x120] sm:$0xff]  ;;  %v2219_v4 = vld [vmem:[%s7509_s10 + $0x158] sm:$0xff] }
 0x47d   :  { %v2175_v59 = vmax.f32 %v7655_v36, %v2159_v41  ;;  %v2211_v41 = vld [vmem:[%s7509_s10 + $0x118] sm:$0xff]  ;;  %v2213_v36 = vld [vmem:[%s7509_s10 + $0x128] sm:$0xff]  ;;  %v2220_v20 = vld [vmem:[%s7509_s10 + $0x160] sm:$0xff] }
 0x47f   :  { %v4241_v7 = vpack.c.bf16 %v2175_v59, %v2174_v22  ;;  %v2209_v22 = vld [vmem:[%s7509_s10 + $0x108] sm:$0xff]  ;;  %v2214_v59 = vld [vmem:[%s7509_s10 + $0x130] sm:$0xff] }
 0x481   :  { %4242 = vmatprep.subr.bf16.mxu0 %v4241_v7 }
 0x482   :  { %4244 = vmatpush3.bf16.msra.mxu0 %v4241_v7  ;;  %v2215_v7 = vld [vmem:[%s7509_s10 + $0x138] sm:$0xff] }
 0x483   :  { %4246 = vmatprep.subr.bf16.mxu0 %v4245_v37  ;;  %v2218_v37 = vld [vmem:[%s7509_s10 + $0x150] sm:$0xff] }
 0x485   :  { %3927 = vmatmul.mubr.f32.vlgmr.msra.gmra.mrb[100].mxu0 %v2177_v55  ;;  %v2650_v55 = vld [vmem:[%s7510_s4 + $0xc8] sm:$0xff] }
 0x486   :  { %3929 = vmatprep.mubr.f32.mxu0 %v2178_v42  ;;  %4248 = vmatpush3.bf16.msra.mxu0 %v4247_v0  ;;  %v2221_v0 = vld [vmem:[%s7509_s10 + $0x168] sm:$0xff]  ;;  %v4261_v17 = vpack.c.bf16 %v2650_v55, %v2649_v60  ;;  %v2222_v42 = vld [vmem:[%s7509_s10 + $0x170] sm:$0xff] }
 0x487   :  { %4250 = vmatprep.subr.bf16.mxu0 %v4249_v15  ;;  %v2633_v15 = vld [vmem:[%s7510_s4 + $0x40] sm:$0xff]  ;;  %v2658_v60 = vld [vmem:[%s7510_s4 + $0x108] sm:$0xff]  ;;  %v2675_v55 = vld [vmem:[%s7510_s4 + $0x190] sm:$0xff] }
 0x488   :  { %v4263_v63 = vpack.c.bf16 %v2634_v53, %v2633_v15 }
 0x489   :  { %3930 = vmatmul.mubr.f32.gmra.mrb[102].mxu0 %v2179_v56  ;;  %v2225_v56 = vld [vmem:[%s7509_s10 + $0x188] sm:$0xff] }
 0x48a   :  { %3932 = vmatprep.mubr.f32.mxu0 %v2180_v30  ;;  %4252 = vmatpush3.bf16.msra.mxu0 %v4251_v62  ;;  %v2226_v62 = vld [vmem:[%s7509_s10 + $0x190] sm:$0xff]  ;;  %v2227_v30 = vld [vmem:[%s7509_s10 + $0x198] sm:$0xff] }
 0x48b   :  { %4254 = vmatprep.subr.bf16.mxu0 %v4253_v2  ;;  %v2228_v2 = vld [vmem:[%s7509_s10 + $0x1a0] sm:$0xff] }
 0x48d   :  { %3933 = vmatmul.mubr.f32.gmra.mrb[104].mxu0 %v2181_v28  ;;  %v2230_v28 = vld [vmem:[%s7509_s10 + $0x1b0] sm:$0xff] }
 0x48e   :  { %3935 = vmatprep.mubr.f32.mxu0 %v2182_v13  ;;  %4256 = vmatpush3.bf16.msra.mxu0 %v4255_v24  ;;  %v2635_v24 = vld [vmem:[%s7510_s4 + $0x50] sm:$0xff]  ;;  %v2636_v13 = vld [vmem:[%s7510_s4 + $0x58] sm:$0xff] }
 0x48f   :  { %4258 = vmatprep.subr.bf16.mxu0 %v4257_v45  ;;  %v4267_v45 = vpack.c.bf16 %v2636_v13, %v2635_v24 }
 0x491   :  { %3936 = vmatmul.mubr.f32.gmra.mrb[106].mxu0 %v2183_v43  ;;  %v2653_v43 = vld [vmem:[%s7510_s4 + $0xe0] sm:$0xff] }
 0x492   :  { %3938 = vmatprep.mubr.f32.mxu0 %v2184_v33  ;;  %4260 = vmatpush3.bf16.msra.mxu0 %v4259_v35  ;;  %v2654_v35 = vld [vmem:[%s7510_s4 + $0xe8] sm:$0xff] }
 0x493   :  { %4262 = vmatprep.subr.bf16.mxu0 %v4261_v17  ;;  %v2233_v33 = vld [vmem:[%s7509_s10 + $0x1c8] sm:$0xff] }
 0x495   :  { %3939 = vmatmul.mubr.f32.gmra.mrb[108].mxu0 %v2185_v38  ;;  %v4269_v38 = vpack.c.bf16 %v2654_v35, %v2653_v43  ;;  %v2664_v43 = vld [vmem:[%s7510_s4 + $0x138] sm:$0xff]  ;;  %v2681_v35 = vld [vmem:[%s7510_s4 + $0x1c0] sm:$0xff] }
 0x496   :  { %3941 = vmatprep.mubr.f32.mxu0 %v2186_v61  ;;  %4264 = vmatpush3.bf16.msra.mxu0 %v4263_v63  ;;  %v2234_v61 = vld [vmem:[%s7509_s10 + $0x1d0] sm:$0xff] }
 0x497   :  { %4266 = vmatprep.subr.bf16.mxu0 %v4265_v46  ;;  %v2659_v63 = vld [vmem:[%s7510_s4 + $0x110] sm:$0xff] }
 0x498   :  { %v2679_v46 = vld [vmem:[%s7510_s4 + $0x1b0] sm:$0xff] }
 0x499   :  { %3942 = vmatmul.mubr.f32.gmra.mrb[110].mxu0 %v2187_v19  ;;  %v2637_v19 = vld [vmem:[%s7510_s4 + $0x60] sm:$0xff] }
 0x49a   :  { %3944 = vmatprep.mubr.f32.mxu0 %v2188_v11  ;;  %4268 = vmatpush3.bf16.msra.mxu0 %v4267_v45  ;;  %v2638_v11 = vld [vmem:[%s7510_s4 + $0x68] sm:$0xff] }
 0x49b   :  { %4270 = vmatprep.subr.bf16.mxu0 %v4269_v38 }
 0x49d   :  { %3945 = vmatmul.mubr.f32.gmra.mrb[112].mxu0 %v2189_v6  ;;  %v4271_v6 = vpack.c.bf16 %v2638_v11, %v2637_v19 }
 0x49e   :  { %3947 = vmatprep.mubr.f32.mxu0 %v2190_v47  ;;  %v2655_v47 = vld [vmem:[%s7510_s4 + $0xf0] sm:$0xff] }
 0x49f   :  { %4272 = vmatpush3.bf16.msra.mxu0 %v4271_v6  ;;  %v2665_v6 = vld [vmem:[%s7510_s4 + $0x140] sm:$0xff] }
 0x4a1   :  { %3948 = vmatmul.mubr.f32.gmra.mrb[114].mxu0 %v2191_v10  ;;  %v2656_v10 = vld [vmem:[%s7510_s4 + $0xf8] sm:$0xff] }
 0x4a2   :  { %3950 = vmatprep.mubr.f32.mxu0 %v2192_v12  ;;  %v2235_v12 = vld [vmem:[%s7509_s10 + $0x1d8] sm:$0xff] }
 0x4a5   :  { %3951 = vmatmul.mubr.f32.gmra.mrb[116].mxu0 %v2193_v34  ;;  %v4273_v34 = vpack.c.bf16 %v2656_v10, %v2655_v47  ;;  %v2666_v47 = vld [vmem:[%s7510_s4 + $0x148] sm:$0xff]  ;;  %v2683_v10 = vld [vmem:[%s7510_s4 + $0x1d0] sm:$0xff] }
 0x4a6   :  { %3953 = vmatprep.mubr.f32.mxu0 %v2194_v18  ;;  %v2236_v18 = vld [vmem:[%s7509_s10 + $0x1e0] sm:$0xff] }
 0x4a7   :  { %4274 = vmatprep.subr.bf16.mxu0 %v4273_v34 }
 0x4a9   :  { %3954 = vmatmul.mubr.f32.gmra.mrb[118].mxu0 %v2195_v8  ;;  %v2639_v8 = vld [vmem:[%s7510_s4 + $0x70] sm:$0xff] }
 0x4aa   :  { %3956 = vmatprep.mubr.f32.mxu0 %v2196_v27  ;;  %v2640_v27 = vld [vmem:[%s7510_s4 + $0x78] sm:$0xff] }
 0x4ad   :  { %3957 = vmatmul.mubr.f32.gmra.mrb[120].mxu0 %v2197_v16  ;;  %v4275_v16 = vpack.c.bf16 %v2640_v27, %v2639_v8 }
 0x4ae   :  { %3959 = vmatprep.mubr.f32.mxu0 %v2198_v29  ;;  %v2237_v29 = vld [vmem:[%s7509_s10 + $0x1e8] sm:$0xff] }
 0x4af   :  { %4276 = vmatpush3.bf16.msra.mxu0 %v4275_v16  ;;  %v2667_v16 = vld [vmem:[%s7510_s4 + $0x150] sm:$0xff] }
 0x4b1   :  { %3960 = vmatmul.mubr.f32.gmra.mrb[122].mxu0 %v2199_v51  ;;  %v2238_v51 = vld [vmem:[%s7509_s10 + $0x1f0] sm:$0xff] }
 0x4b2   :  { %3962 = vmatprep.mubr.f32.mxu0 %v2200_v9  ;;  %v2239_v9 = vld [vmem:[%s7509_s10 + $0x1f8] sm:$0xff] }
 0x4b5   :  { %3963 = vmatmul.mubr.f32.gmra.mrb[124].mxu0 %v2201_v58  ;;  %v2673_v58 = vld [vmem:[%s7510_s4 + $0x180] sm:$0xff] }
 0x4b6   :  { %3965 = vmatprep.mubr.f32.mxu0 %v2202_v39  ;;  %v2674_v39 = vld [vmem:[%s7510_s4 + $0x188] sm:$0xff] }
 0x4b9   :  { %3966 = vmatmul.mubr.f32.gmra.mrb[126].mxu0 %v2203_v54  ;;  %v4277_v54 = vpack.c.bf16 %v2674_v39, %v2673_v58 }
 0x4ba   :  { %3968 = vmatprep.mubr.f32.mxu0 %v2204_v44 }
 0x4bb   :  { %4278 = vmatprep.subr.bf16.mxu0 %v4277_v54 }
 0x4bd   :  { %3969 = vmatmul.mubr.f32.gmra.mrb[128].mxu0 %v2205_v23 }
 0x4be   :  { %3971 = vmatprep.mubr.f32.mxu0 %v2206_v48 }
 0x4c1   :  { %3972 = vmatmul.mubr.f32.gmra.mrb[130].mxu0 %v2207_v52 }
 0x4c2   :  { %3974 = vmatprep.mubr.f32.mxu0 %v2208_v25 }
 0x4c5   :  { %3975 = vmatmul.mubr.f32.gmra.mrb[132].mxu0 %v2209_v22 }
 0x4c6   :  { %3977 = vmatprep.mubr.f32.mxu0 %v2210_v26 }
 0x4c9   :  { %3978 = vmatmul.mubr.f32.gmra.mrb[134].mxu0 %v2211_v41 }
 0x4ca   :  { %3980 = vmatprep.mubr.f32.mxu0 %v2212_v32 }
 0x4cd   :  { %3981 = vmatmul.mubr.f32.gmra.mrb[136].mxu0 %v2213_v36 }
 0x4ce   :  { %3983 = vmatprep.mubr.f32.mxu0 %v2214_v59 }
 0x4d1   :  { %3984 = vmatmul.mubr.f32.gmra.mrb[138].mxu0 %v2215_v7 }
 0x4d2   :  { %3986 = vmatprep.mubr.f32.mxu0 %v2216_v40 }
 0x4d5   :  { %3987 = vmatmul.mubr.f32.gmra.mrb[140].mxu0 %v2217_v14 }
 0x4d6   :  { %3989 = vmatprep.mubr.f32.mxu0 %v2218_v37 }
 0x4d9   :  { %3990 = vmatmul.mubr.f32.gmra.mrb[142].mxu0 %v2219_v4 }
 0x4da   :  { %3992 = vmatprep.mubr.f32.mxu0 %v2220_v20  ;;  %v2657_v20 = vld [vmem:[%s7510_s4 + $0x100] sm:$0xff] }
 0x4dd   :  { %3993 = vmatmul.mubr.f32.gmra.mrb[144].mxu0 %v2221_v0  ;;  %v2676_v0 = vld [vmem:[%s7510_s4 + $0x198] sm:$0xff] }
 0x4de   :  { %3995 = vmatprep.mubr.f32.mxu0 %v2222_v42  ;;  %v4279_v42 = vpack.c.bf16 %v2658_v60, %v2657_v20  ;;  %v4281_v53 = vpack.c.bf16 %v2676_v0, %v2675_v55 }
 0x4e1   :  { %3996 = vmatmul.mubr.f32.gmra.mrb[146].mxu0 %v2223_v31  ;;  %v2660_v31 = vld [vmem:[%s7510_s4 + $0x118] sm:$0xff] }
 0x4e2   :  { %3998 = vmatprep.mubr.f32.mxu0 %v2224_v49  ;;  %v2677_v49 = vld [vmem:[%s7510_s4 + $0x1a0] sm:$0xff] }
 0x4e5   :  { %3999 = vmatmul.mubr.f32.gmra.mrb[148].mxu0 %v2225_v56  ;;  %v2678_v56 = vld [vmem:[%s7510_s4 + $0x1a8] sm:$0xff] }
 0x4e6   :  { %4001 = vmatprep.mubr.f32.mxu0 %v2226_v62  ;;  %v4285_v57 = vpack.c.bf16 %v2678_v56, %v2677_v49 }
 0x4e9   :  { %4002 = vmatmul.mubr.f32.gmra.mrb[150].mxu0 %v2227_v30  ;;  %v4283_v30 = vpack.c.bf16 %v2660_v31, %v2659_v63 }
 0x4ea   :  { %4004 = vmatprep.mubr.f32.mxu0 %v2228_v2 }
 0x4ed   :  { %4005 = vmatmul.mubr.f32.gmra.mrb[152].mxu0 %v2229_v50  ;;  %v2662_v50 = vld [vmem:[%s7510_s4 + $0x128] sm:$0xff] }
 0x4ee   :  { %4007 = vmatprep.mubr.f32.mxu0 %v2230_v28  ;;  %v2680_v28 = vld [vmem:[%s7510_s4 + $0x1b8] sm:$0xff]  ;;  %v4287_v13 = vpack.c.bf16 %v2662_v50, %v2661_v1 }
 0x4f1   :  { %4008 = vmatmul.mubr.f32.gmra.mrb[154].mxu0 %v2231_v3  ;;  %v4289_v3 = vpack.c.bf16 %v2680_v28, %v2679_v46 }
 0x4f2   :  { %4010 = vmatprep.mubr.f32.mxu0 %v2232_v21  ;;  %v2663_v21 = vld [vmem:[%s7510_s4 + $0x130] sm:$0xff] }
 0x4f5   :  { %4011 = vmatmul.mubr.f32.gmra.mrb[156].mxu0 %v2233_v33  ;;  %v2682_v33 = vld [vmem:[%s7510_s4 + $0x1c8] sm:$0xff] }
 0x4f6   :  { %4013 = vmatprep.mubr.f32.mxu0 %v2234_v61  ;;  %v4291_v61 = vpack.c.bf16 %v2664_v43, %v2663_v21  ;;  %v4293_v11 = vpack.c.bf16 %v2682_v33, %v2681_v35 }
 0x4f9   :  { %4014 = vmatmul.mubr.f32.gmra.mrb[158].mxu0 %v2235_v12  ;;  %v2684_v12 = vld [vmem:[%s7510_s4 + $0x1d8] sm:$0xff] }
 0x4fa   :  { %4016 = vmatprep.mubr.f32.mxu0 %v2236_v18  ;;  %v4295_v18 = vpack.c.bf16 %v2666_v47, %v2665_v6  ;;  %v4297_v27 = vpack.c.bf16 %v2684_v12, %v2683_v10 }
 0x4fd   :  { %4017 = vmatmul.mubr.f32.gmra.mrb[160].mxu0 %v2237_v29  ;;  %v2668_v29 = vld [vmem:[%s7510_s4 + $0x158] sm:$0xff] }
 0x4fe   :  { %4019 = vmatprep.mubr.f32.mxu0 %v2238_v51  ;;  %v2685_v51 = vld [vmem:[%s7510_s4 + $0x1e0] sm:$0xff]  ;;  %v4299_v39 = vpack.c.bf16 %v2668_v29, %v2667_v16 }
 0x501   :  { %4020 = vmatmul.mubr.f32.gmra.mrb[162].mxu0 %v2239_v9  ;;  %v2686_v9 = vld [vmem:[%s7510_s4 + $0x1e8] sm:$0xff] }
 0x558   :  { %v3928_v44 = vpop.f32.mrb[100].mxu0 }
 0x559   :  { %v2306_v23 = vpop.f32.mrb[101].mxu0 }
 0x55c   :  { %v3931_v48 = vpop.f32.mrb[102].mxu0 }
 0x55d   :  { %v2316_v52 = vpop.f32.mrb[103].mxu0 }
 0x560   :  { %v7146_v25 = vpop.f32.mrb[104].mxu0 }
 0x561   :  { %v7148_v22 = vpop.f32.mrb[105].mxu0 }
 0x564   :  { %v7150_v26 = vpop.f32.mrb[106].mxu0 }
 0x565   :  { %v7152_v41 = vpop.f32.mrb[107].mxu0 }
 0x568   :  { %v7154_v32 = vpop.f32.mrb[108].mxu0 }
 0x569   :  { %v7156_v36 = vpop.f32.mrb[109].mxu0 }
 0x56c   :  { %v7158_v59 = vpop.f32.mrb[110].mxu0 }
 0x56d   :  { %v7160_v7 = vpop.f32.mrb[111].mxu0 }
 0x570   :  { %v7162_v40 = vpop.f32.mrb[112].mxu0 }
 0x571   :  { %v7164_v14 = vpop.f32.mrb[113].mxu0 }
 0x574   :  { %v7166_v37 = vpop.f32.mrb[114].mxu0 }
 0x575   :  { %v7168_v4 = vpop.f32.mrb[115].mxu0 }
 0x578   :  { %v3952_v17 = vpop.f32.mrb[116].mxu0 }
 0x579   :  { %v2386_v15 = vpop.f32.mrb[117].mxu0 }
 0x57a   :  { %2753 = vmatprep.mubr.f32.mxu0 %v2386_v15 }
 0x57b   :  { %2754 = vmatmul.mubr.f32.vlgmr.msra.gmra.mrb[164].mxu0 %v2306_v23  ;;  %v2669_v23 = vld [vmem:[%s7510_s4 + $0x160] sm:$0xff] }
 0x57c   :  { %v3955_v62 = vpop.f32.mrb[118].mxu0  ;;  %2758 = vmatprep.mubr.f32.mxu0 %v3952_v17  ;;  %4280 = vmatpush3.bf16.msra.mxu0 %v4279_v42  ;;  %v2671_v17 = vld [vmem:[%s7510_s4 + $0x170] sm:$0xff]  ;;  %v2672_v42 = vld [vmem:[%s7510_s4 + $0x178] sm:$0xff] }
 0x57d   :  { %v2396_v2 = vpop.f32.mrb[119].mxu0  ;;  %4282 = vmatprep.subr.bf16.mxu0 %v4281_v53 }
 0x57f   :  { %2759 = vmatmul.mubr.f32.gmra.mrb[166].mxu0 %v3928_v44  ;;  %v4301_v44 = vpack.c.bf16 %v2686_v9, %v2685_v51 }
 0x580   :  { %v3958_v24 = vpop.f32.mrb[120].mxu0  ;;  %2763 = vmatprep.mubr.f32.mxu0 %v2396_v2  ;;  %4284 = vmatpush3.bf16.msra.mxu0 %v4283_v30 }
 0x581   :  { %v2406_v45 = vpop.f32.mrb[121].mxu0  ;;  %4286 = vmatprep.subr.bf16.mxu0 %v4285_v57 }
 0x583   :  { %2764 = vmatmul.mubr.f32.gmra.mrb[168].mxu0 %v2316_v52  ;;  %v2687_v52 = vld [vmem:[%s7510_s4 + $0x1f0] sm:$0xff] }
 0x584   :  { %v3961_v38 = vpop.f32.mrb[122].mxu0  ;;  %2768 = vmatprep.mubr.f32.mxu0 %v3955_v62  ;;  %4288 = vmatpush3.bf16.msra.mxu0 %v4287_v13 }
 0x585   :  { %v2416_v19 = vpop.f32.mrb[123].mxu0  ;;  %4290 = vmatprep.subr.bf16.mxu0 %v4289_v3 }
 0x587   :  { %2769 = vmatmul.mubr.f32.gmra.mrb[170].mxu0 %v3931_v48  ;;  %v2670_v48 = vld [vmem:[%s7510_s4 + $0x168] sm:$0xff] }
 0x588   :  { %v3964_v34 = vpop.f32.mrb[124].mxu0  ;;  %2773 = vmatprep.mubr.f32.mxu0 %v2406_v45  ;;  %4292 = vmatpush3.bf16.msra.mxu0 %v4291_v61  ;;  %v4303_v60 = vpack.c.bf16 %v2670_v48, %v2669_v23 }
 0x589   :  { %v2426_v8 = vpop.f32.mrb[125].mxu0  ;;  %4294 = vmatprep.subr.bf16.mxu0 %v4293_v11 }
 0x58b   :  { %2774 = vmatmul.mubr.f32.gmra.mrb[172].mxu0 %v7148_v22  ;;  %v2688_v22 = vld [vmem:[%s7510_s4 + $0x1f8] sm:$0xff] }
 0x58c   :  { %v3967_v58 = vpop.f32.mrb[126].mxu0  ;;  %2778 = vmatprep.mubr.f32.mxu0 %v3958_v24  ;;  %4296 = vmatpush3.bf16.msra.mxu0 %v4295_v18  ;;  %v4305_v0 = vpack.c.bf16 %v2688_v22, %v2687_v52 }
 0x58d   :  { %v2436_v54 = vpop.f32.mrb[127].mxu0  ;;  %4298 = vmatprep.subr.bf16.mxu0 %v4297_v27 }
 0x58f   :  { %2779 = vmatmul.mubr.f32.gmra.mrb[174].mxu0 %v7146_v25  ;;  %v4307_v25 = vpack.c.bf16 %v2672_v42, %v2671_v17 }
 0x590   :  { %v3970_v20 = vpop.f32.mrb[128].mxu0  ;;  %2783 = vmatprep.mubr.f32.mxu0 %v2416_v19  ;;  %4300 = vmatpush3.bf16.msra.mxu0 %v4299_v39 }
 0x591   :  { %v2446_v55 = vpop.f32.mrb[129].mxu0  ;;  %4302 = vmatprep.subr.bf16.mxu0 %v4301_v44 }
 0x593   :  { %2784 = vmatmul.mubr.f32.gmra.mrb[176].mxu0 %v7152_v41 }
 0x594   :  { %v3973_v15 = vpop.f32.mrb[130].mxu0  ;;  %2788 = vmatprep.mubr.f32.mxu0 %v3961_v38  ;;  %4304 = vmatpush3.bf16.msra.mxu0 %v4303_v60 }
 0x595   :  { %v2456_v53 = vpop.f32.mrb[131].mxu0  ;;  %4306 = vmatprep.subr.bf16.mxu0 %v4305_v0 }
 0x597   :  { %2789 = vmatmul.mubr.f32.gmra.mrb[178].mxu0 %v7150_v26 }
 0x598   :  { %v3976_v63 = vpop.f32.mrb[132].mxu0  ;;  %2793 = vmatprep.mubr.f32.mxu0 %v2426_v8  ;;  %4308 = vmatpush3.bf16.msra.mxu0 %v4307_v25 }
 0x599   :  { %v2466_v31 = vpop.f32.mrb[133].mxu0 }
 0x59b   :  { %2794 = vmatmul.mubr.f32.gmra.mrb[180].mxu0 %v7156_v36 }
 0x59c   :  { %v3979_v49 = vpop.f32.mrb[134].mxu0  ;;  %2798 = vmatprep.mubr.f32.mxu0 %v3964_v34 }
 0x59d   :  { %v2476_v56 = vpop.f32.mrb[135].mxu0 }
 0x59f   :  { %2799 = vmatmul.mubr.f32.gmra.mrb[182].mxu0 %v7154_v32 }
 0x5a0   :  { %v3982_v41 = vpop.f32.mrb[136].mxu0  ;;  %2803 = vmatprep.mubr.f32.mxu0 %v2436_v54 }
 0x5a1   :  { %v2486_v62 = vpop.f32.mrb[137].mxu0 }
 0x5a3   :  { %2804 = vmatmul.mubr.f32.gmra.mrb[184].mxu0 %v7160_v7 }
 0x5a4   :  { %v3985_v30 = vpop.f32.mrb[138].mxu0  ;;  %2808 = vmatprep.mubr.f32.mxu0 %v3967_v58 }
 0x5a5   :  { %v2496_v2 = vpop.f32.mrb[139].mxu0 }
 0x5a7   :  { %2809 = vmatmul.mubr.f32.gmra.mrb[186].mxu0 %v7158_v59 }
 0x5a8   :  { %v3988_v26 = vpop.f32.mrb[140].mxu0  ;;  %2813 = vmatprep.mubr.f32.mxu0 %v2446_v55 }
 0x5a9   :  { %v2506_v57 = vpop.f32.mrb[141].mxu0 }
 0x5ab   :  { %2814 = vmatmul.mubr.f32.gmra.mrb[188].mxu0 %v7164_v14 }
 0x5ac   :  { %v3991_v36 = vpop.f32.mrb[142].mxu0  ;;  %2818 = vmatprep.mubr.f32.mxu0 %v3970_v20 }
 0x5ad   :  { %v2516_v1 = vpop.f32.mrb[143].mxu0 }
 0x5af   :  { %2819 = vmatmul.mubr.f32.gmra.mrb[190].mxu0 %v7162_v40 }
 0x5b0   :  { %v3994_v32 = vpop.f32.mrb[144].mxu0  ;;  %2823 = vmatprep.mubr.f32.mxu0 %v2456_v53 }
 0x5b1   :  { %v2526_v50 = vpop.f32.mrb[145].mxu0 }
 0x5b3   :  { %2824 = vmatmul.mubr.f32.gmra.mrb[192].mxu0 %v7168_v4 }
 0x5b4   :  { %v3997_v7 = vpop.f32.mrb[146].mxu0  ;;  %2828 = vmatprep.mubr.f32.mxu0 %v3973_v15 }
 0x5b5   :  { %v2536_v46 = vpop.f32.mrb[147].mxu0 }
 0x5b7   :  { %2829 = vmatmul.mubr.f32.gmra.mrb[194].mxu0 %v7166_v37 }
 0x5b8   :  { %v4000_v59 = vpop.f32.mrb[148].mxu0 }
 0x5b9   :  { %v2546_v28 = vpop.f32.mrb[149].mxu0 }
 0x5ba   :  { %2898 = vmatprep.mubr.f32.mxu0 %v2546_v28 }
 0x5bb   :  { %2899 = vmatmul.mubr.f32.vlgmr.msra.gmra.mrb[196].mxu0 %v2466_v31 }
 0x5bc   :  { %2903 = vmatprep.mubr.f32.mxu0 %v4000_v59  ;;  %v4003_v14 = vpop.f32.mrb[150].mxu0 }
 0x5bd   :  { %v2556_v24 = vpop.f32.mrb[151].mxu0 }
 0x5bf   :  { %2904 = vmatmul.mubr.f32.gmra.mrb[198].mxu0 %v3976_v63 }
 0x5c0   :  { %2908 = vmatprep.mubr.f32.mxu0 %v2556_v24  ;;  %v4006_v40 = vpop.f32.mrb[152].mxu0 }
 0x5c1   :  { %v2566_v13 = vpop.f32.mrb[153].mxu0 }
 0x5c3   :  { %2909 = vmatmul.mubr.f32.gmra.mrb[200].mxu0 %v2476_v56 }
 0x5c4   :  { %2913 = vmatprep.mubr.f32.mxu0 %v4003_v14  ;;  %v4009_v45 = vpop.f32.mrb[154].mxu0 }
 0x5c5   :  { %v2576_v4 = vpop.f32.mrb[155].mxu0 }
 0x5c7   :  { %2914 = vmatmul.mubr.f32.gmra.mrb[202].mxu0 %v3979_v49 }
 0x5c8   :  { %2918 = vmatprep.mubr.f32.mxu0 %v2566_v13  ;;  %v4012_v3 = vpop.f32.mrb[156].mxu0 }
 0x5c9   :  { %v2586_v21 = vpop.f32.mrb[157].mxu0 }
 0x5cb   :  { %2919 = vmatmul.mubr.f32.gmra.mrb[204].mxu0 %v2486_v62 }
 0x5cc   :  { %2923 = vmatprep.mubr.f32.mxu0 %v4006_v40  ;;  %v4015_v37 = vpop.f32.mrb[158].mxu0 }
 0x5cd   :  { %v2596_v43 = vpop.f32.mrb[159].mxu0 }
 0x5cf   :  { %2924 = vmatmul.mubr.f32.gmra.mrb[206].mxu0 %v3982_v41 }
 0x5d0   :  { %2928 = vmatprep.mubr.f32.mxu0 %v2576_v4  ;;  %v4018_v35 = vpop.f32.mrb[160].mxu0 }
 0x5d1   :  { %v2606_v33 = vpop.f32.mrb[161].mxu0 }
 0x5d3   :  { %2929 = vmatmul.mubr.f32.gmra.mrb[208].mxu0 %v2496_v2 }
 0x5d4   :  { %2933 = vmatprep.mubr.f32.mxu0 %v4009_v45  ;;  %v4021_v38 = vpop.f32.mrb[162].mxu0 }
 0x5d5   :  { %v2616_v61 = vpop.f32.mrb[163].mxu0 }
 0x5d7   :  { %2934 = vmatmul.mubr.f32.gmra.mrb[210].mxu0 %v3985_v30 }
 0x5d8   :  { %2938 = vmatprep.mubr.f32.mxu0 %v2586_v21 }
 0x5db   :  { %2939 = vmatmul.mubr.f32.gmra.mrb[212].mxu0 %v2506_v57 }
 0x5dc   :  { %2943 = vmatprep.mubr.f32.mxu0 %v4012_v3 }
 0x5df   :  { %2944 = vmatmul.mubr.f32.gmra.mrb[214].mxu0 %v3988_v26 }
 0x5e0   :  { %2948 = vmatprep.mubr.f32.mxu0 %v2596_v43 }
 0x5e3   :  { %2949 = vmatmul.mubr.f32.gmra.mrb[216].mxu0 %v2516_v1 }
 0x5e4   :  { %2953 = vmatprep.mubr.f32.mxu0 %v4015_v37 }
 0x5e7   :  { %2954 = vmatmul.mubr.f32.gmra.mrb[218].mxu0 %v3991_v36 }
 0x5e8   :  { %2958 = vmatprep.mubr.f32.mxu0 %v2606_v33 }
 0x5eb   :  { %2959 = vmatmul.mubr.f32.gmra.mrb[220].mxu0 %v2526_v50 }
 0x5ec   :  { %2963 = vmatprep.mubr.f32.mxu0 %v4018_v35 }
 0x5ef   :  { %2964 = vmatmul.mubr.f32.gmra.mrb[222].mxu0 %v3994_v32 }
 0x5f0   :  { %2968 = vmatprep.mubr.f32.mxu0 %v2616_v61 }
 0x5f3   :  { %2969 = vmatmul.mubr.f32.gmra.mrb[224].mxu0 %v2536_v46 }
 0x5f4   :  { %2973 = vmatprep.mubr.f32.mxu0 %v4021_v38 }
 0x5f7   :  { %2974 = vmatmul.mubr.f32.gmra.mrb[226].mxu0 %v3997_v7 }
 0x64e   :  { %v3619_v19 = vpop.f32.mrb[164].mxu0 }
 0x64f   :  { %v3620_v11 = vpop.f32.mrb[165].mxu0 }
 0x650   :  { %v3621_v6 = vadd.f32 %v3620_v11, %v3619_v19  ;;  %v3108_v19 = vld [vmem:[%s7511_s11] sm:$0xff] }
 0x651   :  { %4054 = vmatprep.mubr.f32.mxu0 %v3108_v19 }
 0x652   :  { %v3622_v47 = vpop.f32.mrb[166].mxu0 }
 0x653   :  { %v3623_v10 = vpop.f32.mrb[167].mxu0 }
 0x654   :  { %v3624_v12 = vadd.f32 %v3623_v10, %v3622_v47 }
 0x656   :  { %v3625_v34 = vpop.f32.mrb[168].mxu0 }
 0x657   :  { %v3626_v18 = vpop.f32.mrb[169].mxu0 }
 0x658   :  { %v3627_v8 = vadd.f32 %v3626_v18, %v3625_v34 }
 0x65a   :  { %v3628_v27 = vpop.f32.mrb[170].mxu0 }
 0x65b   :  { %v3629_v16 = vpop.f32.mrb[171].mxu0 }
 0x65c   :  { %v3630_v29 = vadd.f32 %v3629_v16, %v3628_v27 }
 0x65e   :  { %v3631_v51 = vpop.f32.mrb[172].mxu0 }
 0x65f   :  { %v3632_v9 = vpop.f32.mrb[173].mxu0 }
 0x660   :  { %v3633_v58 = vadd.f32 %v3632_v9, %v3631_v51 }
 0x662   :  { %v3634_v39 = vpop.f32.mrb[174].mxu0 }
 0x663   :  { %v3635_v54 = vpop.f32.mrb[175].mxu0 }
 0x664   :  { %v3636_v44 = vadd.f32 %v3635_v54, %v3634_v39 }
 0x666   :  { %v3637_v23 = vpop.f32.mrb[176].mxu0 }
 0x667   :  { %v3638_v48 = vpop.f32.mrb[177].mxu0 }
 0x668   :  { %v3639_v52 = vadd.f32 %v3638_v48, %v3637_v23 }
 0x66a   :  { %v3640_v22 = vpop.f32.mrb[178].mxu0 }
 0x66b   :  { %v3641_v20 = vpop.f32.mrb[179].mxu0 }
 0x66c   :  { %v7272_v60 = vadd.f32 %v3641_v20, %v3640_v22 }
 0x66e   :  { %v3643_v55 = vpop.f32.mrb[180].mxu0 }
 0x66f   :  { %v3644_v0 = vpop.f32.mrb[181].mxu0 }
 0x670   :  { %v7274_v17 = vadd.f32 %v3644_v0, %v3643_v55 }
 0x672   :  { %v3646_v42 = vpop.f32.mrb[182].mxu0 }
 0x673   :  { %v3647_v15 = vpop.f32.mrb[183].mxu0 }
 0x674   :  { %v7276_v25 = vadd.f32 %v3647_v15, %v3646_v42 }
 0x676   :  { %v3649_v53 = vpop.f32.mrb[184].mxu0 }
 0x677   :  { %v3650_v63 = vpop.f32.mrb[185].mxu0 }
 0x678   :  { %v7278_v31 = vadd.f32 %v3650_v63, %v3649_v53 }
 0x67a   :  { %v3652_v49 = vpop.f32.mrb[186].mxu0 }
 0x67b   :  { %v3653_v56 = vpop.f32.mrb[187].mxu0 }
 0x67c   :  { %v7280_v41 = vadd.f32 %v3653_v56, %v3652_v49 }
 0x67e   :  { %v3655_v62 = vpop.f32.mrb[188].mxu0 }
 0x67f   :  { %v3656_v30 = vpop.f32.mrb[189].mxu0 }
 0x680   :  { %v7282_v2 = vadd.f32 %v3656_v30, %v3655_v62 }
 0x682   :  { %v3658_v26 = vpop.f32.mrb[190].mxu0 }
 0x683   :  { %v3659_v57 = vpop.f32.mrb[191].mxu0 }
 0x684   :  { %v7284_v36 = vadd.f32 %v3659_v57, %v3658_v26 }
 0x686   :  { %v3661_v1 = vpop.f32.mrb[192].mxu0 }
 0x687   :  { %v3662_v32 = vpop.f32.mrb[193].mxu0 }
 0x688   :  { %v7286_v50 = vadd.f32 %v3662_v32, %v3661_v1 }
 0x68a   :  { %v3664_v7 = vpop.f32.mrb[194].mxu0 }
 0x68b   :  { %v3665_v46 = vpop.f32.mrb[195].mxu0 }
 0x68c   :  { %v7288_v59 = vadd.f32 %v3665_v46, %v3664_v7 }
 0x68e   :  { %v3699_v28 = vpop.f32.mrb[196].mxu0 }
 0x68f   :  { %v3700_v14 = vpop.f32.mrb[197].mxu0 }
 0x690   :  { %v3701_v24 = vadd.f32 %v3700_v14, %v3699_v28 }
 0x692   :  { %v7290_v40 = vadd.f32 %v3701_v24, %v3621_v6  ;;  %v3702_v13 = vpop.f32.mrb[198].mxu0 }
 0x693   :  { %v3703_v45 = vpop.f32.mrb[199].mxu0 }
 0x694   :  { %v3704_v4 = vadd.f32 %v3703_v45, %v3702_v13 }
 0x696   :  { %v7292_v3 = vadd.f32 %v3704_v4, %v3624_v12  ;;  %v3705_v21 = vpop.f32.mrb[200].mxu0 }
 0x697   :  { %v3706_v37 = vpop.f32.mrb[201].mxu0 }
 0x698   :  { %v3707_v43 = vadd.f32 %v3706_v37, %v3705_v21  ;;  %v3003_v9 = vmul.f32 %v7292_v3, %v7292_v3  ;;  %v2981_v54 = vadd.f32 %v7292_v3, %v7290_v40 }
 0x69a   :  { %v7294_v35 = vadd.f32 %v3707_v43, %v3627_v8  ;;  %v3708_v33 = vpop.f32.mrb[202].mxu0 }
 0x69b   :  { %v3709_v38 = vpop.f32.mrb[203].mxu0 }
 0x69c   :  { %v3710_v61 = vadd.f32 %v3709_v38, %v3708_v33  ;;  %v2982_v20 = vadd.f32 %v2981_v54, %v7294_v35 }
 0x69e   :  { %v7299_v11 = vadd.f32 %v3710_v61, %v3630_v29  ;;  %v3711_v6 = vpop.f32.mrb[204].mxu0  ;;  %v3002_v29 = vmul.f32 %v7290_v40, %v7290_v40 }
 0x69f   :  { %v3712_v47 = vpop.f32.mrb[205].mxu0 }
 0x6a0   :  { %v3713_v10 = vadd.f32 %v3712_v47, %v3711_v6  ;;  %v3018_v22 = vadd.f32 %v3003_v9, %v3002_v29  ;;  %v3005_v55 = vmul.f32 %v7299_v11, %v7299_v11  ;;  %v2983_v15 = vadd.f32 %v2982_v20, %v7299_v11 }
 0x6a2   :  { %v7301_v12 = vadd.f32 %v3713_v10, %v3633_v58  ;;  %v3714_v34 = vpop.f32.mrb[206].mxu0  ;;  %v3004_v58 = vmul.f32 %v7294_v35, %v7294_v35 }
 0x6a3   :  { %v3715_v18 = vpop.f32.mrb[207].mxu0 }
 0x6a4   :  { %v3716_v27 = vadd.f32 %v3715_v18, %v3714_v34  ;;  %v3019_v42 = vadd.f32 %v3018_v22, %v3004_v58  ;;  %v3006_v53 = vmul.f32 %v7301_v12, %v7301_v12  ;;  %v2984_v62 = vadd.f32 %v2983_v15, %v7301_v12 }
 0x6a6   :  { %v7303_v8 = vadd.f32 %v3716_v27, %v3636_v44  ;;  %v3717_v16 = vpop.f32.mrb[208].mxu0  ;;  %v3020_v56 = vadd.f32 %v3019_v42, %v3005_v55 }
 0x6a7   :  { %v3718_v51 = vpop.f32.mrb[209].mxu0 }
 0x6a8   :  { %v3719_v39 = vadd.f32 %v3718_v51, %v3717_v16  ;;  %v3007_v30 = vmul.f32 %v7303_v8, %v7303_v8  ;;  %v3021_v57 = vadd.f32 %v3020_v56, %v3006_v53  ;;  %v2985_v1 = vadd.f32 %v2984_v62, %v7303_v8 }
 0x6aa   :  { %v7313_v23 = vadd.f32 %v3719_v39, %v3639_v52  ;;  %v3720_v48 = vpop.f32.mrb[210].mxu0  ;;  %v3022_v28 = vadd.f32 %v3021_v57, %v3007_v30 }
 0x6ab   :  { %v3721_v44 = vpop.f32.mrb[211].mxu0 }
 0x6ac   :  { %v3722_v0 = vadd.f32 %v3721_v44, %v3720_v48  ;;  %v3008_v32 = vmul.f32 %v7313_v23, %v7313_v23  ;;  %v2986_v14 = vadd.f32 %v2985_v1, %v7313_v23 }
 0x6ae   :  { %v7322_v63 = vadd.f32 %v3722_v0, %v7272_v60  ;;  %v3723_v52 = vpop.f32.mrb[212].mxu0  ;;  %v3023_v45 = vadd.f32 %v3022_v28, %v3008_v32 }
 0x6af   :  { %v3724_v49 = vpop.f32.mrb[213].mxu0 }
 0x6b0   :  { %v3725_v26 = vadd.f32 %v3724_v49, %v3723_v52  ;;  %v3009_v24 = vmul.f32 %v7322_v63, %v7322_v63  ;;  %v2987_v4 = vadd.f32 %v2986_v14, %v7322_v63 }
 0x6b2   :  { %v7331_v7 = vadd.f32 %v3725_v26, %v7274_v17  ;;  %v3726_v60 = vpop.f32.mrb[214].mxu0  ;;  %v3024_v33 = vadd.f32 %v3023_v45, %v3009_v24 }
 0x6b3   :  { %v3727_v46 = vpop.f32.mrb[215].mxu0 }
 0x6b4   :  { %v3728_v13 = vadd.f32 %v3727_v46, %v3726_v60  ;;  %v3010_v21 = vmul.f32 %v7331_v7, %v7331_v7  ;;  %v2988_v38 = vadd.f32 %v2987_v4, %v7331_v7 }
 0x6b6   :  { %v7340_v37 = vadd.f32 %v3728_v13, %v7276_v25  ;;  %v3729_v17 = vpop.f32.mrb[216].mxu0  ;;  %v3025_v6 = vadd.f32 %v3024_v33, %v3010_v21 }
 0x6b7   :  { %v3730_v43 = vpop.f32.mrb[217].mxu0 }
 0x6b8   :  { %v3011_v61 = vmul.f32 %v7340_v37, %v7340_v37  ;;  %v3731_v19 = vadd.f32 %v3730_v43, %v3729_v17  ;;  %v2989_v47 = vadd.f32 %v2988_v38, %v7340_v37 }
 0x6ba   :  { %v7347_v10 = vadd.f32 %v3731_v19, %v7278_v31  ;;  %v3732_v34 = vpop.f32.mrb[218].mxu0  ;;  %v3026_v27 = vadd.f32 %v3025_v6, %v3011_v61 }
 0x6bb   :  { %v3733_v18 = vpop.f32.mrb[219].mxu0 }
 0x6bc   :  { %v2990_v25 = vadd.f32 %v2989_v47, %v7347_v10  ;;  %v3012_v16 = vmul.f32 %v7347_v10, %v7347_v10  ;;  %v3734_v51 = vadd.f32 %v3733_v18, %v3732_v34 }
 0x6be   :  { %v3027_v9 = vadd.f32 %v3026_v27, %v3012_v16  ;;  %v7353_v39 = vadd.f32 %v3734_v51, %v7280_v41  ;;  %v3735_v29 = vpop.f32.mrb[220].mxu0  ;;  %v2979_v16 = vld [vmem:[%s7512_s5] sm:$0x1] }
 0x6bf   :  { %v3736_v54 = vpop.f32.mrb[221].mxu0 }
 0x6c0   :  { %v2991_v58 = vadd.f32 %v2990_v25, %v7353_v39  ;;  %v3013_v31 = vmul.f32 %v7353_v39, %v7353_v39  ;;  %v3737_v48 = vadd.f32 %v3736_v54, %v3735_v29  ;;  %v2980_v29 = vld [vmem:[%s7513_s6] sm:$0x1] }
 0x6c2   :  { %v3028_v44 = vadd.f32 %v3027_v9, %v3013_v31  ;;  %v7359_v22 = vadd.f32 %v3737_v48, %v7282_v2  ;;  %v3738_v20 = vpop.f32.mrb[222].mxu0 }
 0x6c3   :  { %v3739_v55 = vpop.f32.mrb[223].mxu0 }
 0x6c4   :  { %v2992_v0 = vadd.f32 %v2991_v58, %v7359_v22  ;;  %v3014_v41 = vmul.f32 %v7359_v22, %v7359_v22  ;;  %v3740_v42 = vadd.f32 %v3739_v55, %v3738_v20  ;;  %v7656_v58 = vld [vmem:[#allocation26_spill] sm:$0xff] }
 0x6c6   :  { %v3029_v15 = vadd.f32 %v3028_v44, %v3014_v41  ;;  %v7365_v53 = vadd.f32 %v3740_v42, %v7284_v36  ;;  %v3741_v52 = vpop.f32.mrb[224].mxu0 }
 0x6c7   :  { %v3742_v49 = vpop.f32.mrb[225].mxu0 }
 0x6c8   :  { %v2993_v56 = vadd.f32 %v2992_v0, %v7365_v53  ;;  %v3015_v2 = vmul.f32 %v7365_v53, %v7365_v53  ;;  %v3743_v62 = vadd.f32 %v3742_v49, %v3741_v52 }
 0x6ca   :  { %v3030_v30 = vadd.f32 %v3029_v15, %v3015_v2  ;;  %v7371_v26 = vadd.f32 %v3743_v62, %v7286_v50  ;;  %v3744_v57 = vpop.f32.mrb[226].mxu0 }
 0x6cb   :  { %v3745_v1 = vpop.f32.mrb[227].mxu0 }
 0x6cc   :  { %v2994_v32 = vadd.f32 %v2993_v56, %v7371_v26  ;;  %v3016_v36 = vmul.f32 %v7371_v26, %v7371_v26  ;;  %v3746_v60 = vadd.f32 %v3745_v1, %v3744_v57 }
 0x6ce   :  { %v3031_v46 = vadd.f32 %v3030_v30, %v3016_v36  ;;  %v2976_v28 = vadd.f32 %v3746_v60, %v7288_v59 }
 0x6d0   :  { %v2995_v14 = vadd.f32 %v2994_v32, %v2976_v28  ;;  %v3017_v24 = vmul.f32 %v2976_v28, %v2976_v28 }
 0x6d2   :  { %v2996_v13 = vrot.slane %v2995_v14, 4  ;;  %v3032_v45 = vadd.f32 %v3031_v46, %v3017_v24 }
 0x6d4   :  { %v2997_v4 = vadd.f32 %v2996_v13, %v2995_v14  ;;  %v3033_v21 = vrot.slane %v3032_v45, 4 }
 0x6d6   :  { %v2998_v17 = vrot.slane %v2997_v4, 2  ;;  %v3034_v50 = vadd.f32 %v3033_v21, %v3032_v45 }
 0x6d8   :  { %v2999_v43 = vadd.f32 %v2998_v17, %v2997_v4  ;;  %v3035_v33 = vrot.slane %v3034_v50, 2 }
 0x6da   :  { %v3000_v38 = vrot.slane %v2999_v43, 1  ;;  %v3036_v61 = vadd.f32 %v3035_v33, %v3034_v50 }
 0x6dc   :  { %v3001_v19 = vadd.f32 %v3000_v38, %v2999_v43  ;;  %v3037_v6 = vrot.slane %v3036_v61, 1 }
 0x6de   :  { %v3038_v47 = vadd.f32 %v3037_v6, %v3036_v61  ;;  %v3039_v34 = vmul.f32 0.013888889, %v3001_v19 }
 0x6e0   :  { %v3040_v18 = vmul.f32 0.013888889, %v3038_v47  ;;  %v3041_v27 = vmul.f32 %v3039_v34, %v3039_v34 }
 0x6e2   :  { %v3042_v25 = vsub.f32 %v3040_v18, %v3041_v27 }
 0x6e4   :  { %v3043_v59 = vadd.f32 1e-05, %v3042_v25 }
 0x6e6   :  { %4512 = vrsqrt.f32 %v3043_v59 }
 0x6f0   :  { %v4513_v51 = vpop.eup %4512 }
 0x6f1   :  { %v3045_v9 = vmul.f32 %v4513_v51, %v2979_v16 }
 0x6f3   :  { %v3046_v54 = vmul.f32 %v3045_v9, %v3039_v34  ;;  %v3052_v31 = vrot.slane %v3045_v9, %v7656_v58 }
 0x6f5   :  { %v3047_v48 = vsub.f32 %v2980_v29, %v3046_v54  ;;  %v3069_v44 = vmul.f32 %v3052_v31, %v2976_v28  ;;  %v3054_v20 = vmul.f32 %v3052_v31, %v7290_v40  ;;  %v3055_v55 = vmul.f32 %v3052_v31, %v7292_v3  ;;  %v3255_v29 = vld [vmem:[%s7514_s7 + $0x8] sm:$0xff] }
 0x6f6   :  { %v3056_v0 = vmul.f32 %v3052_v31, %v7294_v35  ;;  %v3057_v41 = vmul.f32 %v3052_v31, %v7299_v11  ;;  %v3058_v42 = vmul.f32 %v3052_v31, %v7301_v12  ;;  %v3059_v15 = vmul.f32 %v3052_v31, %v7303_v8  ;;  %v3109_v54 = vld [vmem:[%s7511_s11 + $0x8] sm:$0xff] }
 0x6f7   :  { %v3074_v52 = vrot.slane %v3047_v48, %v7656_v58  ;;  %v3060_v49 = vmul.f32 %v3052_v31, %v7313_v23  ;;  %v3061_v56 = vmul.f32 %v3052_v31, %v7322_v63  ;;  %v3062_v2 = vmul.f32 %v3052_v31, %v7331_v7  ;;  %v3256_v48 = vld [vmem:[%s7514_s7 + $0x10] sm:$0xff] }
 0x6f8   :  { %v3063_v40 = vmul.f32 %v3052_v31, %v7340_v37  ;;  %v3064_v3 = vmul.f32 %v3052_v31, %v7347_v10  ;;  %v3065_v35 = vmul.f32 %v3052_v31, %v7353_v39  ;;  %v3066_v11 = vmul.f32 %v3052_v31, %v7359_v22 }
 0x6f9   :  { %v3076_v62 = vadd.f32 %v3074_v52, %v3054_v20  ;;  %v3077_v12 = vadd.f32 %v3074_v52, %v3055_v55  ;;  %v3078_v30 = vadd.f32 %v3074_v52, %v3056_v0  ;;  %v3079_v8 = vadd.f32 %v3074_v52, %v3057_v41  ;;  %v3111_v20 = vld [vmem:[%s7511_s11 + $0x18] sm:$0xff]  ;;  %v3112_v0 = vld [vmem:[%s7511_s11 + $0x20] sm:$0xff] }
 0x6fa   :  { %v3080_v57 = vadd.f32 %v3074_v52, %v3058_v42  ;;  %v3081_v1 = vadd.f32 %v3074_v52, %v3059_v15  ;;  %v3082_v32 = vadd.f32 %v3074_v52, %v3060_v49  ;;  %v3083_v23 = vadd.f32 %v3074_v52, %v3061_v56  ;;  %v3258_v41 = vld [vmem:[%s7514_s7 + $0x20] sm:$0xff]  ;;  %v3259_v42 = vld [vmem:[%s7514_s7 + $0x28] sm:$0xff]  ;;  %v3114_v49 = vld [vmem:[%s7511_s11 + $0x30] sm:$0xff] }
 0x6fb   :  { %v3092_v36 = vmax.f32 %v3076_v62, 0.0  ;;  %v3093_v63 = vmax.f32 %v3077_v12, 0.0  ;;  %v3094_v60 = vmax.f32 %v3078_v30, 0.0  ;;  %v3095_v7 = vmax.f32 %v3079_v8, 0.0  ;;  %v3113_v15 = vld [vmem:[%s7511_s11 + $0x28] sm:$0xff]  ;;  %v3260_v56 = vld [vmem:[%s7514_s7 + $0x30] sm:$0xff] }
 0x6fc   :  { %v3096_v46 = vmax.f32 %v3080_v57, 0.0  ;;  %v3097_v37 = vmax.f32 %v3081_v1, 0.0  ;;  %v3098_v28 = vmax.f32 %v3082_v32, 0.0  ;;  %v3099_v10 = vmax.f32 %v3083_v23, 0.0  ;;  %v3263_v62 = vld [vmem:[%s7514_s7 + $0x48] sm:$0xff]  ;;  %v3118_v8 = vld [vmem:[%s7511_s11 + $0x50] sm:$0xff] }
 0x6fd   :  { %v4309_v14 = vpack.c.bf16 %v3093_v63, %v3092_v36  ;;  %v4313_v39 = vpack.c.bf16 %v3095_v7, %v3094_v60  ;;  %v3084_v24 = vadd.f32 %v3074_v52, %v3062_v2  ;;  %v3085_v22 = vadd.f32 %v3074_v52, %v3063_v40  ;;  %v3261_v2 = vld [vmem:[%s7514_s7 + $0x38] sm:$0xff]  ;;  %v3117_v12 = vld [vmem:[%s7511_s11 + $0x48] sm:$0xff]  ;;  %v3264_v1 = vld [vmem:[%s7514_s7 + $0x50] sm:$0xff] }
 0x6fe   :  { %v4317_v13 = vpack.c.bf16 %v3097_v37, %v3096_v46  ;;  %v4321_v45 = vpack.c.bf16 %v3099_v10, %v3098_v28  ;;  %v3086_v4 = vadd.f32 %v3074_v52, %v3064_v3  ;;  %v3087_v21 = vadd.f32 %v3074_v52, %v3065_v35  ;;  %v3115_v40 = vld [vmem:[%s7511_s11 + $0x38] sm:$0xff]  ;;  %v3116_v35 = vld [vmem:[%s7511_s11 + $0x40] sm:$0xff]  ;;  %v3267_v63 = vld [vmem:[%s7514_s7 + $0x68] sm:$0xff] }
 0x6ff   :  { %4310 = vmatprep.subr.bf16.mxu0 %v4309_v14  ;;  %v3100_v17 = vmax.f32 %v3084_v24, 0.0  ;;  %v3101_v50 = vmax.f32 %v3085_v22, 0.0  ;;  %v3067_v43 = vmul.f32 %v3052_v31, %v7365_v53  ;;  %v3088_v33 = vadd.f32 %v3074_v52, %v3066_v11  ;;  %v3262_v11 = vld [vmem:[%s7514_s7 + $0x40] sm:$0xff]  ;;  %v3119_v57 = vld [vmem:[%s7511_s11 + $0x58] sm:$0xff]  ;;  %v3268_v7 = vld [vmem:[%s7514_s7 + $0x70] sm:$0xff] }
 0x700   :  { %4312 = vmatpush3.bf16.msra.mxu0 %v4309_v14  ;;  %v3102_v38 = vmax.f32 %v3086_v4, 0.0  ;;  %v3103_v61 = vmax.f32 %v3087_v21, 0.0  ;;  %v3068_v19 = vmul.f32 %v3052_v31, %v7371_v26  ;;  %v3091_v6 = vadd.f32 %v3074_v52, %v3069_v44  ;;  %v3254_v26 = vld [vmem:[%s7514_s7] sm:$0xff]  ;;  %v3110_v31 = vld [vmem:[%s7511_s11 + $0x10] sm:$0xff]  ;;  %v3257_v44 = vld [vmem:[%s7514_s7 + $0x18] sm:$0xff] }
 0x701   :  { %4314 = vmatprep.subr.bf16.mxu0 %v4313_v39  ;;  %v4325_v47 = vpack.c.bf16 %v3101_v50, %v3100_v17  ;;  %v3089_v34 = vadd.f32 %v3074_v52, %v3067_v43  ;;  %v3104_v18 = vmax.f32 %v3088_v33, 0.0  ;;  %v4342_v58 = vpack.c.bf16 %v3255_v29, %v3254_v26  ;;  %v3265_v32 = vld [vmem:[%s7514_s7 + $0x58] sm:$0xff]  ;;  %v3266_v36 = vld [vmem:[%s7514_s7 + $0x60] sm:$0xff] }
 0x702   :  { %v4329_v27 = vpack.c.bf16 %v3103_v61, %v3102_v38  ;;  %v3090_v25 = vadd.f32 %v3074_v52, %v3068_v19  ;;  %v3107_v59 = vmax.f32 %v3091_v6, 0.0  ;;  %v4345_v55 = vpack.c.bf16 %v3257_v44, %v3256_v48  ;;  %v3269_v46 = vld [vmem:[%s7514_s7 + $0x78] sm:$0xff] }
 0x703   :  { %v3105_v16 = vmax.f32 %v3089_v34, 0.0  ;;  %v4348_v52 = vpack.c.bf16 %v3259_v42, %v3258_v41  ;;  %v4351_v3 = vpack.c.bf16 %v3261_v2, %v3260_v56  ;;  %v4354_v30 = vpack.c.bf16 %v3263_v62, %v3262_v11 }
 0x704   :  { %4316 = vmatpush3.bf16.msra.mxu0 %v4313_v39  ;;  %v3106_v51 = vmax.f32 %v3090_v25, 0.0  ;;  %v4357_v23 = vpack.c.bf16 %v3265_v32, %v3264_v1  ;;  %v4360_v60 = vpack.c.bf16 %v3267_v63, %v3266_v36  ;;  %v4363_v37 = vpack.c.bf16 %v3269_v46, %v3268_v7 }
 0x705   :  { %4318 = vmatprep.subr.bf16.mxu0 %v4317_v13  ;;  %v4333_v9 = vpack.c.bf16 %v3105_v16, %v3104_v18  ;;  %v4522_v28 = vmov 0.0  }
 0x706   :  { %v4337_v53 = vpack.c.bf16 %v3107_v59, %v3106_v51 }
 0x708   :  { %4320 = vmatpush3.bf16.msra.mxu0 %v4317_v13 }
 0x709   :  { %4322 = vmatprep.subr.bf16.mxu0 %v4321_v45 }
 0x70c   :  { %4324 = vmatpush3.bf16.msra.mxu0 %v4321_v45 }
 0x70d   :  { %4326 = vmatprep.subr.bf16.mxu0 %v4325_v47 }
 0x710   :  { %4328 = vmatpush3.bf16.msra.mxu0 %v4325_v47 }
 0x711   :  { %4330 = vmatprep.subr.bf16.mxu0 %v4329_v27 }
 0x714   :  { %4332 = vmatpush3.bf16.msra.mxu0 %v4329_v27  ;;  %v3440_v27 = vld [vmem:[%s7515_s8] ss:$0 sm:$0xff] }
 0x715   :  { %4334 = vmatprep.subr.bf16.mxu0 %v4333_v9 }
 0x718   :  { %4336 = vmatpush3.bf16.msra.mxu0 %v4333_v9 }
 0x719   :  { %4338 = vmatprep.subr.bf16.mxu0 %v4337_v53 }
 0x71c   :  { %4340 = vmatpush3.bf16.msra.mxu0 %v4337_v53 }
 0x71d   :  { %4341 = vmatprep.subr.bf16.mxu0 %v7639_v5 }
 0x71f   :  { %4055 = vmatmul.mubr.f32.vlgmr.msra.gmra.mrb[228].mxu0 %v3109_v54 }
 0x720   :  { %4057 = vmatprep.mubr.f32.mxu0 %v3110_v31  ;;  %4343 = vmatpush3.bf16.msra.mxu0 %v4342_v58 }
 0x721   :  { %4344 = vmatprep.subr.bf16.mxu0 %v7639_v5 }
 0x723   :  { %4058 = vmatmul.mubr.f32.gmra.mrb[230].mxu0 %v3111_v20 }
 0x724   :  { %4060 = vmatprep.mubr.f32.mxu0 %v3112_v0  ;;  %4346 = vmatpush3.bf16.msra.mxu0 %v4345_v55 }
 0x725   :  { %4347 = vmatprep.subr.bf16.mxu0 %v7639_v5 }
 0x727   :  { %4061 = vmatmul.mubr.f32.gmra.mrb[232].mxu0 %v3113_v15 }
 0x728   :  { %4063 = vmatprep.mubr.f32.mxu0 %v3114_v49  ;;  %4349 = vmatpush3.bf16.msra.mxu0 %v4348_v52 }
 0x729   :  { %4350 = vmatprep.subr.bf16.mxu0 %v7639_v5 }
 0x72b   :  { %4064 = vmatmul.mubr.f32.gmra.mrb[234].mxu0 %v3115_v40 }
 0x72c   :  { %4066 = vmatprep.mubr.f32.mxu0 %v3116_v35  ;;  %4352 = vmatpush3.bf16.msra.mxu0 %v4351_v3 }
 0x72d   :  { %4353 = vmatprep.subr.bf16.mxu0 %v7639_v5 }
 0x72f   :  { %4067 = vmatmul.mubr.f32.gmra.mrb[236].mxu0 %v3117_v12 }
 0x730   :  { %4069 = vmatprep.mubr.f32.mxu0 %v3118_v8  ;;  %4355 = vmatpush3.bf16.msra.mxu0 %v4354_v30 }
 0x731   :  { %4356 = vmatprep.subr.bf16.mxu0 %v7639_v5 }
 0x733   :  { %4070 = vmatmul.mubr.f32.gmra.mrb[238].mxu0 %v3119_v57 }
 0x734   :  { %4358 = vmatpush3.bf16.msra.mxu0 %v4357_v23  ;;  %4104 = vmatprep.mubr.msk.f32.mxu0 %vm4521_vm1, %v4522_v28 }
 0x735   :  { %4359 = vmatprep.subr.bf16.mxu0 %v7639_v5 }
 0x738   :  { %4361 = vmatpush3.bf16.msra.mxu0 %v4360_v60 }
 0x739   :  { %4362 = vmatprep.subr.bf16.mxu0 %v7639_v5 }
 0x73c   :  { %4364 = vmatpush3.bf16.msra.mxu0 %v4363_v37 }
 0x7f2   :  { %v4056_v10 = vpop.f32.mrb[228].mxu0 }
 0x7f3   :  { %v3186_v14 = vpop.f32.mrb[229].mxu0 }
 0x7f6   :  { %v4059_v39 = vpop.f32.mrb[230].mxu0 }
 0x7f7   :  { %v3245_v24 = vmax.f32 %v3186_v14, %v4059_v39  ;;  %v3196_v22 = vpop.f32.mrb[231].mxu0 }
 0x7fa   :  { %v4062_v5 = vpop.f32.mrb[232].mxu0 }
 0x7fb   :  { %v3247_v13 = vmax.f32 %v3196_v22, %v4062_v5  ;;  %v3206_v45 = vpop.f32.mrb[233].mxu0 }
 0x7fc   :  { %v3246_v4 = vmax.f32 %v4056_v10, %v3206_v45 }
 0x7fe   :  { %v4065_v21 = vpop.f32.mrb[234].mxu0 }
 0x7ff   :  { %v3216_v17 = vpop.f32.mrb[235].mxu0 }
 0x802   :  { %v4068_v50 = vpop.f32.mrb[236].mxu0 }
 0x803   :  { %v3248_v43 = vmax.f32 %v3216_v17, %v4068_v50  ;;  %v3226_v33 = vpop.f32.mrb[237].mxu0 }
 0x805   :  { %v3251_v38 = vmax.f32 %v3245_v24, %v3248_v43 }
 0x806   :  { %v4071_v61 = vpop.f32.mrb[238].mxu0 }
 0x807   :  { %v3250_v19 = vmax.f32 %v3226_v33, %v4071_v61  ;;  %v3236_v6 = vpop.f32.mrb[239].mxu0  ;;  %4105 = vmatmul.mubr.f32.vlgmr.msra.gmra.mrb[240].mxu0 %v3251_v38 }
 0x808   :  { %v3249_v47 = vmax.f32 %v4065_v21, %v3236_v6  ;;  %4107 = vmatprep.mubr.msk.f32.mxu0 %vm4521_vm1, %v4522_v28 }
 0x809   :  { %v3253_v34 = vmax.f32 %v3247_v13, %v3250_v19 }
 0x80a   :  { %v3252_v18 = vmax.f32 %v3246_v4, %v3249_v47 }
 0x80c   :  { %4108 = vmatmul.mubr.f32.gmra.mrb[242].mxu0 %v3252_v18 }
 0x80d   :  { %4110 = vmatprep.mubr.msk.f32.mxu0 %vm4521_vm1, %v4522_v28 }
 0x810   :  { %4111 = vmatmul.mubr.f32.gmra.mrb[244].mxu0 %v3253_v34 }
 0x8da   :  { %v3343_v25 = vpop.f32.mrb[240].mxu0 }
 0x8db   :  { %v3344_v59 = vadd.f32 %v3440_v27, %v3343_v25  ;;  %v4106_v16 = vpop.f32.mrb[241].mxu0 }
 0x8dd   :  { %v3357_v51 = vmul.f32 0.5, %v3344_v59 }
 0x8df   :  { %4514 = vtanh.f32 %v3357_v51  ;;  %v3348_v9 = vpop.f32.mrb[242].mxu0 }
 0x8e0   :  { %v3349_v53 = vadd.f32 %v3440_v27, %v3348_v9  ;;  %v4109_v26 = vpop.f32.mrb[243].mxu0 }
 0x8e2   :  { %v3358_v29 = vmul.f32 0.5, %v3349_v53 }
 0x8e3   :  { %v3353_v54 = vpop.f32.mrb[244].mxu0 }
 0x8e4   :  { %4516 = vtanh.f32 %v3358_v29  ;;  %v3354_v58 = vadd.f32 %v3440_v27, %v3353_v54  ;;  %v4112_v31 = vpop.f32.mrb[245].mxu0 }
 0x8e6   :  { %v3359_v48 = vmul.f32 0.5, %v3354_v58 }
 0x8e8   :  { %4518 = vtanh.f32 %v3359_v48 }
 0x8e9   :  { %v4515_v44 = vpop.eup %4514 }
 0x8ea   :  { %v3363_v20 = vmul.f32 0.5, %v4515_v44 }
 0x8ec   :  { %v3366_v55 = vadd.f32 0.5, %v3363_v20 }
 0x8ee   :  { %v4517_v0 = vpop.eup %4516  ;;  %3369 = vst [vmem:[%s7516_s12] sm:$0xff] %v3366_v55 }
 0x8ef   :  { %v3364_v41 = vmul.f32 0.5, %v4517_v0 }
 0x8f1   :  { %v3367_v42 = vadd.f32 0.5, %v3364_v41 }
 0x8f2   :  { %v4519_v15 = vpop.eup %4518 }
 0x8f3   :  { %3370 = vst [vmem:[%s7516_s12 + $0x8] sm:$0xff] %v3367_v42  ;;  %v3365_v52 = vmul.f32 0.5, %v4519_v15 }
 0x8f5   :  { %v3368_v49 = vadd.f32 0.5, %v3365_v52 }
 0x8f7   :  { %3371 = vst [vmem:[%s7516_s12 + $0x10] sm:$0xff] %v3368_v49 }

</bundles_post_ra>
